<compile_context>
chip_gen: v7x
topology: tpu7x:2x2x1
jax: 0.10.0
libtpu: 0.0.40
codegen_flags: <defaults>
</compile_context>

<pallas_src>
import functools
import math

import jax
import jax.numpy as jnp
from jax import lax
from jax.experimental import pallas as pl
from jax.experimental.pallas import tpu as pltpu

_LN_EPS = 1e-5
_SQRT2 = math.sqrt(2.0)
_BF16 = jnp.bfloat16
_F32 = jnp.float32


# ------------------------- in-kernel helper math ---------------------------

def _ln(y, gamma, beta):
    # PyTorch LayerNorm (biased variance, eps=1e-5), all f32.
    mean = jnp.mean(y, axis=-1, keepdims=True)
    var = jnp.mean((y - mean) ** 2, axis=-1, keepdims=True)
    return (y - mean) * lax.rsqrt(var + _LN_EPS) * gamma + beta


def _gelu(h):
    # exact erf GELU, matches F.gelu default
    return 0.5 * h * (1.0 + lax.erf(h / _SQRT2))


def _mm(a_f32, w_ref, b_ref):
    # bf16 MXU inputs, f32 accumulation, f32 bias add.
    return (jnp.dot(a_f32.astype(_BF16), w_ref[...],
                    preferred_element_type=_F32) + b_ref[...])


def _softmax_rows(s):
    s = s - jnp.max(s, axis=-1, keepdims=True)
    p = jnp.exp(s)
    return p * pl.reciprocal(jnp.sum(p, axis=-1, keepdims=True), approx=True)


# --------------------------- fused encoder stack ----------------------------

def _encoder_stack_kernel(ts_ref, wi_ref, bi_ref, pe_ref, iln_ref,
                          wqkv_ref, bqkv_ref, wo_ref, bo_ref, ln1_ref,
                          w1_ref, b1_ref, w2_ref, b2_ref, ln2_ref,
                          o_ref, *, B, S, nhead, Dh, scale):
    D = nhead * Dh
    l = pl.program_id(0)

    # --- grid step 0: input projection + positional encoding + input LN ----
    @pl.when(l == 0)
    def _():
        h = _mm(ts_ref[...], wi_ref, bi_ref) + pe_ref[...]
        o_ref[...] = _ln(h, iln_ref[0:1, :], iln_ref[1:2, :])

    x = o_ref[...]                                      # (B*S, D) f32, resident

    # --- self-attention: packed QKV kept as register value, lane-dense heads
    qkv = _mm(x, wqkv_ref, bqkv_ref)                    # (B*S, 3D) f32
    lane = lax.broadcasted_iota(jnp.int32, (S, D), 1)
    head_masks = [(lane >= h * Dh) & (lane < (h + 1) * Dh) for h in range(nhead)]

    attn_blocks = []
    for b in range(B):
        r0, r1 = b * S, (b + 1) * S
        q_b = qkv[r0:r1, 0:D]                           # (S, D) f32
        k_b = qkv[r0:r1, D:2 * D].astype(_BF16)         # (S, D) bf16
        v_b = qkv[r0:r1, 2 * D:3 * D].astype(_BF16)     # (S, D) bf16
        acc = jnp.zeros((S, D), _F32)
        for h in range(nhead):
            # mask non-head lanes of Q -> contraction over 128 lanes equals the
            # per-head (Dh-lane) contraction, with no sub-128 lane slicing.
            q_h = jnp.where(head_masks[h], q_b, 0.0).astype(_BF16)
            s = lax.dot_general(q_h, k_b, (((1,), (1,)), ((), ())),
                                preferred_element_type=_F32) * scale   # (S, S)
            p = _softmax_rows(s)
            o_h = jnp.dot(p.astype(_BF16), v_b, preferred_element_type=_F32)
            acc = acc + jnp.where(head_masks[h], o_h, 0.0)
        attn_blocks.append(acc)
    attn = jnp.concatenate(attn_blocks, axis=0)         # (B*S, D) lane-dense

    # --- out-projection + residual + LN, then FFN + residual + LN ----------
    x1 = _ln(x + _mm(attn, wo_ref, bo_ref), ln1_ref[0:1, :], ln1_ref[1:2, :])
    ff = _mm(_gelu(_mm(x1, w1_ref, b1_ref)), w2_ref, b2_ref)
    o_ref[...] = _ln(x1 + ff, ln2_ref[0:1, :], ln2_ref[1:2, :])


def encoder_stack(ts2, pe, params, B, S, nhead):
    M, _ = ts2.shape
    D = pe.shape[1]
    ep = params["enc"]
    L = ep["wqkv"].shape[0]
    Dh = D // nhead

    def c_spec(shape):      # layer-invariant input: loaded once, kept resident
        n = len(shape)
        return pl.BlockSpec(shape, lambda l, n=n: (0,) * n)

    def l_spec(shape):      # layer-stacked weight: leading L axis, squeezed
        n = len(shape)
        return pl.BlockSpec((None,) + tuple(shape[1:]),
                            lambda l, n=n: (l,) + (0,) * (n - 1))

    layer_keys = ("wqkv", "bqkv", "wo", "bo", "ln1", "w1", "b1", "w2", "b2", "ln2")
    in_specs = [c_spec(ts2.shape), c_spec(params["in_proj_w"].shape),
                c_spec(params["in_proj_b"].shape), c_spec(pe.shape),
                c_spec(params["in_ln"].shape)]
    in_specs += [l_spec(ep[k].shape) for k in layer_keys]

    return pl.pallas_call(
        functools.partial(_encoder_stack_kernel, B=B, S=S, nhead=nhead, Dh=Dh,
                          scale=1.0 / math.sqrt(Dh)),
        grid=(L,),
        in_specs=in_specs,
        out_specs=pl.BlockSpec((M, D), lambda l: (0, 0)),   # resident accumulator
        out_shape=jax.ShapeDtypeStruct((M, D), _F32),
        compiler_params=pltpu.CompilerParams(dimension_semantics=("arbitrary",)),
    )(ts2, params["in_proj_w"], params["in_proj_b"], pe, params["in_ln"],
      *[ep[k] for k in layer_keys])


# --------------------------- fused decoder stack ----------------------------

def _decoder_stack_kernel(tgt_ref, mem_ref, hw_ref, hb_ref,
                          wv_ref, bv_ref, wo_ref, bo_ref, ln1_ref,
                          cwq_ref, cbq_ref, cwkv_ref, cbkv_ref, cwo_ref,
                          cbo_ref, ln2_ref,
                          w1_ref, b1_ref, w2_ref, b2_ref, ln3_ref,
                          pred_ref, x_s, *, B, S, nhead, Dh, scale):
    D = nhead * Dh
    l = pl.program_id(0)
    nl = pl.num_programs(0)

    @pl.when(l == 0)
    def _():
        x_s[...] = tgt_ref[...]                          # (B, D) initial target

    x = x_s[...]

    # Self-attention with tgt_len == 1 and no mask: softmax over a single key
    # is exactly 1, so the block reduces to out_proj(V_proj(x)).  Exact.
    sa = _mm(_mm(x, wv_ref, bv_ref), wo_ref, bo_ref)
    x1 = _ln(x + sa, ln1_ref[0:1, :], ln1_ref[1:2, :])

    # Cross-attention vs encoder memory: one query row per (batch, head) ->
    # scores via lane-masked VPU multiply + lane reduce, output via p-weighted
    # sublane reduce of V.  No MXU, no attention scratch.
    q = _mm(x1, cwq_ref, cbq_ref)                        # (B, D)
    kv = _mm(mem_ref[...], cwkv_ref, cbkv_ref)           # (B*S, 2D)
    lane_s = lax.broadcasted_iota(jnp.int32, (S, D), 1)
    lane_1 = lax.broadcasted_iota(jnp.int32, (1, D), 1)
    masks_s = [(lane_s >= h * Dh) & (lane_s < (h + 1) * Dh) for h in range(nhead)]
    masks_1 = [(lane_1 >= h * Dh) & (lane_1 < (h + 1) * Dh) for h in range(nhead)]

    rows = []
    for b in range(B):
        r0, r1 = b * S, (b + 1) * S
        k_b = kv[r0:r1, 0:D]                             # (S, D)
        v_b = kv[r0:r1, D:2 * D]                         # (S, D)
        qk = q[b:b + 1, :] * k_b                         # (S, D)
        row = jnp.zeros((1, D), _F32)
        for h in range(nhead):
            s_h = jnp.sum(jnp.where(masks_s[h], qk, 0.0),
                          axis=1, keepdims=True) * scale           # (S, 1)
            s_h = s_h - jnp.max(s_h, axis=0, keepdims=True)
            p_h = jnp.exp(s_h)
            p_h = p_h * pl.reciprocal(jnp.sum(p_h, axis=0, keepdims=True),
                                      approx=True)                  # (S, 1)
            o_h = jnp.sum(p_h * v_b, axis=0, keepdims=True)         # (1, D)
            row = row + jnp.where(masks_1[h], o_h, 0.0)
        rows.append(row)
    attn = jnp.concatenate(rows, axis=0)                 # (B, D) lane-dense

    x2 = _ln(x1 + _mm(attn, cwo_ref, cbo_ref), ln2_ref[0:1, :], ln2_ref[1:2, :])
    ff = _mm(_gelu(_mm(x2, w1_ref, b1_ref)), w2_ref, b2_ref)
    x3 = _ln(x2 + ff, ln3_ref[0:1, :], ln3_ref[1:2, :])
    x_s[...] = x3

    # --- last grid step: prediction head, lane-dense (B, 256) output -------
    @pl.when(l == nl - 1)
    def _():
        pred_ref[...] = _mm(x3, hw_ref, hb_ref)


_DEC_LAYER_KEYS = ("wv", "bv", "wo", "bo", "ln1",
                   "cwq", "cbq", "cwkv", "cbkv", "cwo", "cbo", "ln2",
                   "w1", "b1", "w2", "b2", "ln3")


def decoder_stack(tgt, mem, params, B, S, nhead):
    D = tgt.shape[1]
    dp = params["dec"]
    L = dp["wv"].shape[0]
    Dh = D // nhead
    N = params["head_w"].shape[1]

    def c_spec(shape):
        n = len(shape)
        return pl.BlockSpec(shape, lambda l, n=n: (0,) * n)

    def l_spec(shape):
        n = len(shape)
        return pl.BlockSpec((None,) + tuple(shape[1:]),
                            lambda l, n=n: (l,) + (0,) * (n - 1))

    in_specs = [c_spec(tgt.shape), c_spec(mem.shape),
                c_spec(params["head_w"].shape), c_spec(params["head_b"].shape)]
    in_specs += [l_spec(dp[k].shape) for k in _DEC_LAYER_KEYS]

    return pl.pallas_call(
        functools.partial(_decoder_stack_kernel, B=B, S=S, nhead=nhead, Dh=Dh,
                          scale=1.0 / math.sqrt(Dh)),
        grid=(L,),
        in_specs=in_specs,
        out_specs=pl.BlockSpec((B, N), lambda l: (0, 0)),
        out_shape=jax.ShapeDtypeStruct((B, N), _F32),
        scratch_shapes=[pltpu.VMEM((B, D), _F32)],       # resident decoder state
        compiler_params=pltpu.CompilerParams(dimension_semantics=("arbitrary",)),
    )(tgt, mem, params["head_w"], params["head_b"],
      *[dp[k] for k in _DEC_LAYER_KEYS])


# ----------------------------- model pieces --------------------------------

def build_input_vectors(params, hero_ids, item_ids, player_nums, team_nums):
    # glue: embedding gathers + concatenation (plain JAX)
    B, S, P, NI = item_ids.shape
    h_emb = params["hero_emb"][hero_ids]                 # (B,S,10,He)
    i_emb = params["item_emb"][item_ids]                 # (B,S,10,6,Ie)  row 0 == 0
    i_flat = i_emb.reshape(B, S, P, -1)
    p_feat = jnp.concatenate([h_emb, i_flat, player_nums], axis=-1)
    p_flat = p_feat.reshape(B, S, -1)
    t_flat = team_nums.reshape(B, S, -1)
    return jnp.concatenate([p_flat, t_flat], axis=-1)


def forward(params, hero_ids, item_ids, player_nums, team_nums, *, cfg):
    B, S = hero_ids.shape[:2]
    D = cfg["model_dim"]
    nhead = cfg["nhead"]
    out_dim = 10 * cfg["num_player_numeric"] + 2 * cfg["num_team_numeric"]

    ts = build_input_vectors(params, hero_ids, item_ids, player_nums, team_nums)
    ts2 = ts.reshape(B * S, -1)
    pad = params["in_proj_w"].shape[0] - ts2.shape[1]
    if pad:  # lane-align the contraction dim (892 -> 896); padded weight rows are zero
        ts2 = jnp.pad(ts2, ((0, 0), (0, pad)))

    pe = jnp.broadcast_to(params["pos_enc"][None, :S, :], (B, S, D)).reshape(B * S, D)

    # Fused encoder stack (input proj + PE + input LN folded into grid step 0).
    mem = encoder_stack(ts2, pe, params, B, S, nhead)    # (B*S, D)

    # Decoder target: SOS token + positional encoding, tgt_len == 1.
    tgt = jnp.broadcast_to(params["sos"], (B, D)) + params["pos_enc"][0:1, :]
    assert tgt.shape == (B, D)  # decoder self-attn shortcut requires tgt_len == 1

    # Fused decoder stack (pred head folded into the last grid step).
    out = decoder_stack(tgt, mem, params, B, S, nhead)   # (B, 256) lane-dense
    return out[:, :out_dim]                              # slice padding in plain JAX


# ----------------------------- parameter init ------------------------------

def _w(key, shape, scale=0.02):
    return scale * jax.random.normal(key, shape, dtype=_F32)


def _ln_params(D):
    # row 0: gamma, row 1: beta
    return jnp.stack([jnp.ones((D,), _F32), jnp.zeros((D,), _F32)])


def _enc_layer_params(key, D, FF):
    ks = jax.random.split(key, 4)
    return dict(
        wqkv=_w(ks[0], (D, 3 * D)).astype(_BF16), bqkv=jnp.zeros((1, 3 * D), _F32),
        wo=_w(ks[1], (D, D)).astype(_BF16), bo=jnp.zeros((1, D), _F32),
        ln1=_ln_params(D),
        w1=_w(ks[2], (D, FF)).astype(_BF16), b1=jnp.zeros((1, FF), _F32),
        w2=_w(ks[3], (FF, D)).astype(_BF16), b2=jnp.zeros((1, D), _F32),
        ln2=_ln_params(D),
    )


def _dec_layer_params(key, D, FF):
    ks = jax.random.split(key, 7)
    # Self-attn q/k projections are omitted: with tgt_len==1 and no mask the
    # forward pass depends only on the V and output projections (exact identity).
    return dict(
        wv=_w(ks[0], (D, D)).astype(_BF16), bv=jnp.zeros((1, D), _F32),
        wo=_w(ks[1], (D, D)).astype(_BF16), bo=jnp.zeros((1, D), _F32),
        ln1=_ln_params(D),
        cwq=_w(ks[2], (D, D)).astype(_BF16), cbq=jnp.zeros((1, D), _F32),
        cwkv=_w(ks[3], (D, 2 * D)).astype(_BF16), cbkv=jnp.zeros((1, 2 * D), _F32),
        cwo=_w(ks[4], (D, D)).astype(_BF16), cbo=jnp.zeros((1, D), _F32),
        ln2=_ln_params(D),
        w1=_w(ks[5], (D, FF)).astype(_BF16), b1=jnp.zeros((1, FF), _F32),
        w2=_w(ks[6], (FF, D)).astype(_BF16), b2=jnp.zeros((1, D), _F32),
        ln3=_ln_params(D),
    )


def init_params(key, cfg):
    D, FF = cfg["model_dim"], cfg["ff_dim"]
    He, Ie = cfg["hero_emb_dim"], cfg["item_emb_dim"]
    input_dim = 10 * (He + 6 * Ie + cfg["num_player_numeric"]) + 2 * cfg["num_team_numeric"]
    input_dim_pad = ((input_dim + 127) // 128) * 128
    out_dim = 10 * cfg["num_player_numeric"] + 2 * cfg["num_team_numeric"]
    out_dim_pad = ((out_dim + 127) // 128) * 128

    keys = jax.random.split(key, 4 + 2 * cfg["num_layers"])
    hero_emb = _w(keys[0], (cfg["hero_vocab"], He), scale=1.0)
    item_emb = _w(keys[1], (cfg["item_vocab"], Ie), scale=1.0)
    item_emb = item_emb.at[0].set(0.0)  # padding_idx=0

    # sinusoidal positional encoding (exactly as in the module)
    Smax = cfg["max_seq_len"]
    position = jnp.arange(Smax, dtype=_F32)[:, None]
    div_term = jnp.exp(jnp.arange(0, D, 2, dtype=_F32) * -(math.log(10000.0) / D))
    pe = jnp.zeros((Smax, D), _F32)
    pe = pe.at[:, 0::2].set(jnp.sin(position * div_term))
    pe = pe.at[:, 1::2].set(jnp.cos(position * div_term))

    in_w = jnp.pad(_w(keys[2], (input_dim, D)),
                   ((0, input_dim_pad - input_dim), (0, 0))).astype(_BF16)
    head_w = jnp.pad(_w(keys[3], (D, out_dim)),
                     ((0, 0), (0, out_dim_pad - out_dim))).astype(_BF16)

    nl = cfg["num_layers"]
    enc_layers = [_enc_layer_params(keys[4 + i], D, FF) for i in range(nl)]
    dec_layers = [_dec_layer_params(keys[4 + nl + i], D, FF) for i in range(nl)]
    # Stack per-layer weights along a leading L axis for the layer-grid kernels.
    enc = jax.tree_util.tree_map(lambda *xs: jnp.stack(xs, axis=0), *enc_layers)
    dec = jax.tree_util.tree_map(lambda *xs: jnp.stack(xs, axis=0), *dec_layers)

    return dict(
        hero_emb=hero_emb, item_emb=item_emb, pos_enc=pe,
        in_proj_w=in_w, in_proj_b=jnp.zeros((1, D), _F32),
        in_ln=_ln_params(D),
        sos=jnp.zeros((1, D), _F32),
        head_w=head_w, head_b=jnp.zeros((1, out_dim_pad), _F32),
        enc=enc, dec=dec,
    )


# --------------------------------- main -------------------------------------

if __name__ == "__main__":
    cfg = dict(
        hero_vocab=32, item_vocab=40, max_seq_len=16,
        hero_emb_dim=16, item_emb_dim=8,
        num_player_numeric=19, num_team_numeric=31,
        model_dim=128, nhead=4, ff_dim=256, num_layers=2,
    )
    B, S = 2, 8

    key = jax.random.PRNGKey(0)
    k_param, k_h, k_i, k_p, k_t = jax.random.split(key, 5)
    params = init_params(k_param, cfg)

    hero_ids = jax.random.randint(k_h, (B, S, 10), 0, cfg["hero_vocab"], dtype=jnp.int32)
    item_ids = jax.random.randint(k_i, (B, S, 10, 6), 0, cfg["item_vocab"], dtype=jnp.int32)
    player_nums = jax.random.normal(k_p, (B, S, 10, cfg["num_player_numeric"]), dtype=_F32)
    team_nums = jax.random.normal(k_t, (B, S, 2, cfg["num_team_numeric"]), dtype=_F32)

    fwd = jax.jit(functools.partial(forward, cfg=cfg))
    out = jax.block_until_ready(fwd(params, hero_ids, item_ids, player_nums, team_nums))

    expected_out_dim = 10 * cfg["num_player_numeric"] + 2 * cfg["num_team_numeric"]
    assert out.shape == (B, expected_out_dim), out.shape
    assert bool(jnp.all(jnp.isfinite(out)))
    print("KERNEL_OK")
</pallas_src>

<mosaic_0001>
module attributes {stable_mosaic.version = 11 : i64} {
  func.func @_encoder_stack_kernel(%arg0: i32, %arg1: memref<16x896xf32, #tpu.memory_space<vmem>>, %arg2: memref<896x128xbf16, #tpu.memory_space<vmem>>, %arg3: memref<1x128xf32, #tpu.memory_space<vmem>>, %arg4: memref<16x128xf32, #tpu.memory_space<vmem>>, %arg5: memref<2x128xf32, #tpu.memory_space<vmem>>, %arg6: memref<1x128x384xbf16, #tpu.memory_space<vmem>>, %arg7: memref<1x1x384xf32, #tpu.memory_space<vmem>>, %arg8: memref<1x128x128xbf16, #tpu.memory_space<vmem>>, %arg9: memref<1x1x128xf32, #tpu.memory_space<vmem>>, %arg10: memref<1x2x128xf32, #tpu.memory_space<vmem>>, %arg11: memref<1x128x256xbf16, #tpu.memory_space<vmem>>, %arg12: memref<1x1x256xf32, #tpu.memory_space<vmem>>, %arg13: memref<1x256x128xbf16, #tpu.memory_space<vmem>>, %arg14: memref<1x1x128xf32, #tpu.memory_space<vmem>>, %arg15: memref<1x2x128xf32, #tpu.memory_space<vmem>>, %arg16: memref<16x128xf32, #tpu.memory_space<vmem>>) attributes {dimension_semantics = [#tpu.dimension_semantics<arbitrary>], iteration_bounds = array<i64: 2>, scalar_prefetch = 0 : i64, scratch_operands = 0 : i64, tpu.core_type = #tpu.core_type<tc>, window_params = [{pipeline_mode = #tpu.pipeline_mode<synchronous>, transform_indices = @transform_0, window_bounds = array<i64: 16, 896>}, {pipeline_mode = #tpu.pipeline_mode<synchronous>, transform_indices = @transform_1, window_bounds = array<i64: 896, 128>}, {pipeline_mode = #tpu.pipeline_mode<synchronous>, transform_indices = @transform_2, window_bounds = array<i64: 1, 128>}, {pipeline_mode = #tpu.pipeline_mode<synchronous>, transform_indices = @transform_3, window_bounds = array<i64: 16, 128>}, {pipeline_mode = #tpu.pipeline_mode<synchronous>, transform_indices = @transform_4, window_bounds = array<i64: 2, 128>}, {transform_indices = @transform_5, window_bounds = array<i64: 1, 128, 384>}, {transform_indices = @transform_6, window_bounds = array<i64: 1, 1, 384>}, {transform_indices = @transform_7, window_bounds = array<i64: 1, 128, 128>}, {transform_indices = @transform_8, window_bounds = array<i64: 1, 1, 128>}, {transform_indices = @transform_9, window_bounds = array<i64: 1, 2, 128>}, {transform_indices = @transform_10, window_bounds = array<i64: 1, 128, 256>}, {transform_indices = @transform_11, window_bounds = array<i64: 1, 1, 256>}, {transform_indices = @transform_12, window_bounds = array<i64: 1, 256, 128>}, {transform_indices = @transform_13, window_bounds = array<i64: 1, 1, 128>}, {transform_indices = @transform_14, window_bounds = array<i64: 1, 2, 128>}, {pipeline_mode = #tpu.pipeline_mode<synchronous>, transform_indices = @transform_15, window_bounds = array<i64: 16, 128>}]} {
    %c0_i32 = arith.constant 0 : i32
    %0 = arith.cmpi eq, %arg0, %c0_i32 : i32
    %1 = arith.extui %0 : i1 to i32
    %c0_i32_0 = arith.constant 0 : i32
    %2 = arith.cmpi ne, %1, %c0_i32_0 : i32
    scf.if %2 {
      %c0_117 = arith.constant 0 : index
      %c0_118 = arith.constant 0 : index
      %301 = vector.load %arg1[%c0_117, %c0_118] : memref<16x896xf32, #tpu.memory_space<vmem>>, vector<16x896xf32>
      %302 = arith.truncf %301 : vector<16x896xf32> to vector<16x896xbf16>
      %c0_119 = arith.constant 0 : index
      %c0_120 = arith.constant 0 : index
      %303 = vector.load %arg2[%c0_119, %c0_120] : memref<896x128xbf16, #tpu.memory_space<vmem>>, vector<896x128xbf16>
      %cst_121 = arith.constant dense<0.000000e+00> : vector<16x128xf32>
      %304 = tpu.matmul %302, %303, %cst_121 {dimension_numbers = #tpu.dot_dimension_numbers<[1], [0], [0], [1], [0, 0, 1, 1], [], []>} : vector<16x896xbf16>, vector<896x128xbf16>, vector<16x128xf32> -> vector<16x128xf32>
      %c0_122 = arith.constant 0 : index
      %c0_123 = arith.constant 0 : index
      %305 = vector.load %arg3[%c0_122, %c0_123] : memref<1x128xf32, #tpu.memory_space<vmem>>, vector<1x128xf32>
      %306 = vector.broadcast %305 : vector<1x128xf32> to vector<16x128xf32>
      %307 = arith.addf %304, %306 : vector<16x128xf32>
      %c0_124 = arith.constant 0 : index
      %c0_125 = arith.constant 0 : index
      %308 = vector.load %arg4[%c0_124, %c0_125] : memref<16x128xf32, #tpu.memory_space<vmem>>, vector<16x128xf32>
      %309 = arith.addf %307, %308 : vector<16x128xf32>
      %c0_126 = arith.constant 0 : index
      %c0_127 = arith.constant 0 : index
      %310 = vector.load %arg5[%c0_126, %c0_127] : memref<2x128xf32, #tpu.memory_space<vmem>>, vector<1x128xf32>
      %c1_128 = arith.constant 1 : index
      %c0_129 = arith.constant 0 : index
      %311 = vector.load %arg5[%c1_128, %c0_129] : memref<2x128xf32, #tpu.memory_space<vmem>>, vector<1x128xf32>
      %cst_130 = arith.constant dense<0.000000e+00> : vector<16xf32>
      %312 = vector.multi_reduction <add>, %309, %cst_130 [1] : vector<16x128xf32> to vector<16xf32>
      %313 = vector.shape_cast %312 : vector<16xf32> to vector<16x1xf32>
      %cst_131 = arith.constant 1.280000e+02 : f32
      %314 = vector.broadcast %cst_131 : f32 to vector<16x1xf32>
      %315 = arith.divf %313, %314 : vector<16x1xf32>
      %316 = vector.broadcast %315 : vector<16x1xf32> to vector<16x128xf32>
      %317 = arith.subf %309, %316 : vector<16x128xf32>
      %318 = arith.mulf %317, %317 : vector<16x128xf32>
      %cst_132 = arith.constant dense<0.000000e+00> : vector<16xf32>
      %319 = vector.multi_reduction <add>, %318, %cst_132 [1] : vector<16x128xf32> to vector<16xf32>
      %320 = vector.shape_cast %319 : vector<16xf32> to vector<16x1xf32>
      %cst_133 = arith.constant 1.280000e+02 : f32
      %321 = vector.broadcast %cst_133 : f32 to vector<16x1xf32>
      %322 = arith.divf %320, %321 : vector<16x1xf32>
      %323 = vector.broadcast %315 : vector<16x1xf32> to vector<16x128xf32>
      %324 = arith.subf %309, %323 : vector<16x128xf32>
      %cst_134 = arith.constant 9.99999974E-6 : f32
      %325 = vector.broadcast %cst_134 : f32 to vector<16x1xf32>
      %326 = arith.addf %322, %325 : vector<16x1xf32>
      %327 = math.rsqrt %326 : vector<16x1xf32>
      %328 = vector.broadcast %327 : vector<16x1xf32> to vector<16x128xf32>
      %329 = arith.mulf %324, %328 : vector<16x128xf32>
      %330 = vector.broadcast %310 : vector<1x128xf32> to vector<16x128xf32>
      %331 = arith.mulf %329, %330 : vector<16x128xf32>
      %332 = vector.broadcast %311 : vector<1x128xf32> to vector<16x128xf32>
      %333 = arith.addf %331, %332 : vector<16x128xf32>
      %c0_135 = arith.constant 0 : index
      %c0_136 = arith.constant 0 : index
      %334 = vector.load %arg16[%c0_135, %c0_136] : memref<16x128xf32, #tpu.memory_space<vmem>>, vector<16x128xf32>
      tpu.vector_store %arg16[%c0_135, %c0_136], %333 {strides = array<i32>} : memref<16x128xf32, #tpu.memory_space<vmem>>, vector<16x128xf32>,
    } else {
    }
    %c0 = arith.constant 0 : index
    %c0_1 = arith.constant 0 : index
    %3 = vector.load %arg16[%c0, %c0_1] : memref<16x128xf32, #tpu.memory_space<vmem>>, vector<16x128xf32>
    %4 = arith.truncf %3 : vector<16x128xf32> to vector<16x128xbf16>
    %c0_2 = arith.constant 0 : index
    %c0_3 = arith.constant 0 : index
    %c0_4 = arith.constant 0 : index
    %5 = vector.load %arg6[%c0_2, %c0_3, %c0_4] : memref<1x128x384xbf16, #tpu.memory_space<vmem>>, vector<1x128x384xbf16>
    %6 = vector.shape_cast %5 : vector<1x128x384xbf16> to vector<128x384xbf16>
    %cst = arith.constant dense<0.000000e+00> : vector<16x384xf32>
    %7 = tpu.matmul %4, %6, %cst {dimension_numbers = #tpu.dot_dimension_numbers<[1], [0], [0], [1], [0, 0, 1, 1], [], []>} : vector<16x128xbf16>, vector<128x384xbf16>, vector<16x384xf32> -> vector<16x384xf32>
    %c0_5 = arith.constant 0 : index
    %c0_6 = arith.constant 0 : index
    %c0_7 = arith.constant 0 : index
    %8 = vector.load %arg7[%c0_5, %c0_6, %c0_7] : memref<1x1x384xf32, #tpu.memory_space<vmem>>, vector<1x1x384xf32>
    %9 = vector.shape_cast %8 : vector<1x1x384xf32> to vector<1x384xf32>
    %10 = vector.broadcast %9 : vector<1x384xf32> to vector<16x384xf32>
    %11 = arith.addf %7, %10 : vector<16x384xf32>
    %12 = tpu.iota {dimensions = array<i32: 1>} : vector<8x128xi32>
    %c0_i32_8 = arith.constant 0 : i32
    %13 = vector.broadcast %c0_i32_8 : i32 to vector<8x128xi32>
    %14 = arith.cmpi sge, %12, %13 : vector<8x128xi32>
    %c32_i32 = arith.constant 32 : i32
    %15 = vector.broadcast %c32_i32 : i32 to vector<8x128xi32>
    %16 = arith.cmpi slt, %12, %15 : vector<8x128xi32>
    %17 = arith.andi %14, %16 : vector<8x128xi1>
    %c32_i32_9 = arith.constant 32 : i32
    %18 = vector.broadcast %c32_i32_9 : i32 to vector<8x128xi32>
    %19 = arith.cmpi sge, %12, %18 : vector<8x128xi32>
    %c64_i32 = arith.constant 64 : i32
    %20 = vector.broadcast %c64_i32 : i32 to vector<8x128xi32>
    %21 = arith.cmpi slt, %12, %20 : vector<8x128xi32>
    %22 = arith.andi %19, %21 : vector<8x128xi1>
    %c64_i32_10 = arith.constant 64 : i32
    %23 = vector.broadcast %c64_i32_10 : i32 to vector<8x128xi32>
    %24 = arith.cmpi sge, %12, %23 : vector<8x128xi32>
    %c96_i32 = arith.constant 96 : i32
    %25 = vector.broadcast %c96_i32 : i32 to vector<8x128xi32>
    %26 = arith.cmpi slt, %12, %25 : vector<8x128xi32>
    %27 = arith.andi %24, %26 : vector<8x128xi1>
    %c96_i32_11 = arith.constant 96 : i32
    %28 = vector.broadcast %c96_i32_11 : i32 to vector<8x128xi32>
    %29 = arith.cmpi sge, %12, %28 : vector<8x128xi32>
    %c128_i32 = arith.constant 128 : i32
    %30 = vector.broadcast %c128_i32 : i32 to vector<8x128xi32>
    %31 = arith.cmpi slt, %12, %30 : vector<8x128xi32>
    %32 = arith.andi %29, %31 : vector<8x128xi1>
    %33 = vector.extract_strided_slice %11 {offsets = [0, 0], sizes = [8, 128], strides = [1, 1]} : vector<16x384xf32> to vector<8x128xf32>
    %34 = vector.extract_strided_slice %11 {offsets = [0, 128], sizes = [8, 128], strides = [1, 1]} : vector<16x384xf32> to vector<8x128xf32>
    %35 = arith.truncf %34 : vector<8x128xf32> to vector<8x128xbf16>
    %36 = vector.extract_strided_slice %11 {offsets = [0, 256], sizes = [8, 128], strides = [1, 1]} : vector<16x384xf32> to vector<8x128xf32>
    %37 = arith.truncf %36 : vector<8x128xf32> to vector<8x128xbf16>
    %cst_12 = arith.constant 0.000000e+00 : f32
    %38 = vector.broadcast %cst_12 : f32 to vector<8x128xf32>
    %cst_13 = arith.constant 0.000000e+00 : f32
    %39 = vector.broadcast %cst_13 : f32 to vector<8x128xf32>
    %40 = arith.select %17, %33, %39 : vector<8x128xi1>, vector<8x128xf32>
    %41 = arith.truncf %40 : vector<8x128xf32> to vector<8x128xbf16>
    %cst_14 = arith.constant dense<0.000000e+00> : vector<8x8xf32>
    %42 = tpu.matmul %41, %35, %cst_14 {dimension_numbers = #tpu.dot_dimension_numbers<[1], [1], [0], [0], [0, 0, 1, 0], [], []>} : vector<8x128xbf16>, vector<8x128xbf16>, vector<8x8xf32> -> vector<8x8xf32>
    %cst_15 = arith.constant 0.176776692 : f32
    %43 = vector.broadcast %cst_15 : f32 to vector<8x8xf32>
    %44 = arith.mulf %42, %43 : vector<8x8xf32>
    %cst_16 = arith.constant dense<0xFF800000> : vector<8xf32>
    %45 = vector.multi_reduction <maximumf>, %44, %cst_16 [1] : vector<8x8xf32> to vector<8xf32>
    %46 = vector.shape_cast %45 : vector<8xf32> to vector<8x1xf32>
    %47 = vector.broadcast %46 : vector<8x1xf32> to vector<8x8xf32>
    %48 = arith.subf %44, %47 : vector<8x8xf32>
    %49 = math.exp %48 : vector<8x8xf32>
    %cst_17 = arith.constant dense<0.000000e+00> : vector<8xf32>
    %50 = vector.multi_reduction <add>, %49, %cst_17 [1] : vector<8x8xf32> to vector<8xf32>
    %51 = vector.shape_cast %50 : vector<8xf32> to vector<8x1xf32>
    %52 = tpu.reciprocal %51 {approx = true} : vector<8x1xf32> -> vector<8x1xf32>
    %53 = vector.broadcast %52 : vector<8x1xf32> to vector<8x8xf32>
    %54 = arith.mulf %49, %53 : vector<8x8xf32>
    %55 = arith.truncf %54 : vector<8x8xf32> to vector<8x8xbf16>
    %cst_18 = arith.constant dense<0.000000e+00> : vector<8x128xf32>
    %56 = tpu.matmul %55, %37, %cst_18 {dimension_numbers = #tpu.dot_dimension_numbers<[1], [0], [0], [1], [0, 0, 1, 1], [], []>} : vector<8x8xbf16>, vector<8x128xbf16>, vector<8x128xf32> -> vector<8x128xf32>
    %cst_19 = arith.constant 0.000000e+00 : f32
    %57 = vector.broadcast %cst_19 : f32 to vector<8x128xf32>
    %58 = arith.select %17, %56, %57 : vector<8x128xi1>, vector<8x128xf32>
    %59 = arith.addf %38, %58 : vector<8x128xf32>
    %cst_20 = arith.constant 0.000000e+00 : f32
    %60 = vector.broadcast %cst_20 : f32 to vector<8x128xf32>
    %61 = arith.select %22, %33, %60 : vector<8x128xi1>, vector<8x128xf32>
    %62 = arith.truncf %61 : vector<8x128xf32> to vector<8x128xbf16>
    %cst_21 = arith.constant dense<0.000000e+00> : vector<8x8xf32>
    %63 = tpu.matmul %62, %35, %cst_21 {dimension_numbers = #tpu.dot_dimension_numbers<[1], [1], [0], [0], [0, 0, 1, 0], [], []>} : vector<8x128xbf16>, vector<8x128xbf16>, vector<8x8xf32> -> vector<8x8xf32>
    %cst_22 = arith.constant 0.176776692 : f32
    %64 = vector.broadcast %cst_22 : f32 to vector<8x8xf32>
    %65 = arith.mulf %63, %64 : vector<8x8xf32>
    %cst_23 = arith.constant dense<0xFF800000> : vector<8xf32>
    %66 = vector.multi_reduction <maximumf>, %65, %cst_23 [1] : vector<8x8xf32> to vector<8xf32>
    %67 = vector.shape_cast %66 : vector<8xf32> to vector<8x1xf32>
    %68 = vector.broadcast %67 : vector<8x1xf32> to vector<8x8xf32>
    %69 = arith.subf %65, %68 : vector<8x8xf32>
    %70 = math.exp %69 : vector<8x8xf32>
    %cst_24 = arith.constant dense<0.000000e+00> : vector<8xf32>
    %71 = vector.multi_reduction <add>, %70, %cst_24 [1] : vector<8x8xf32> to vector<8xf32>
    %72 = vector.shape_cast %71 : vector<8xf32> to vector<8x1xf32>
    %73 = tpu.reciprocal %72 {approx = true} : vector<8x1xf32> -> vector<8x1xf32>
    %74 = vector.broadcast %73 : vector<8x1xf32> to vector<8x8xf32>
    %75 = arith.mulf %70, %74 : vector<8x8xf32>
    %76 = arith.truncf %75 : vector<8x8xf32> to vector<8x8xbf16>
    %cst_25 = arith.constant dense<0.000000e+00> : vector<8x128xf32>
    %77 = tpu.matmul %76, %37, %cst_25 {dimension_numbers = #tpu.dot_dimension_numbers<[1], [0], [0], [1], [0, 0, 1, 1], [], []>} : vector<8x8xbf16>, vector<8x128xbf16>, vector<8x128xf32> -> vector<8x128xf32>
    %cst_26 = arith.constant 0.000000e+00 : f32
    %78 = vector.broadcast %cst_26 : f32 to vector<8x128xf32>
    %79 = arith.select %22, %77, %78 : vector<8x128xi1>, vector<8x128xf32>
    %80 = arith.addf %59, %79 : vector<8x128xf32>
    %cst_27 = arith.constant 0.000000e+00 : f32
    %81 = vector.broadcast %cst_27 : f32 to vector<8x128xf32>
    %82 = arith.select %27, %33, %81 : vector<8x128xi1>, vector<8x128xf32>
    %83 = arith.truncf %82 : vector<8x128xf32> to vector<8x128xbf16>
    %cst_28 = arith.constant dense<0.000000e+00> : vector<8x8xf32>
    %84 = tpu.matmul %83, %35, %cst_28 {dimension_numbers = #tpu.dot_dimension_numbers<[1], [1], [0], [0], [0, 0, 1, 0], [], []>} : vector<8x128xbf16>, vector<8x128xbf16>, vector<8x8xf32> -> vector<8x8xf32>
    %cst_29 = arith.constant 0.176776692 : f32
    %85 = vector.broadcast %cst_29 : f32 to vector<8x8xf32>
    %86 = arith.mulf %84, %85 : vector<8x8xf32>
    %cst_30 = arith.constant dense<0xFF800000> : vector<8xf32>
    %87 = vector.multi_reduction <maximumf>, %86, %cst_30 [1] : vector<8x8xf32> to vector<8xf32>
    %88 = vector.shape_cast %87 : vector<8xf32> to vector<8x1xf32>
    %89 = vector.broadcast %88 : vector<8x1xf32> to vector<8x8xf32>
    %90 = arith.subf %86, %89 : vector<8x8xf32>
    %91 = math.exp %90 : vector<8x8xf32>
    %cst_31 = arith.constant dense<0.000000e+00> : vector<8xf32>
    %92 = vector.multi_reduction <add>, %91, %cst_31 [1] : vector<8x8xf32> to vector<8xf32>
    %93 = vector.shape_cast %92 : vector<8xf32> to vector<8x1xf32>
    %94 = tpu.reciprocal %93 {approx = true} : vector<8x1xf32> -> vector<8x1xf32>
    %95 = vector.broadcast %94 : vector<8x1xf32> to vector<8x8xf32>
    %96 = arith.mulf %91, %95 : vector<8x8xf32>
    %97 = arith.truncf %96 : vector<8x8xf32> to vector<8x8xbf16>
    %cst_32 = arith.constant dense<0.000000e+00> : vector<8x128xf32>
    %98 = tpu.matmul %97, %37, %cst_32 {dimension_numbers = #tpu.dot_dimension_numbers<[1], [0], [0], [1], [0, 0, 1, 1], [], []>} : vector<8x8xbf16>, vector<8x128xbf16>, vector<8x128xf32> -> vector<8x128xf32>
    %cst_33 = arith.constant 0.000000e+00 : f32
    %99 = vector.broadcast %cst_33 : f32 to vector<8x128xf32>
    %100 = arith.select %27, %98, %99 : vector<8x128xi1>, vector<8x128xf32>
    %101 = arith.addf %80, %100 : vector<8x128xf32>
    %cst_34 = arith.constant 0.000000e+00 : f32
    %102 = vector.broadcast %cst_34 : f32 to vector<8x128xf32>
    %103 = arith.select %32, %33, %102 : vector<8x128xi1>, vector<8x128xf32>
    %104 = arith.truncf %103 : vector<8x128xf32> to vector<8x128xbf16>
    %cst_35 = arith.constant dense<0.000000e+00> : vector<8x8xf32>
    %105 = tpu.matmul %104, %35, %cst_35 {dimension_numbers = #tpu.dot_dimension_numbers<[1], [1], [0], [0], [0, 0, 1, 0], [], []>} : vector<8x128xbf16>, vector<8x128xbf16>, vector<8x8xf32> -> vector<8x8xf32>
    %cst_36 = arith.constant 0.176776692 : f32
    %106 = vector.broadcast %cst_36 : f32 to vector<8x8xf32>
    %107 = arith.mulf %105, %106 : vector<8x8xf32>
    %cst_37 = arith.constant dense<0xFF800000> : vector<8xf32>
    %108 = vector.multi_reduction <maximumf>, %107, %cst_37 [1] : vector<8x8xf32> to vector<8xf32>
    %109 = vector.shape_cast %108 : vector<8xf32> to vector<8x1xf32>
    %110 = vector.broadcast %109 : vector<8x1xf32> to vector<8x8xf32>
    %111 = arith.subf %107, %110 : vector<8x8xf32>
    %112 = math.exp %111 : vector<8x8xf32>
    %cst_38 = arith.constant dense<0.000000e+00> : vector<8xf32>
    %113 = vector.multi_reduction <add>, %112, %cst_38 [1] : vector<8x8xf32> to vector<8xf32>
    %114 = vector.shape_cast %113 : vector<8xf32> to vector<8x1xf32>
    %115 = tpu.reciprocal %114 {approx = true} : vector<8x1xf32> -> vector<8x1xf32>
    %116 = vector.broadcast %115 : vector<8x1xf32> to vector<8x8xf32>
    %117 = arith.mulf %112, %116 : vector<8x8xf32>
    %118 = arith.truncf %117 : vector<8x8xf32> to vector<8x8xbf16>
    %cst_39 = arith.constant dense<0.000000e+00> : vector<8x128xf32>
    %119 = tpu.matmul %118, %37, %cst_39 {dimension_numbers = #tpu.dot_dimension_numbers<[1], [0], [0], [1], [0, 0, 1, 1], [], []>} : vector<8x8xbf16>, vector<8x128xbf16>, vector<8x128xf32> -> vector<8x128xf32>
    %cst_40 = arith.constant 0.000000e+00 : f32
    %120 = vector.broadcast %cst_40 : f32 to vector<8x128xf32>
    %121 = arith.select %32, %119, %120 : vector<8x128xi1>, vector<8x128xf32>
    %122 = arith.addf %101, %121 : vector<8x128xf32>
    %123 = vector.extract_strided_slice %11 {offsets = [8, 0], sizes = [8, 128], strides = [1, 1]} : vector<16x384xf32> to vector<8x128xf32>
    %124 = vector.extract_strided_slice %11 {offsets = [8, 128], sizes = [8, 128], strides = [1, 1]} : vector<16x384xf32> to vector<8x128xf32>
    %125 = arith.truncf %124 : vector<8x128xf32> to vector<8x128xbf16>
    %126 = vector.extract_strided_slice %11 {offsets = [8, 256], sizes = [8, 128], strides = [1, 1]} : vector<16x384xf32> to vector<8x128xf32>
    %127 = arith.truncf %126 : vector<8x128xf32> to vector<8x128xbf16>
    %cst_41 = arith.constant 0.000000e+00 : f32
    %128 = vector.broadcast %cst_41 : f32 to vector<8x128xf32>
    %cst_42 = arith.constant 0.000000e+00 : f32
    %129 = vector.broadcast %cst_42 : f32 to vector<8x128xf32>
    %130 = arith.select %17, %123, %129 : vector<8x128xi1>, vector<8x128xf32>
    %131 = arith.truncf %130 : vector<8x128xf32> to vector<8x128xbf16>
    %cst_43 = arith.constant dense<0.000000e+00> : vector<8x8xf32>
    %132 = tpu.matmul %131, %125, %cst_43 {dimension_numbers = #tpu.dot_dimension_numbers<[1], [1], [0], [0], [0, 0, 1, 0], [], []>} : vector<8x128xbf16>, vector<8x128xbf16>, vector<8x8xf32> -> vector<8x8xf32>
    %cst_44 = arith.constant 0.176776692 : f32
    %133 = vector.broadcast %cst_44 : f32 to vector<8x8xf32>
    %134 = arith.mulf %132, %133 : vector<8x8xf32>
    %cst_45 = arith.constant dense<0xFF800000> : vector<8xf32>
    %135 = vector.multi_reduction <maximumf>, %134, %cst_45 [1] : vector<8x8xf32> to vector<8xf32>
    %136 = vector.shape_cast %135 : vector<8xf32> to vector<8x1xf32>
    %137 = vector.broadcast %136 : vector<8x1xf32> to vector<8x8xf32>
    %138 = arith.subf %134, %137 : vector<8x8xf32>
    %139 = math.exp %138 : vector<8x8xf32>
    %cst_46 = arith.constant dense<0.000000e+00> : vector<8xf32>
    %140 = vector.multi_reduction <add>, %139, %cst_46 [1] : vector<8x8xf32> to vector<8xf32>
    %141 = vector.shape_cast %140 : vector<8xf32> to vector<8x1xf32>
    %142 = tpu.reciprocal %141 {approx = true} : vector<8x1xf32> -> vector<8x1xf32>
    %143 = vector.broadcast %142 : vector<8x1xf32> to vector<8x8xf32>
    %144 = arith.mulf %139, %143 : vector<8x8xf32>
    %145 = arith.truncf %144 : vector<8x8xf32> to vector<8x8xbf16>
    %cst_47 = arith.constant dense<0.000000e+00> : vector<8x128xf32>
    %146 = tpu.matmul %145, %127, %cst_47 {dimension_numbers = #tpu.dot_dimension_numbers<[1], [0], [0], [1], [0, 0, 1, 1], [], []>} : vector<8x8xbf16>, vector<8x128xbf16>, vector<8x128xf32> -> vector<8x128xf32>
    %cst_48 = arith.constant 0.000000e+00 : f32
    %147 = vector.broadcast %cst_48 : f32 to vector<8x128xf32>
    %148 = arith.select %17, %146, %147 : vector<8x128xi1>, vector<8x128xf32>
    %149 = arith.addf %128, %148 : vector<8x128xf32>
    %cst_49 = arith.constant 0.000000e+00 : f32
    %150 = vector.broadcast %cst_49 : f32 to vector<8x128xf32>
    %151 = arith.select %22, %123, %150 : vector<8x128xi1>, vector<8x128xf32>
    %152 = arith.truncf %151 : vector<8x128xf32> to vector<8x128xbf16>
    %cst_50 = arith.constant dense<0.000000e+00> : vector<8x8xf32>
    %153 = tpu.matmul %152, %125, %cst_50 {dimension_numbers = #tpu.dot_dimension_numbers<[1], [1], [0], [0], [0, 0, 1, 0], [], []>} : vector<8x128xbf16>, vector<8x128xbf16>, vector<8x8xf32> -> vector<8x8xf32>
    %cst_51 = arith.constant 0.176776692 : f32
    %154 = vector.broadcast %cst_51 : f32 to vector<8x8xf32>
    %155 = arith.mulf %153, %154 : vector<8x8xf32>
    %cst_52 = arith.constant dense<0xFF800000> : vector<8xf32>
    %156 = vector.multi_reduction <maximumf>, %155, %cst_52 [1] : vector<8x8xf32> to vector<8xf32>
    %157 = vector.shape_cast %156 : vector<8xf32> to vector<8x1xf32>
    %158 = vector.broadcast %157 : vector<8x1xf32> to vector<8x8xf32>
    %159 = arith.subf %155, %158 : vector<8x8xf32>
    %160 = math.exp %159 : vector<8x8xf32>
    %cst_53 = arith.constant dense<0.000000e+00> : vector<8xf32>
    %161 = vector.multi_reduction <add>, %160, %cst_53 [1] : vector<8x8xf32> to vector<8xf32>
    %162 = vector.shape_cast %161 : vector<8xf32> to vector<8x1xf32>
    %163 = tpu.reciprocal %162 {approx = true} : vector<8x1xf32> -> vector<8x1xf32>
    %164 = vector.broadcast %163 : vector<8x1xf32> to vector<8x8xf32>
    %165 = arith.mulf %160, %164 : vector<8x8xf32>
    %166 = arith.truncf %165 : vector<8x8xf32> to vector<8x8xbf16>
    %cst_54 = arith.constant dense<0.000000e+00> : vector<8x128xf32>
    %167 = tpu.matmul %166, %127, %cst_54 {dimension_numbers = #tpu.dot_dimension_numbers<[1], [0], [0], [1], [0, 0, 1, 1], [], []>} : vector<8x8xbf16>, vector<8x128xbf16>, vector<8x128xf32> -> vector<8x128xf32>
    %cst_55 = arith.constant 0.000000e+00 : f32
    %168 = vector.broadcast %cst_55 : f32 to vector<8x128xf32>
    %169 = arith.select %22, %167, %168 : vector<8x128xi1>, vector<8x128xf32>
    %170 = arith.addf %149, %169 : vector<8x128xf32>
    %cst_56 = arith.constant 0.000000e+00 : f32
    %171 = vector.broadcast %cst_56 : f32 to vector<8x128xf32>
    %172 = arith.select %27, %123, %171 : vector<8x128xi1>, vector<8x128xf32>
    %173 = arith.truncf %172 : vector<8x128xf32> to vector<8x128xbf16>
    %cst_57 = arith.constant dense<0.000000e+00> : vector<8x8xf32>
    %174 = tpu.matmul %173, %125, %cst_57 {dimension_numbers = #tpu.dot_dimension_numbers<[1], [1], [0], [0], [0, 0, 1, 0], [], []>} : vector<8x128xbf16>, vector<8x128xbf16>, vector<8x8xf32> -> vector<8x8xf32>
    %cst_58 = arith.constant 0.176776692 : f32
    %175 = vector.broadcast %cst_58 : f32 to vector<8x8xf32>
    %176 = arith.mulf %174, %175 : vector<8x8xf32>
    %cst_59 = arith.constant dense<0xFF800000> : vector<8xf32>
    %177 = vector.multi_reduction <maximumf>, %176, %cst_59 [1] : vector<8x8xf32> to vector<8xf32>
    %178 = vector.shape_cast %177 : vector<8xf32> to vector<8x1xf32>
    %179 = vector.broadcast %178 : vector<8x1xf32> to vector<8x8xf32>
    %180 = arith.subf %176, %179 : vector<8x8xf32>
    %181 = math.exp %180 : vector<8x8xf32>
    %cst_60 = arith.constant dense<0.000000e+00> : vector<8xf32>
    %182 = vector.multi_reduction <add>, %181, %cst_60 [1] : vector<8x8xf32> to vector<8xf32>
    %183 = vector.shape_cast %182 : vector<8xf32> to vector<8x1xf32>
    %184 = tpu.reciprocal %183 {approx = true} : vector<8x1xf32> -> vector<8x1xf32>
    %185 = vector.broadcast %184 : vector<8x1xf32> to vector<8x8xf32>
    %186 = arith.mulf %181, %185 : vector<8x8xf32>
    %187 = arith.truncf %186 : vector<8x8xf32> to vector<8x8xbf16>
    %cst_61 = arith.constant dense<0.000000e+00> : vector<8x128xf32>
    %188 = tpu.matmul %187, %127, %cst_61 {dimension_numbers = #tpu.dot_dimension_numbers<[1], [0], [0], [1], [0, 0, 1, 1], [], []>} : vector<8x8xbf16>, vector<8x128xbf16>, vector<8x128xf32> -> vector<8x128xf32>
    %cst_62 = arith.constant 0.000000e+00 : f32
    %189 = vector.broadcast %cst_62 : f32 to vector<8x128xf32>
    %190 = arith.select %27, %188, %189 : vector<8x128xi1>, vector<8x128xf32>
    %191 = arith.addf %170, %190 : vector<8x128xf32>
    %cst_63 = arith.constant 0.000000e+00 : f32
    %192 = vector.broadcast %cst_63 : f32 to vector<8x128xf32>
    %193 = arith.select %32, %123, %192 : vector<8x128xi1>, vector<8x128xf32>
    %194 = arith.truncf %193 : vector<8x128xf32> to vector<8x128xbf16>
    %cst_64 = arith.constant dense<0.000000e+00> : vector<8x8xf32>
    %195 = tpu.matmul %194, %125, %cst_64 {dimension_numbers = #tpu.dot_dimension_numbers<[1], [1], [0], [0], [0, 0, 1, 0], [], []>} : vector<8x128xbf16>, vector<8x128xbf16>, vector<8x8xf32> -> vector<8x8xf32>
    %cst_65 = arith.constant 0.176776692 : f32
    %196 = vector.broadcast %cst_65 : f32 to vector<8x8xf32>
    %197 = arith.mulf %195, %196 : vector<8x8xf32>
    %cst_66 = arith.constant dense<0xFF800000> : vector<8xf32>
    %198 = vector.multi_reduction <maximumf>, %197, %cst_66 [1] : vector<8x8xf32> to vector<8xf32>
    %199 = vector.shape_cast %198 : vector<8xf32> to vector<8x1xf32>
    %200 = vector.broadcast %199 : vector<8x1xf32> to vector<8x8xf32>
    %201 = arith.subf %197, %200 : vector<8x8xf32>
    %202 = math.exp %201 : vector<8x8xf32>
    %cst_67 = arith.constant dense<0.000000e+00> : vector<8xf32>
    %203 = vector.multi_reduction <add>, %202, %cst_67 [1] : vector<8x8xf32> to vector<8xf32>
    %204 = vector.shape_cast %203 : vector<8xf32> to vector<8x1xf32>
    %205 = tpu.reciprocal %204 {approx = true} : vector<8x1xf32> -> vector<8x1xf32>
    %206 = vector.broadcast %205 : vector<8x1xf32> to vector<8x8xf32>
    %207 = arith.mulf %202, %206 : vector<8x8xf32>
    %208 = arith.truncf %207 : vector<8x8xf32> to vector<8x8xbf16>
    %cst_68 = arith.constant dense<0.000000e+00> : vector<8x128xf32>
    %209 = tpu.matmul %208, %127, %cst_68 {dimension_numbers = #tpu.dot_dimension_numbers<[1], [0], [0], [1], [0, 0, 1, 1], [], []>} : vector<8x8xbf16>, vector<8x128xbf16>, vector<8x128xf32> -> vector<8x128xf32>
    %cst_69 = arith.constant 0.000000e+00 : f32
    %210 = vector.broadcast %cst_69 : f32 to vector<8x128xf32>
    %211 = arith.select %32, %209, %210 : vector<8x128xi1>, vector<8x128xf32>
    %212 = arith.addf %191, %211 : vector<8x128xf32>
    %213 = tpu.concatenate %122, %212 in 0 : vector<8x128xf32>, vector<8x128xf32> -> vector<16x128xf32>
    %214 = arith.truncf %213 : vector<16x128xf32> to vector<16x128xbf16>
    %c0_70 = arith.constant 0 : index
    %c0_71 = arith.constant 0 : index
    %c0_72 = arith.constant 0 : index
    %215 = vector.load %arg8[%c0_70, %c0_71, %c0_72] : memref<1x128x128xbf16, #tpu.memory_space<vmem>>, vector<1x128x128xbf16>
    %216 = vector.shape_cast %215 : vector<1x128x128xbf16> to vector<128x128xbf16>
    %cst_73 = arith.constant dense<0.000000e+00> : vector<16x128xf32>
    %217 = tpu.matmul %214, %216, %cst_73 {dimension_numbers = #tpu.dot_dimension_numbers<[1], [0], [0], [1], [0, 0, 1, 1], [], []>} : vector<16x128xbf16>, vector<128x128xbf16>, vector<16x128xf32> -> vector<16x128xf32>
    %c0_74 = arith.constant 0 : index
    %c0_75 = arith.constant 0 : index
    %c0_76 = arith.constant 0 : index
    %218 = vector.load %arg9[%c0_74, %c0_75, %c0_76] : memref<1x1x128xf32, #tpu.memory_space<vmem>>, vector<1x1x128xf32>
    %219 = vector.shape_cast %218 : vector<1x1x128xf32> to vector<1x128xf32>
    %220 = vector.broadcast %219 : vector<1x128xf32> to vector<16x128xf32>
    %221 = arith.addf %217, %220 : vector<16x128xf32>
    %222 = arith.addf %3, %221 : vector<16x128xf32>
    %c0_77 = arith.constant 0 : index
    %c0_78 = arith.constant 0 : index
    %c0_79 = arith.constant 0 : index
    %223 = vector.load %arg10[%c0_77, %c0_78, %c0_79] : memref<1x2x128xf32, #tpu.memory_space<vmem>>, vector<1x1x128xf32>
    %224 = vector.shape_cast %223 : vector<1x1x128xf32> to vector<1x128xf32>
    %c0_80 = arith.constant 0 : index
    %c1 = arith.constant 1 : index
    %c0_81 = arith.constant 0 : index
    %225 = vector.load %arg10[%c0_80, %c1, %c0_81] : memref<1x2x128xf32, #tpu.memory_space<vmem>>, vector<1x1x128xf32>
    %226 = vector.shape_cast %225 : vector<1x1x128xf32> to vector<1x128xf32>
    %cst_82 = arith.constant dense<0.000000e+00> : vector<16xf32>
    %227 = vector.multi_reduction <add>, %222, %cst_82 [1] : vector<16x128xf32> to vector<16xf32>
    %228 = vector.shape_cast %227 : vector<16xf32> to vector<16x1xf32>
    %cst_83 = arith.constant 1.280000e+02 : f32
    %229 = vector.broadcast %cst_83 : f32 to vector<16x1xf32>
    %230 = arith.divf %228, %229 : vector<16x1xf32>
    %231 = vector.broadcast %230 : vector<16x1xf32> to vector<16x128xf32>
    %232 = arith.subf %222, %231 : vector<16x128xf32>
    %233 = arith.mulf %232, %232 : vector<16x128xf32>
    %cst_84 = arith.constant dense<0.000000e+00> : vector<16xf32>
    %234 = vector.multi_reduction <add>, %233, %cst_84 [1] : vector<16x128xf32> to vector<16xf32>
    %235 = vector.shape_cast %234 : vector<16xf32> to vector<16x1xf32>
    %cst_85 = arith.constant 1.280000e+02 : f32
    %236 = vector.broadcast %cst_85 : f32 to vector<16x1xf32>
    %237 = arith.divf %235, %236 : vector<16x1xf32>
    %238 = vector.broadcast %230 : vector<16x1xf32> to vector<16x128xf32>
    %239 = arith.subf %222, %238 : vector<16x128xf32>
    %cst_86 = arith.constant 9.99999974E-6 : f32
    %240 = vector.broadcast %cst_86 : f32 to vector<16x1xf32>
    %241 = arith.addf %237, %240 : vector<16x1xf32>
    %242 = math.rsqrt %241 : vector<16x1xf32>
    %243 = vector.broadcast %242 : vector<16x1xf32> to vector<16x128xf32>
    %244 = arith.mulf %239, %243 : vector<16x128xf32>
    %245 = vector.broadcast %224 : vector<1x128xf32> to vector<16x128xf32>
    %246 = arith.mulf %244, %245 : vector<16x128xf32>
    %247 = vector.broadcast %226 : vector<1x128xf32> to vector<16x128xf32>
    %248 = arith.addf %246, %247 : vector<16x128xf32>
    %249 = arith.truncf %248 : vector<16x128xf32> to vector<16x128xbf16>
    %c0_87 = arith.constant 0 : index
    %c0_88 = arith.constant 0 : index
    %c0_89 = arith.constant 0 : index
    %250 = vector.load %arg11[%c0_87, %c0_88, %c0_89] : memref<1x128x256xbf16, #tpu.memory_space<vmem>>, vector<1x128x256xbf16>
    %251 = vector.shape_cast %250 : vector<1x128x256xbf16> to vector<128x256xbf16>
    %cst_90 = arith.constant dense<0.000000e+00> : vector<16x256xf32>
    %252 = tpu.matmul %249, %251, %cst_90 {dimension_numbers = #tpu.dot_dimension_numbers<[1], [0], [0], [1], [0, 0, 1, 1], [], []>} : vector<16x128xbf16>, vector<128x256xbf16>, vector<16x256xf32> -> vector<16x256xf32>
    %c0_91 = arith.constant 0 : index
    %c0_92 = arith.constant 0 : index
    %c0_93 = arith.constant 0 : index
    %253 = vector.load %arg12[%c0_91, %c0_92, %c0_93] : memref<1x1x256xf32, #tpu.memory_space<vmem>>, vector<1x1x256xf32>
    %254 = vector.shape_cast %253 : vector<1x1x256xf32> to vector<1x256xf32>
    %255 = vector.broadcast %254 : vector<1x256xf32> to vector<16x256xf32>
    %256 = arith.addf %252, %255 : vector<16x256xf32>
    %cst_94 = arith.constant 5.000000e-01 : f32
    %257 = vector.broadcast %cst_94 : f32 to vector<16x256xf32>
    %258 = arith.mulf %257, %256 : vector<16x256xf32>
    %cst_95 = arith.constant 1.41421354 : f32
    %259 = vector.broadcast %cst_95 : f32 to vector<16x256xf32>
    %260 = arith.divf %256, %259 : vector<16x256xf32>
    %261 = math.erf %260 : vector<16x256xf32>
    %cst_96 = arith.constant 1.000000e+00 : f32
    %262 = vector.broadcast %cst_96 : f32 to vector<16x256xf32>
    %263 = arith.addf %262, %261 : vector<16x256xf32>
    %264 = arith.mulf %258, %263 : vector<16x256xf32>
    %265 = arith.truncf %264 : vector<16x256xf32> to vector<16x256xbf16>
    %c0_97 = arith.constant 0 : index
    %c0_98 = arith.constant 0 : index
    %c0_99 = arith.constant 0 : index
    %266 = vector.load %arg13[%c0_97, %c0_98, %c0_99] : memref<1x256x128xbf16, #tpu.memory_space<vmem>>, vector<1x256x128xbf16>
    %267 = vector.shape_cast %266 : vector<1x256x128xbf16> to vector<256x128xbf16>
    %cst_100 = arith.constant dense<0.000000e+00> : vector<16x128xf32>
    %268 = tpu.matmul %265, %267, %cst_100 {dimension_numbers = #tpu.dot_dimension_numbers<[1], [0], [0], [1], [0, 0, 1, 1], [], []>} : vector<16x256xbf16>, vector<256x128xbf16>, vector<16x128xf32> -> vector<16x128xf32>
    %c0_101 = arith.constant 0 : index
    %c0_102 = arith.constant 0 : index
    %c0_103 = arith.constant 0 : index
    %269 = vector.load %arg14[%c0_101, %c0_102, %c0_103] : memref<1x1x128xf32, #tpu.memory_space<vmem>>, vector<1x1x128xf32>
    %270 = vector.shape_cast %269 : vector<1x1x128xf32> to vector<1x128xf32>
    %271 = vector.broadcast %270 : vector<1x128xf32> to vector<16x128xf32>
    %272 = arith.addf %268, %271 : vector<16x128xf32>
    %273 = arith.addf %248, %272 : vector<16x128xf32>
    %c0_104 = arith.constant 0 : index
    %c0_105 = arith.constant 0 : index
    %c0_106 = arith.constant 0 : index
    %274 = vector.load %arg15[%c0_104, %c0_105, %c0_106] : memref<1x2x128xf32, #tpu.memory_space<vmem>>, vector<1x1x128xf32>
    %275 = vector.shape_cast %274 : vector<1x1x128xf32> to vector<1x128xf32>
    %c0_107 = arith.constant 0 : index
    %c1_108 = arith.constant 1 : index
    %c0_109 = arith.constant 0 : index
    %276 = vector.load %arg15[%c0_107, %c1_108, %c0_109] : memref<1x2x128xf32, #tpu.memory_space<vmem>>, vector<1x1x128xf32>
    %277 = vector.shape_cast %276 : vector<1x1x128xf32> to vector<1x128xf32>
    %cst_110 = arith.constant dense<0.000000e+00> : vector<16xf32>
    %278 = vector.multi_reduction <add>, %273, %cst_110 [1] : vector<16x128xf32> to vector<16xf32>
    %279 = vector.shape_cast %278 : vector<16xf32> to vector<16x1xf32>
    %cst_111 = arith.constant 1.280000e+02 : f32
    %280 = vector.broadcast %cst_111 : f32 to vector<16x1xf32>
    %281 = arith.divf %279, %280 : vector<16x1xf32>
    %282 = vector.broadcast %281 : vector<16x1xf32> to vector<16x128xf32>
    %283 = arith.subf %273, %282 : vector<16x128xf32>
    %284 = arith.mulf %283, %283 : vector<16x128xf32>
    %cst_112 = arith.constant dense<0.000000e+00> : vector<16xf32>
    %285 = vector.multi_reduction <add>, %284, %cst_112 [1] : vector<16x128xf32> to vector<16xf32>
    %286 = vector.shape_cast %285 : vector<16xf32> to vector<16x1xf32>
    %cst_113 = arith.constant 1.280000e+02 : f32
    %287 = vector.broadcast %cst_113 : f32 to vector<16x1xf32>
    %288 = arith.divf %286, %287 : vector<16x1xf32>
    %289 = vector.broadcast %281 : vector<16x1xf32> to vector<16x128xf32>
    %290 = arith.subf %273, %289 : vector<16x128xf32>
    %cst_114 = arith.constant 9.99999974E-6 : f32
    %291 = vector.broadcast %cst_114 : f32 to vector<16x1xf32>
    %292 = arith.addf %288, %291 : vector<16x1xf32>
    %293 = math.rsqrt %292 : vector<16x1xf32>
    %294 = vector.broadcast %293 : vector<16x1xf32> to vector<16x128xf32>
    %295 = arith.mulf %290, %294 : vector<16x128xf32>
    %296 = vector.broadcast %275 : vector<1x128xf32> to vector<16x128xf32>
    %297 = arith.mulf %295, %296 : vector<16x128xf32>
    %298 = vector.broadcast %277 : vector<1x128xf32> to vector<16x128xf32>
    %299 = arith.addf %297, %298 : vector<16x128xf32>
    %c0_115 = arith.constant 0 : index
    %c0_116 = arith.constant 0 : index
    %300 = vector.load %arg16[%c0_115, %c0_116] : memref<16x128xf32, #tpu.memory_space<vmem>>, vector<16x128xf32>
    tpu.vector_store %arg16[%c0_115, %c0_116], %299 {strides = array<i32>} : memref<16x128xf32, #tpu.memory_space<vmem>>, vector<16x128xf32>,
    return
  }
  func.func @transform_0(%arg0: i32) -> (i32, i32) {
    %c0_i32 = arith.constant 0 : i32
    %c0_i32_0 = arith.constant 0 : i32
    %c0_i32_1 = arith.constant 0 : i32
    return %c0_i32, %c0_i32_0 : i32, i32
  }
  func.func @transform_1(%arg0: i32) -> (i32, i32) {
    %c0_i32 = arith.constant 0 : i32
    %c0_i32_0 = arith.constant 0 : i32
    %c0_i32_1 = arith.constant 0 : i32
    return %c0_i32, %c0_i32_0 : i32, i32
  }
  func.func @transform_2(%arg0: i32) -> (i32, i32) {
    %c0_i32 = arith.constant 0 : i32
    %c0_i32_0 = arith.constant 0 : i32
    %c0_i32_1 = arith.constant 0 : i32
    return %c0_i32, %c0_i32_0 : i32, i32
  }
  func.func @transform_3(%arg0: i32) -> (i32, i32) {
    %c0_i32 = arith.constant 0 : i32
    %c0_i32_0 = arith.constant 0 : i32
    %c0_i32_1 = arith.constant 0 : i32
    return %c0_i32, %c0_i32_0 : i32, i32
  }
  func.func @transform_4(%arg0: i32) -> (i32, i32) {
    %c0_i32 = arith.constant 0 : i32
    %c0_i32_0 = arith.constant 0 : i32
    %c0_i32_1 = arith.constant 0 : i32
    return %c0_i32, %c0_i32_0 : i32, i32
  }
  func.func @transform_5(%arg0: i32) -> (i32, i32, i32) {
    %c0_i32 = arith.constant 0 : i32
    %c0_i32_0 = arith.constant 0 : i32
    %c0_i32_1 = arith.constant 0 : i32
    return %arg0, %c0_i32, %c0_i32_0 : i32, i32, i32
  }
  func.func @transform_6(%arg0: i32) -> (i32, i32, i32) {
    %c0_i32 = arith.constant 0 : i32
    %c0_i32_0 = arith.constant 0 : i32
    %c0_i32_1 = arith.constant 0 : i32
    return %arg0, %c0_i32, %c0_i32_0 : i32, i32, i32
  }
  func.func @transform_7(%arg0: i32) -> (i32, i32, i32) {
    %c0_i32 = arith.constant 0 : i32
    %c0_i32_0 = arith.constant 0 : i32
    %c0_i32_1 = arith.constant 0 : i32
    return %arg0, %c0_i32, %c0_i32_0 : i32, i32, i32
  }
  func.func @transform_8(%arg0: i32) -> (i32, i32, i32) {
    %c0_i32 = arith.constant 0 : i32
    %c0_i32_0 = arith.constant 0 : i32
    %c0_i32_1 = arith.constant 0 : i32
    return %arg0, %c0_i32, %c0_i32_0 : i32, i32, i32
  }
  func.func @transform_9(%arg0: i32) -> (i32, i32, i32) {
    %c0_i32 = arith.constant 0 : i32
    %c0_i32_0 = arith.constant 0 : i32
    %c0_i32_1 = arith.constant 0 : i32
    return %arg0, %c0_i32, %c0_i32_0 : i32, i32, i32
  }
  func.func @transform_10(%arg0: i32) -> (i32, i32, i32) {
    %c0_i32 = arith.constant 0 : i32
    %c0_i32_0 = arith.constant 0 : i32
    %c0_i32_1 = arith.constant 0 : i32
    return %arg0, %c0_i32, %c0_i32_0 : i32, i32, i32
  }
  func.func @transform_11(%arg0: i32) -> (i32, i32, i32) {
    %c0_i32 = arith.constant 0 : i32
    %c0_i32_0 = arith.constant 0 : i32
    %c0_i32_1 = arith.constant 0 : i32
    return %arg0, %c0_i32, %c0_i32_0 : i32, i32, i32
  }
  func.func @transform_12(%arg0: i32) -> (i32, i32, i32) {
    %c0_i32 = arith.constant 0 : i32
    %c0_i32_0 = arith.constant 0 : i32
    %c0_i32_1 = arith.constant 0 : i32
    return %arg0, %c0_i32, %c0_i32_0 : i32, i32, i32
  }
  func.func @transform_13(%arg0: i32) -> (i32, i32, i32) {
    %c0_i32 = arith.constant 0 : i32
    %c0_i32_0 = arith.constant 0 : i32
    %c0_i32_1 = arith.constant 0 : i32
    return %arg0, %c0_i32, %c0_i32_0 : i32, i32, i32
  }
  func.func @transform_14(%arg0: i32) -> (i32, i32, i32) {
    %c0_i32 = arith.constant 0 : i32
    %c0_i32_0 = arith.constant 0 : i32
    %c0_i32_1 = arith.constant 0 : i32
    return %arg0, %c0_i32, %c0_i32_0 : i32, i32, i32
  }
  func.func @transform_15(%arg0: i32) -> (i32, i32) {
    %c0_i32 = arith.constant 0 : i32
    %c0_i32_0 = arith.constant 0 : i32
    %c0_i32_1 = arith.constant 0 : i32
    return %c0_i32, %c0_i32_0 : i32, i32
  }
}

module attributes {stable_mosaic.version = 11 : i64} {
  func.func @_decoder_stack_kernel(%arg0: i32, %arg1: memref<2x128xf32, #tpu.memory_space<vmem>>, %arg2: memref<16x128xf32, #tpu.memory_space<vmem>>, %arg3: memref<128x256xbf16, #tpu.memory_space<vmem>>, %arg4: memref<1x256xf32, #tpu.memory_space<vmem>>, %arg5: memref<1x128x128xbf16, #tpu.memory_space<vmem>>, %arg6: memref<1x1x128xf32, #tpu.memory_space<vmem>>, %arg7: memref<1x128x128xbf16, #tpu.memory_space<vmem>>, %arg8: memref<1x1x128xf32, #tpu.memory_space<vmem>>, %arg9: memref<1x2x128xf32, #tpu.memory_space<vmem>>, %arg10: memref<1x128x128xbf16, #tpu.memory_space<vmem>>, %arg11: memref<1x1x128xf32, #tpu.memory_space<vmem>>, %arg12: memref<1x128x256xbf16, #tpu.memory_space<vmem>>, %arg13: memref<1x1x256xf32, #tpu.memory_space<vmem>>, %arg14: memref<1x128x128xbf16, #tpu.memory_space<vmem>>, %arg15: memref<1x1x128xf32, #tpu.memory_space<vmem>>, %arg16: memref<1x2x128xf32, #tpu.memory_space<vmem>>, %arg17: memref<1x128x256xbf16, #tpu.memory_space<vmem>>, %arg18: memref<1x1x256xf32, #tpu.memory_space<vmem>>, %arg19: memref<1x256x128xbf16, #tpu.memory_space<vmem>>, %arg20: memref<1x1x128xf32, #tpu.memory_space<vmem>>, %arg21: memref<1x2x128xf32, #tpu.memory_space<vmem>>, %arg22: memref<2x256xf32, #tpu.memory_space<vmem>>, %arg23: memref<2x128xf32, #tpu.memory_space<vmem>>) attributes {dimension_semantics = [#tpu.dimension_semantics<arbitrary>], iteration_bounds = array<i64: 2>, scalar_prefetch = 0 : i64, scratch_operands = 1 : i64, tpu.core_type = #tpu.core_type<tc>, window_params = [{pipeline_mode = #tpu.pipeline_mode<synchronous>, transform_indices = @transform_0, window_bounds = array<i64: 2, 128>}, {pipeline_mode = #tpu.pipeline_mode<synchronous>, transform_indices = @transform_1, window_bounds = array<i64: 16, 128>}, {pipeline_mode = #tpu.pipeline_mode<synchronous>, transform_indices = @transform_2, window_bounds = array<i64: 128, 256>}, {pipeline_mode = #tpu.pipeline_mode<synchronous>, transform_indices = @transform_3, window_bounds = array<i64: 1, 256>}, {transform_indices = @transform_4, window_bounds = array<i64: 1, 128, 128>}, {transform_indices = @transform_5, window_bounds = array<i64: 1, 1, 128>}, {transform_indices = @transform_6, window_bounds = array<i64: 1, 128, 128>}, {transform_indices = @transform_7, window_bounds = array<i64: 1, 1, 128>}, {transform_indices = @transform_8, window_bounds = array<i64: 1, 2, 128>}, {transform_indices = @transform_9, window_bounds = array<i64: 1, 128, 128>}, {transform_indices = @transform_10, window_bounds = array<i64: 1, 1, 128>}, {transform_indices = @transform_11, window_bounds = array<i64: 1, 128, 256>}, {transform_indices = @transform_12, window_bounds = array<i64: 1, 1, 256>}, {transform_indices = @transform_13, window_bounds = array<i64: 1, 128, 128>}, {transform_indices = @transform_14, window_bounds = array<i64: 1, 1, 128>}, {transform_indices = @transform_15, window_bounds = array<i64: 1, 2, 128>}, {transform_indices = @transform_16, window_bounds = array<i64: 1, 128, 256>}, {transform_indices = @transform_17, window_bounds = array<i64: 1, 1, 256>}, {transform_indices = @transform_18, window_bounds = array<i64: 1, 256, 128>}, {transform_indices = @transform_19, window_bounds = array<i64: 1, 1, 128>}, {transform_indices = @transform_20, window_bounds = array<i64: 1, 2, 128>}, {pipeline_mode = #tpu.pipeline_mode<synchronous>, transform_indices = @transform_21, window_bounds = array<i64: 2, 256>}]} {
    %c0_i32 = arith.constant 0 : i32
    %0 = arith.cmpi eq, %arg0, %c0_i32 : i32
    %1 = arith.extui %0 : i1 to i32
    %c0_i32_0 = arith.constant 0 : i32
    %2 = arith.cmpi ne, %1, %c0_i32_0 : i32
    scf.if %2 {
      %c0_160 = arith.constant 0 : index
      %c0_161 = arith.constant 0 : index
      %393 = vector.load %arg1[%c0_160, %c0_161] : memref<2x128xf32, #tpu.memory_space<vmem>>, vector<2x128xf32>
      %c0_162 = arith.constant 0 : index
      %c0_163 = arith.constant 0 : index
      %394 = vector.load %arg23[%c0_162, %c0_163] : memref<2x128xf32, #tpu.memory_space<vmem>>, vector<2x128xf32>
      tpu.vector_store %arg23[%c0_162, %c0_163], %393 {strides = array<i32>} : memref<2x128xf32, #tpu.memory_space<vmem>>, vector<2x128xf32>,
    } else {
    }
    %c0 = arith.constant 0 : index
    %c0_1 = arith.constant 0 : index
    %3 = vector.load %arg23[%c0, %c0_1] : memref<2x128xf32, #tpu.memory_space<vmem>>, vector<2x128xf32>
    %4 = arith.truncf %3 : vector<2x128xf32> to vector<2x128xbf16>
    %c0_2 = arith.constant 0 : index
    %c0_3 = arith.constant 0 : index
    %c0_4 = arith.constant 0 : index
    %5 = vector.load %arg5[%c0_2, %c0_3, %c0_4] : memref<1x128x128xbf16, #tpu.memory_space<vmem>>, vector<1x128x128xbf16>
    %6 = vector.shape_cast %5 : vector<1x128x128xbf16> to vector<128x128xbf16>
    %cst = arith.constant dense<0.000000e+00> : vector<2x128xf32>
    %7 = tpu.matmul %4, %6, %cst {dimension_numbers = #tpu.dot_dimension_numbers<[1], [0], [0], [1], [0, 0, 1, 1], [], []>} : vector<2x128xbf16>, vector<128x128xbf16>, vector<2x128xf32> -> vector<2x128xf32>
    %c0_5 = arith.constant 0 : index
    %c0_6 = arith.constant 0 : index
    %c0_7 = arith.constant 0 : index
    %8 = vector.load %arg6[%c0_5, %c0_6, %c0_7] : memref<1x1x128xf32, #tpu.memory_space<vmem>>, vector<1x1x128xf32>
    %9 = vector.shape_cast %8 : vector<1x1x128xf32> to vector<1x128xf32>
    %10 = vector.broadcast %9 : vector<1x128xf32> to vector<2x128xf32>
    %11 = arith.addf %7, %10 : vector<2x128xf32>
    %12 = arith.truncf %11 : vector<2x128xf32> to vector<2x128xbf16>
    %c0_8 = arith.constant 0 : index
    %c0_9 = arith.constant 0 : index
    %c0_10 = arith.constant 0 : index
    %13 = vector.load %arg7[%c0_8, %c0_9, %c0_10] : memref<1x128x128xbf16, #tpu.memory_space<vmem>>, vector<1x128x128xbf16>
    %14 = vector.shape_cast %13 : vector<1x128x128xbf16> to vector<128x128xbf16>
    %cst_11 = arith.constant dense<0.000000e+00> : vector<2x128xf32>
    %15 = tpu.matmul %12, %14, %cst_11 {dimension_numbers = #tpu.dot_dimension_numbers<[1], [0], [0], [1], [0, 0, 1, 1], [], []>} : vector<2x128xbf16>, vector<128x128xbf16>, vector<2x128xf32> -> vector<2x128xf32>
    %c0_12 = arith.constant 0 : index
    %c0_13 = arith.constant 0 : index
    %c0_14 = arith.constant 0 : index
    %16 = vector.load %arg8[%c0_12, %c0_13, %c0_14] : memref<1x1x128xf32, #tpu.memory_space<vmem>>, vector<1x1x128xf32>
    %17 = vector.shape_cast %16 : vector<1x1x128xf32> to vector<1x128xf32>
    %18 = vector.broadcast %17 : vector<1x128xf32> to vector<2x128xf32>
    %19 = arith.addf %15, %18 : vector<2x128xf32>
    %20 = arith.addf %3, %19 : vector<2x128xf32>
    %c0_15 = arith.constant 0 : index
    %c0_16 = arith.constant 0 : index
    %c0_17 = arith.constant 0 : index
    %21 = vector.load %arg9[%c0_15, %c0_16, %c0_17] : memref<1x2x128xf32, #tpu.memory_space<vmem>>, vector<1x1x128xf32>
    %22 = vector.shape_cast %21 : vector<1x1x128xf32> to vector<1x128xf32>
    %c0_18 = arith.constant 0 : index
    %c1 = arith.constant 1 : index
    %c0_19 = arith.constant 0 : index
    %23 = vector.load %arg9[%c0_18, %c1, %c0_19] : memref<1x2x128xf32, #tpu.memory_space<vmem>>, vector<1x1x128xf32>
    %24 = vector.shape_cast %23 : vector<1x1x128xf32> to vector<1x128xf32>
    %cst_20 = arith.constant dense<0.000000e+00> : vector<2xf32>
    %25 = vector.multi_reduction <add>, %20, %cst_20 [1] : vector<2x128xf32> to vector<2xf32>
    %26 = vector.shape_cast %25 : vector<2xf32> to vector<2x1xf32>
    %cst_21 = arith.constant 1.280000e+02 : f32
    %27 = vector.broadcast %cst_21 : f32 to vector<2x1xf32>
    %28 = arith.divf %26, %27 : vector<2x1xf32>
    %29 = vector.broadcast %28 : vector<2x1xf32> to vector<2x128xf32>
    %30 = arith.subf %20, %29 : vector<2x128xf32>
    %31 = arith.mulf %30, %30 : vector<2x128xf32>
    %cst_22 = arith.constant dense<0.000000e+00> : vector<2xf32>
    %32 = vector.multi_reduction <add>, %31, %cst_22 [1] : vector<2x128xf32> to vector<2xf32>
    %33 = vector.shape_cast %32 : vector<2xf32> to vector<2x1xf32>
    %cst_23 = arith.constant 1.280000e+02 : f32
    %34 = vector.broadcast %cst_23 : f32 to vector<2x1xf32>
    %35 = arith.divf %33, %34 : vector<2x1xf32>
    %36 = vector.broadcast %28 : vector<2x1xf32> to vector<2x128xf32>
    %37 = arith.subf %20, %36 : vector<2x128xf32>
    %cst_24 = arith.constant 9.99999974E-6 : f32
    %38 = vector.broadcast %cst_24 : f32 to vector<2x1xf32>
    %39 = arith.addf %35, %38 : vector<2x1xf32>
    %40 = math.rsqrt %39 : vector<2x1xf32>
    %41 = vector.broadcast %40 : vector<2x1xf32> to vector<2x128xf32>
    %42 = arith.mulf %37, %41 : vector<2x128xf32>
    %43 = vector.broadcast %22 : vector<1x128xf32> to vector<2x128xf32>
    %44 = arith.mulf %42, %43 : vector<2x128xf32>
    %45 = vector.broadcast %24 : vector<1x128xf32> to vector<2x128xf32>
    %46 = arith.addf %44, %45 : vector<2x128xf32>
    %47 = arith.truncf %46 : vector<2x128xf32> to vector<2x128xbf16>
    %c0_25 = arith.constant 0 : index
    %c0_26 = arith.constant 0 : index
    %c0_27 = arith.constant 0 : index
    %48 = vector.load %arg10[%c0_25, %c0_26, %c0_27] : memref<1x128x128xbf16, #tpu.memory_space<vmem>>, vector<1x128x128xbf16>
    %49 = vector.shape_cast %48 : vector<1x128x128xbf16> to vector<128x128xbf16>
    %cst_28 = arith.constant dense<0.000000e+00> : vector<2x128xf32>
    %50 = tpu.matmul %47, %49, %cst_28 {dimension_numbers = #tpu.dot_dimension_numbers<[1], [0], [0], [1], [0, 0, 1, 1], [], []>} : vector<2x128xbf16>, vector<128x128xbf16>, vector<2x128xf32> -> vector<2x128xf32>
    %c0_29 = arith.constant 0 : index
    %c0_30 = arith.constant 0 : index
    %c0_31 = arith.constant 0 : index
    %51 = vector.load %arg11[%c0_29, %c0_30, %c0_31] : memref<1x1x128xf32, #tpu.memory_space<vmem>>, vector<1x1x128xf32>
    %52 = vector.shape_cast %51 : vector<1x1x128xf32> to vector<1x128xf32>
    %53 = vector.broadcast %52 : vector<1x128xf32> to vector<2x128xf32>
    %54 = arith.addf %50, %53 : vector<2x128xf32>
    %c0_32 = arith.constant 0 : index
    %c0_33 = arith.constant 0 : index
    %55 = vector.load %arg2[%c0_32, %c0_33] : memref<16x128xf32, #tpu.memory_space<vmem>>, vector<16x128xf32>
    %56 = arith.truncf %55 : vector<16x128xf32> to vector<16x128xbf16>
    %c0_34 = arith.constant 0 : index
    %c0_35 = arith.constant 0 : index
    %c0_36 = arith.constant 0 : index
    %57 = vector.load %arg12[%c0_34, %c0_35, %c0_36] : memref<1x128x256xbf16, #tpu.memory_space<vmem>>, vector<1x128x256xbf16>
    %58 = vector.shape_cast %57 : vector<1x128x256xbf16> to vector<128x256xbf16>
    %cst_37 = arith.constant dense<0.000000e+00> : vector<16x256xf32>
    %59 = tpu.matmul %56, %58, %cst_37 {dimension_numbers = #tpu.dot_dimension_numbers<[1], [0], [0], [1], [0, 0, 1, 1], [], []>} : vector<16x128xbf16>, vector<128x256xbf16>, vector<16x256xf32> -> vector<16x256xf32>
    %c0_38 = arith.constant 0 : index
    %c0_39 = arith.constant 0 : index
    %c0_40 = arith.constant 0 : index
    %60 = vector.load %arg13[%c0_38, %c0_39, %c0_40] : memref<1x1x256xf32, #tpu.memory_space<vmem>>, vector<1x1x256xf32>
    %61 = vector.shape_cast %60 : vector<1x1x256xf32> to vector<1x256xf32>
    %62 = vector.broadcast %61 : vector<1x256xf32> to vector<16x256xf32>
    %63 = arith.addf %59, %62 : vector<16x256xf32>
    %64 = tpu.iota {dimensions = array<i32: 1>} : vector<8x128xi32>
    %65 = tpu.iota {dimensions = array<i32: 1>} : vector<1x128xi32>
    %c0_i32_41 = arith.constant 0 : i32
    %66 = vector.broadcast %c0_i32_41 : i32 to vector<8x128xi32>
    %67 = arith.cmpi sge, %64, %66 : vector<8x128xi32>
    %c32_i32 = arith.constant 32 : i32
    %68 = vector.broadcast %c32_i32 : i32 to vector<8x128xi32>
    %69 = arith.cmpi slt, %64, %68 : vector<8x128xi32>
    %70 = arith.andi %67, %69 : vector<8x128xi1>
    %c32_i32_42 = arith.constant 32 : i32
    %71 = vector.broadcast %c32_i32_42 : i32 to vector<8x128xi32>
    %72 = arith.cmpi sge, %64, %71 : vector<8x128xi32>
    %c64_i32 = arith.constant 64 : i32
    %73 = vector.broadcast %c64_i32 : i32 to vector<8x128xi32>
    %74 = arith.cmpi slt, %64, %73 : vector<8x128xi32>
    %75 = arith.andi %72, %74 : vector<8x128xi1>
    %c64_i32_43 = arith.constant 64 : i32
    %76 = vector.broadcast %c64_i32_43 : i32 to vector<8x128xi32>
    %77 = arith.cmpi sge, %64, %76 : vector<8x128xi32>
    %c96_i32 = arith.constant 96 : i32
    %78 = vector.broadcast %c96_i32 : i32 to vector<8x128xi32>
    %79 = arith.cmpi slt, %64, %78 : vector<8x128xi32>
    %80 = arith.andi %77, %79 : vector<8x128xi1>
    %c96_i32_44 = arith.constant 96 : i32
    %81 = vector.broadcast %c96_i32_44 : i32 to vector<8x128xi32>
    %82 = arith.cmpi sge, %64, %81 : vector<8x128xi32>
    %c128_i32 = arith.constant 128 : i32
    %83 = vector.broadcast %c128_i32 : i32 to vector<8x128xi32>
    %84 = arith.cmpi slt, %64, %83 : vector<8x128xi32>
    %85 = arith.andi %82, %84 : vector<8x128xi1>
    %c0_i32_45 = arith.constant 0 : i32
    %86 = vector.broadcast %c0_i32_45 : i32 to vector<1x128xi32>
    %87 = arith.cmpi sge, %65, %86 : vector<1x128xi32>
    %c32_i32_46 = arith.constant 32 : i32
    %88 = vector.broadcast %c32_i32_46 : i32 to vector<1x128xi32>
    %89 = arith.cmpi slt, %65, %88 : vector<1x128xi32>
    %90 = arith.andi %87, %89 : vector<1x128xi1>
    %c32_i32_47 = arith.constant 32 : i32
    %91 = vector.broadcast %c32_i32_47 : i32 to vector<1x128xi32>
    %92 = arith.cmpi sge, %65, %91 : vector<1x128xi32>
    %c64_i32_48 = arith.constant 64 : i32
    %93 = vector.broadcast %c64_i32_48 : i32 to vector<1x128xi32>
    %94 = arith.cmpi slt, %65, %93 : vector<1x128xi32>
    %95 = arith.andi %92, %94 : vector<1x128xi1>
    %c64_i32_49 = arith.constant 64 : i32
    %96 = vector.broadcast %c64_i32_49 : i32 to vector<1x128xi32>
    %97 = arith.cmpi sge, %65, %96 : vector<1x128xi32>
    %c96_i32_50 = arith.constant 96 : i32
    %98 = vector.broadcast %c96_i32_50 : i32 to vector<1x128xi32>
    %99 = arith.cmpi slt, %65, %98 : vector<1x128xi32>
    %100 = arith.andi %97, %99 : vector<1x128xi1>
    %c96_i32_51 = arith.constant 96 : i32
    %101 = vector.broadcast %c96_i32_51 : i32 to vector<1x128xi32>
    %102 = arith.cmpi sge, %65, %101 : vector<1x128xi32>
    %c128_i32_52 = arith.constant 128 : i32
    %103 = vector.broadcast %c128_i32_52 : i32 to vector<1x128xi32>
    %104 = arith.cmpi slt, %65, %103 : vector<1x128xi32>
    %105 = arith.andi %102, %104 : vector<1x128xi1>
    %106 = vector.extract_strided_slice %63 {offsets = [0, 0], sizes = [8, 128], strides = [1, 1]} : vector<16x256xf32> to vector<8x128xf32>
    %107 = vector.extract_strided_slice %63 {offsets = [0, 128], sizes = [8, 128], strides = [1, 1]} : vector<16x256xf32> to vector<8x128xf32>
    %108 = vector.extract_strided_slice %54 {offsets = [0, 0], sizes = [1, 128], strides = [1, 1]} : vector<2x128xf32> to vector<1x128xf32>
    %109 = vector.broadcast %108 : vector<1x128xf32> to vector<8x128xf32>
    %110 = arith.mulf %109, %106 : vector<8x128xf32>
    %cst_53 = arith.constant 0.000000e+00 : f32
    %111 = vector.broadcast %cst_53 : f32 to vector<1x128xf32>
    %cst_54 = arith.constant 0.000000e+00 : f32
    %112 = vector.broadcast %cst_54 : f32 to vector<8x128xf32>
    %113 = arith.select %70, %110, %112 : vector<8x128xi1>, vector<8x128xf32>
    %cst_55 = arith.constant dense<0.000000e+00> : vector<8xf32>
    %114 = vector.multi_reduction <add>, %113, %cst_55 [1] : vector<8x128xf32> to vector<8xf32>
    %115 = vector.shape_cast %114 : vector<8xf32> to vector<8x1xf32>
    %cst_56 = arith.constant 0.176776692 : f32
    %116 = vector.broadcast %cst_56 : f32 to vector<8x1xf32>
    %117 = arith.mulf %115, %116 : vector<8x1xf32>
    %cst_57 = arith.constant dense<0xFF800000> : vector<1xf32>
    %118 = vector.multi_reduction <maximumf>, %117, %cst_57 [0] : vector<8x1xf32> to vector<1xf32>
    %119 = vector.shape_cast %118 : vector<1xf32> to vector<1x1xf32>
    %120 = vector.broadcast %119 : vector<1x1xf32> to vector<8x1xf32>
    %121 = arith.subf %117, %120 : vector<8x1xf32>
    %122 = math.exp %121 : vector<8x1xf32>
    %cst_58 = arith.constant dense<0.000000e+00> : vector<1xf32>
    %123 = vector.multi_reduction <add>, %122, %cst_58 [0] : vector<8x1xf32> to vector<1xf32>
    %124 = vector.shape_cast %123 : vector<1xf32> to vector<1x1xf32>
    %125 = tpu.reciprocal %124 {approx = true} : vector<1x1xf32> -> vector<1x1xf32>
    %126 = vector.broadcast %125 : vector<1x1xf32> to vector<8x1xf32>
    %127 = arith.mulf %122, %126 : vector<8x1xf32>
    %128 = vector.broadcast %127 : vector<8x1xf32> to vector<8x128xf32>
    %129 = arith.mulf %128, %107 : vector<8x128xf32>
    %cst_59 = arith.constant dense<0.000000e+00> : vector<128xf32>
    %130 = vector.multi_reduction <add>, %129, %cst_59 [0] : vector<8x128xf32> to vector<128xf32>
    %131 = vector.shape_cast %130 : vector<128xf32> to vector<1x128xf32>
    %cst_60 = arith.constant 0.000000e+00 : f32
    %132 = vector.broadcast %cst_60 : f32 to vector<1x128xf32>
    %133 = arith.select %90, %131, %132 : vector<1x128xi1>, vector<1x128xf32>
    %134 = arith.addf %111, %133 : vector<1x128xf32>
    %cst_61 = arith.constant 0.000000e+00 : f32
    %135 = vector.broadcast %cst_61 : f32 to vector<8x128xf32>
    %136 = arith.select %75, %110, %135 : vector<8x128xi1>, vector<8x128xf32>
    %cst_62 = arith.constant dense<0.000000e+00> : vector<8xf32>
    %137 = vector.multi_reduction <add>, %136, %cst_62 [1] : vector<8x128xf32> to vector<8xf32>
    %138 = vector.shape_cast %137 : vector<8xf32> to vector<8x1xf32>
    %cst_63 = arith.constant 0.176776692 : f32
    %139 = vector.broadcast %cst_63 : f32 to vector<8x1xf32>
    %140 = arith.mulf %138, %139 : vector<8x1xf32>
    %cst_64 = arith.constant dense<0xFF800000> : vector<1xf32>
    %141 = vector.multi_reduction <maximumf>, %140, %cst_64 [0] : vector<8x1xf32> to vector<1xf32>
    %142 = vector.shape_cast %141 : vector<1xf32> to vector<1x1xf32>
    %143 = vector.broadcast %142 : vector<1x1xf32> to vector<8x1xf32>
    %144 = arith.subf %140, %143 : vector<8x1xf32>
    %145 = math.exp %144 : vector<8x1xf32>
    %cst_65 = arith.constant dense<0.000000e+00> : vector<1xf32>
    %146 = vector.multi_reduction <add>, %145, %cst_65 [0] : vector<8x1xf32> to vector<1xf32>
    %147 = vector.shape_cast %146 : vector<1xf32> to vector<1x1xf32>
    %148 = tpu.reciprocal %147 {approx = true} : vector<1x1xf32> -> vector<1x1xf32>
    %149 = vector.broadcast %148 : vector<1x1xf32> to vector<8x1xf32>
    %150 = arith.mulf %145, %149 : vector<8x1xf32>
    %151 = vector.broadcast %150 : vector<8x1xf32> to vector<8x128xf32>
    %152 = arith.mulf %151, %107 : vector<8x128xf32>
    %cst_66 = arith.constant dense<0.000000e+00> : vector<128xf32>
    %153 = vector.multi_reduction <add>, %152, %cst_66 [0] : vector<8x128xf32> to vector<128xf32>
    %154 = vector.shape_cast %153 : vector<128xf32> to vector<1x128xf32>
    %cst_67 = arith.constant 0.000000e+00 : f32
    %155 = vector.broadcast %cst_67 : f32 to vector<1x128xf32>
    %156 = arith.select %95, %154, %155 : vector<1x128xi1>, vector<1x128xf32>
    %157 = arith.addf %134, %156 : vector<1x128xf32>
    %cst_68 = arith.constant 0.000000e+00 : f32
    %158 = vector.broadcast %cst_68 : f32 to vector<8x128xf32>
    %159 = arith.select %80, %110, %158 : vector<8x128xi1>, vector<8x128xf32>
    %cst_69 = arith.constant dense<0.000000e+00> : vector<8xf32>
    %160 = vector.multi_reduction <add>, %159, %cst_69 [1] : vector<8x128xf32> to vector<8xf32>
    %161 = vector.shape_cast %160 : vector<8xf32> to vector<8x1xf32>
    %cst_70 = arith.constant 0.176776692 : f32
    %162 = vector.broadcast %cst_70 : f32 to vector<8x1xf32>
    %163 = arith.mulf %161, %162 : vector<8x1xf32>
    %cst_71 = arith.constant dense<0xFF800000> : vector<1xf32>
    %164 = vector.multi_reduction <maximumf>, %163, %cst_71 [0] : vector<8x1xf32> to vector<1xf32>
    %165 = vector.shape_cast %164 : vector<1xf32> to vector<1x1xf32>
    %166 = vector.broadcast %165 : vector<1x1xf32> to vector<8x1xf32>
    %167 = arith.subf %163, %166 : vector<8x1xf32>
    %168 = math.exp %167 : vector<8x1xf32>
    %cst_72 = arith.constant dense<0.000000e+00> : vector<1xf32>
    %169 = vector.multi_reduction <add>, %168, %cst_72 [0] : vector<8x1xf32> to vector<1xf32>
    %170 = vector.shape_cast %169 : vector<1xf32> to vector<1x1xf32>
    %171 = tpu.reciprocal %170 {approx = true} : vector<1x1xf32> -> vector<1x1xf32>
    %172 = vector.broadcast %171 : vector<1x1xf32> to vector<8x1xf32>
    %173 = arith.mulf %168, %172 : vector<8x1xf32>
    %174 = vector.broadcast %173 : vector<8x1xf32> to vector<8x128xf32>
    %175 = arith.mulf %174, %107 : vector<8x128xf32>
    %cst_73 = arith.constant dense<0.000000e+00> : vector<128xf32>
    %176 = vector.multi_reduction <add>, %175, %cst_73 [0] : vector<8x128xf32> to vector<128xf32>
    %177 = vector.shape_cast %176 : vector<128xf32> to vector<1x128xf32>
    %cst_74 = arith.constant 0.000000e+00 : f32
    %178 = vector.broadcast %cst_74 : f32 to vector<1x128xf32>
    %179 = arith.select %100, %177, %178 : vector<1x128xi1>, vector<1x128xf32>
    %180 = arith.addf %157, %179 : vector<1x128xf32>
    %cst_75 = arith.constant 0.000000e+00 : f32
    %181 = vector.broadcast %cst_75 : f32 to vector<8x128xf32>
    %182 = arith.select %85, %110, %181 : vector<8x128xi1>, vector<8x128xf32>
    %cst_76 = arith.constant dense<0.000000e+00> : vector<8xf32>
    %183 = vector.multi_reduction <add>, %182, %cst_76 [1] : vector<8x128xf32> to vector<8xf32>
    %184 = vector.shape_cast %183 : vector<8xf32> to vector<8x1xf32>
    %cst_77 = arith.constant 0.176776692 : f32
    %185 = vector.broadcast %cst_77 : f32 to vector<8x1xf32>
    %186 = arith.mulf %184, %185 : vector<8x1xf32>
    %cst_78 = arith.constant dense<0xFF800000> : vector<1xf32>
    %187 = vector.multi_reduction <maximumf>, %186, %cst_78 [0] : vector<8x1xf32> to vector<1xf32>
    %188 = vector.shape_cast %187 : vector<1xf32> to vector<1x1xf32>
    %189 = vector.broadcast %188 : vector<1x1xf32> to vector<8x1xf32>
    %190 = arith.subf %186, %189 : vector<8x1xf32>
    %191 = math.exp %190 : vector<8x1xf32>
    %cst_79 = arith.constant dense<0.000000e+00> : vector<1xf32>
    %192 = vector.multi_reduction <add>, %191, %cst_79 [0] : vector<8x1xf32> to vector<1xf32>
    %193 = vector.shape_cast %192 : vector<1xf32> to vector<1x1xf32>
    %194 = tpu.reciprocal %193 {approx = true} : vector<1x1xf32> -> vector<1x1xf32>
    %195 = vector.broadcast %194 : vector<1x1xf32> to vector<8x1xf32>
    %196 = arith.mulf %191, %195 : vector<8x1xf32>
    %197 = vector.broadcast %196 : vector<8x1xf32> to vector<8x128xf32>
    %198 = arith.mulf %197, %107 : vector<8x128xf32>
    %cst_80 = arith.constant dense<0.000000e+00> : vector<128xf32>
    %199 = vector.multi_reduction <add>, %198, %cst_80 [0] : vector<8x128xf32> to vector<128xf32>
    %200 = vector.shape_cast %199 : vector<128xf32> to vector<1x128xf32>
    %cst_81 = arith.constant 0.000000e+00 : f32
    %201 = vector.broadcast %cst_81 : f32 to vector<1x128xf32>
    %202 = arith.select %105, %200, %201 : vector<1x128xi1>, vector<1x128xf32>
    %203 = arith.addf %180, %202 : vector<1x128xf32>
    %204 = vector.extract_strided_slice %63 {offsets = [8, 0], sizes = [8, 128], strides = [1, 1]} : vector<16x256xf32> to vector<8x128xf32>
    %205 = vector.extract_strided_slice %63 {offsets = [8, 128], sizes = [8, 128], strides = [1, 1]} : vector<16x256xf32> to vector<8x128xf32>
    %206 = vector.extract_strided_slice %54 {offsets = [1, 0], sizes = [1, 128], strides = [1, 1]} : vector<2x128xf32> to vector<1x128xf32>
    %207 = vector.broadcast %206 : vector<1x128xf32> to vector<8x128xf32>
    %208 = arith.mulf %207, %204 : vector<8x128xf32>
    %cst_82 = arith.constant 0.000000e+00 : f32
    %209 = vector.broadcast %cst_82 : f32 to vector<1x128xf32>
    %cst_83 = arith.constant 0.000000e+00 : f32
    %210 = vector.broadcast %cst_83 : f32 to vector<8x128xf32>
    %211 = arith.select %70, %208, %210 : vector<8x128xi1>, vector<8x128xf32>
    %cst_84 = arith.constant dense<0.000000e+00> : vector<8xf32>
    %212 = vector.multi_reduction <add>, %211, %cst_84 [1] : vector<8x128xf32> to vector<8xf32>
    %213 = vector.shape_cast %212 : vector<8xf32> to vector<8x1xf32>
    %cst_85 = arith.constant 0.176776692 : f32
    %214 = vector.broadcast %cst_85 : f32 to vector<8x1xf32>
    %215 = arith.mulf %213, %214 : vector<8x1xf32>
    %cst_86 = arith.constant dense<0xFF800000> : vector<1xf32>
    %216 = vector.multi_reduction <maximumf>, %215, %cst_86 [0] : vector<8x1xf32> to vector<1xf32>
    %217 = vector.shape_cast %216 : vector<1xf32> to vector<1x1xf32>
    %218 = vector.broadcast %217 : vector<1x1xf32> to vector<8x1xf32>
    %219 = arith.subf %215, %218 : vector<8x1xf32>
    %220 = math.exp %219 : vector<8x1xf32>
    %cst_87 = arith.constant dense<0.000000e+00> : vector<1xf32>
    %221 = vector.multi_reduction <add>, %220, %cst_87 [0] : vector<8x1xf32> to vector<1xf32>
    %222 = vector.shape_cast %221 : vector<1xf32> to vector<1x1xf32>
    %223 = tpu.reciprocal %222 {approx = true} : vector<1x1xf32> -> vector<1x1xf32>
    %224 = vector.broadcast %223 : vector<1x1xf32> to vector<8x1xf32>
    %225 = arith.mulf %220, %224 : vector<8x1xf32>
    %226 = vector.broadcast %225 : vector<8x1xf32> to vector<8x128xf32>
    %227 = arith.mulf %226, %205 : vector<8x128xf32>
    %cst_88 = arith.constant dense<0.000000e+00> : vector<128xf32>
    %228 = vector.multi_reduction <add>, %227, %cst_88 [0] : vector<8x128xf32> to vector<128xf32>
    %229 = vector.shape_cast %228 : vector<128xf32> to vector<1x128xf32>
    %cst_89 = arith.constant 0.000000e+00 : f32
    %230 = vector.broadcast %cst_89 : f32 to vector<1x128xf32>
    %231 = arith.select %90, %229, %230 : vector<1x128xi1>, vector<1x128xf32>
    %232 = arith.addf %209, %231 : vector<1x128xf32>
    %cst_90 = arith.constant 0.000000e+00 : f32
    %233 = vector.broadcast %cst_90 : f32 to vector<8x128xf32>
    %234 = arith.select %75, %208, %233 : vector<8x128xi1>, vector<8x128xf32>
    %cst_91 = arith.constant dense<0.000000e+00> : vector<8xf32>
    %235 = vector.multi_reduction <add>, %234, %cst_91 [1] : vector<8x128xf32> to vector<8xf32>
    %236 = vector.shape_cast %235 : vector<8xf32> to vector<8x1xf32>
    %cst_92 = arith.constant 0.176776692 : f32
    %237 = vector.broadcast %cst_92 : f32 to vector<8x1xf32>
    %238 = arith.mulf %236, %237 : vector<8x1xf32>
    %cst_93 = arith.constant dense<0xFF800000> : vector<1xf32>
    %239 = vector.multi_reduction <maximumf>, %238, %cst_93 [0] : vector<8x1xf32> to vector<1xf32>
    %240 = vector.shape_cast %239 : vector<1xf32> to vector<1x1xf32>
    %241 = vector.broadcast %240 : vector<1x1xf32> to vector<8x1xf32>
    %242 = arith.subf %238, %241 : vector<8x1xf32>
    %243 = math.exp %242 : vector<8x1xf32>
    %cst_94 = arith.constant dense<0.000000e+00> : vector<1xf32>
    %244 = vector.multi_reduction <add>, %243, %cst_94 [0] : vector<8x1xf32> to vector<1xf32>
    %245 = vector.shape_cast %244 : vector<1xf32> to vector<1x1xf32>
    %246 = tpu.reciprocal %245 {approx = true} : vector<1x1xf32> -> vector<1x1xf32>
    %247 = vector.broadcast %246 : vector<1x1xf32> to vector<8x1xf32>
    %248 = arith.mulf %243, %247 : vector<8x1xf32>
    %249 = vector.broadcast %248 : vector<8x1xf32> to vector<8x128xf32>
    %250 = arith.mulf %249, %205 : vector<8x128xf32>
    %cst_95 = arith.constant dense<0.000000e+00> : vector<128xf32>
    %251 = vector.multi_reduction <add>, %250, %cst_95 [0] : vector<8x128xf32> to vector<128xf32>
    %252 = vector.shape_cast %251 : vector<128xf32> to vector<1x128xf32>
    %cst_96 = arith.constant 0.000000e+00 : f32
    %253 = vector.broadcast %cst_96 : f32 to vector<1x128xf32>
    %254 = arith.select %95, %252, %253 : vector<1x128xi1>, vector<1x128xf32>
    %255 = arith.addf %232, %254 : vector<1x128xf32>
    %cst_97 = arith.constant 0.000000e+00 : f32
    %256 = vector.broadcast %cst_97 : f32 to vector<8x128xf32>
    %257 = arith.select %80, %208, %256 : vector<8x128xi1>, vector<8x128xf32>
    %cst_98 = arith.constant dense<0.000000e+00> : vector<8xf32>
    %258 = vector.multi_reduction <add>, %257, %cst_98 [1] : vector<8x128xf32> to vector<8xf32>
    %259 = vector.shape_cast %258 : vector<8xf32> to vector<8x1xf32>
    %cst_99 = arith.constant 0.176776692 : f32
    %260 = vector.broadcast %cst_99 : f32 to vector<8x1xf32>
    %261 = arith.mulf %259, %260 : vector<8x1xf32>
    %cst_100 = arith.constant dense<0xFF800000> : vector<1xf32>
    %262 = vector.multi_reduction <maximumf>, %261, %cst_100 [0] : vector<8x1xf32> to vector<1xf32>
    %263 = vector.shape_cast %262 : vector<1xf32> to vector<1x1xf32>
    %264 = vector.broadcast %263 : vector<1x1xf32> to vector<8x1xf32>
    %265 = arith.subf %261, %264 : vector<8x1xf32>
    %266 = math.exp %265 : vector<8x1xf32>
    %cst_101 = arith.constant dense<0.000000e+00> : vector<1xf32>
    %267 = vector.multi_reduction <add>, %266, %cst_101 [0] : vector<8x1xf32> to vector<1xf32>
    %268 = vector.shape_cast %267 : vector<1xf32> to vector<1x1xf32>
    %269 = tpu.reciprocal %268 {approx = true} : vector<1x1xf32> -> vector<1x1xf32>
    %270 = vector.broadcast %269 : vector<1x1xf32> to vector<8x1xf32>
    %271 = arith.mulf %266, %270 : vector<8x1xf32>
    %272 = vector.broadcast %271 : vector<8x1xf32> to vector<8x128xf32>
    %273 = arith.mulf %272, %205 : vector<8x128xf32>
    %cst_102 = arith.constant dense<0.000000e+00> : vector<128xf32>
    %274 = vector.multi_reduction <add>, %273, %cst_102 [0] : vector<8x128xf32> to vector<128xf32>
    %275 = vector.shape_cast %274 : vector<128xf32> to vector<1x128xf32>
    %cst_103 = arith.constant 0.000000e+00 : f32
    %276 = vector.broadcast %cst_103 : f32 to vector<1x128xf32>
    %277 = arith.select %100, %275, %276 : vector<1x128xi1>, vector<1x128xf32>
    %278 = arith.addf %255, %277 : vector<1x128xf32>
    %cst_104 = arith.constant 0.000000e+00 : f32
    %279 = vector.broadcast %cst_104 : f32 to vector<8x128xf32>
    %280 = arith.select %85, %208, %279 : vector<8x128xi1>, vector<8x128xf32>
    %cst_105 = arith.constant dense<0.000000e+00> : vector<8xf32>
    %281 = vector.multi_reduction <add>, %280, %cst_105 [1] : vector<8x128xf32> to vector<8xf32>
    %282 = vector.shape_cast %281 : vector<8xf32> to vector<8x1xf32>
    %cst_106 = arith.constant 0.176776692 : f32
    %283 = vector.broadcast %cst_106 : f32 to vector<8x1xf32>
    %284 = arith.mulf %282, %283 : vector<8x1xf32>
    %cst_107 = arith.constant dense<0xFF800000> : vector<1xf32>
    %285 = vector.multi_reduction <maximumf>, %284, %cst_107 [0] : vector<8x1xf32> to vector<1xf32>
    %286 = vector.shape_cast %285 : vector<1xf32> to vector<1x1xf32>
    %287 = vector.broadcast %286 : vector<1x1xf32> to vector<8x1xf32>
    %288 = arith.subf %284, %287 : vector<8x1xf32>
    %289 = math.exp %288 : vector<8x1xf32>
    %cst_108 = arith.constant dense<0.000000e+00> : vector<1xf32>
    %290 = vector.multi_reduction <add>, %289, %cst_108 [0] : vector<8x1xf32> to vector<1xf32>
    %291 = vector.shape_cast %290 : vector<1xf32> to vector<1x1xf32>
    %292 = tpu.reciprocal %291 {approx = true} : vector<1x1xf32> -> vector<1x1xf32>
    %293 = vector.broadcast %292 : vector<1x1xf32> to vector<8x1xf32>
    %294 = arith.mulf %289, %293 : vector<8x1xf32>
    %295 = vector.broadcast %294 : vector<8x1xf32> to vector<8x128xf32>
    %296 = arith.mulf %295, %205 : vector<8x128xf32>
    %cst_109 = arith.constant dense<0.000000e+00> : vector<128xf32>
    %297 = vector.multi_reduction <add>, %296, %cst_109 [0] : vector<8x128xf32> to vector<128xf32>
    %298 = vector.shape_cast %297 : vector<128xf32> to vector<1x128xf32>
    %cst_110 = arith.constant 0.000000e+00 : f32
    %299 = vector.broadcast %cst_110 : f32 to vector<1x128xf32>
    %300 = arith.select %105, %298, %299 : vector<1x128xi1>, vector<1x128xf32>
    %301 = arith.addf %278, %300 : vector<1x128xf32>
    %302 = tpu.concatenate %203, %301 in 0 : vector<1x128xf32>, vector<1x128xf32> -> vector<2x128xf32>
    %303 = arith.truncf %302 : vector<2x128xf32> to vector<2x128xbf16>
    %c0_111 = arith.constant 0 : index
    %c0_112 = arith.constant 0 : index
    %c0_113 = arith.constant 0 : index
    %304 = vector.load %arg14[%c0_111, %c0_112, %c0_113] : memref<1x128x128xbf16, #tpu.memory_space<vmem>>, vector<1x128x128xbf16>
    %305 = vector.shape_cast %304 : vector<1x128x128xbf16> to vector<128x128xbf16>
    %cst_114 = arith.constant dense<0.000000e+00> : vector<2x128xf32>
    %306 = tpu.matmul %303, %305, %cst_114 {dimension_numbers = #tpu.dot_dimension_numbers<[1], [0], [0], [1], [0, 0, 1, 1], [], []>} : vector<2x128xbf16>, vector<128x128xbf16>, vector<2x128xf32> -> vector<2x128xf32>
    %c0_115 = arith.constant 0 : index
    %c0_116 = arith.constant 0 : index
    %c0_117 = arith.constant 0 : index
    %307 = vector.load %arg15[%c0_115, %c0_116, %c0_117] : memref<1x1x128xf32, #tpu.memory_space<vmem>>, vector<1x1x128xf32>
    %308 = vector.shape_cast %307 : vector<1x1x128xf32> to vector<1x128xf32>
    %309 = vector.broadcast %308 : vector<1x128xf32> to vector<2x128xf32>
    %310 = arith.addf %306, %309 : vector<2x128xf32>
    %311 = arith.addf %46, %310 : vector<2x128xf32>
    %c0_118 = arith.constant 0 : index
    %c0_119 = arith.constant 0 : index
    %c0_120 = arith.constant 0 : index
    %312 = vector.load %arg16[%c0_118, %c0_119, %c0_120] : memref<1x2x128xf32, #tpu.memory_space<vmem>>, vector<1x1x128xf32>
    %313 = vector.shape_cast %312 : vector<1x1x128xf32> to vector<1x128xf32>
    %c0_121 = arith.constant 0 : index
    %c1_122 = arith.constant 1 : index
    %c0_123 = arith.constant 0 : index
    %314 = vector.load %arg16[%c0_121, %c1_122, %c0_123] : memref<1x2x128xf32, #tpu.memory_space<vmem>>, vector<1x1x128xf32>
    %315 = vector.shape_cast %314 : vector<1x1x128xf32> to vector<1x128xf32>
    %cst_124 = arith.constant dense<0.000000e+00> : vector<2xf32>
    %316 = vector.multi_reduction <add>, %311, %cst_124 [1] : vector<2x128xf32> to vector<2xf32>
    %317 = vector.shape_cast %316 : vector<2xf32> to vector<2x1xf32>
    %cst_125 = arith.constant 1.280000e+02 : f32
    %318 = vector.broadcast %cst_125 : f32 to vector<2x1xf32>
    %319 = arith.divf %317, %318 : vector<2x1xf32>
    %320 = vector.broadcast %319 : vector<2x1xf32> to vector<2x128xf32>
    %321 = arith.subf %311, %320 : vector<2x128xf32>
    %322 = arith.mulf %321, %321 : vector<2x128xf32>
    %cst_126 = arith.constant dense<0.000000e+00> : vector<2xf32>
    %323 = vector.multi_reduction <add>, %322, %cst_126 [1] : vector<2x128xf32> to vector<2xf32>
    %324 = vector.shape_cast %323 : vector<2xf32> to vector<2x1xf32>
    %cst_127 = arith.constant 1.280000e+02 : f32
    %325 = vector.broadcast %cst_127 : f32 to vector<2x1xf32>
    %326 = arith.divf %324, %325 : vector<2x1xf32>
    %327 = vector.broadcast %319 : vector<2x1xf32> to vector<2x128xf32>
    %328 = arith.subf %311, %327 : vector<2x128xf32>
    %cst_128 = arith.constant 9.99999974E-6 : f32
    %329 = vector.broadcast %cst_128 : f32 to vector<2x1xf32>
    %330 = arith.addf %326, %329 : vector<2x1xf32>
    %331 = math.rsqrt %330 : vector<2x1xf32>
    %332 = vector.broadcast %331 : vector<2x1xf32> to vector<2x128xf32>
    %333 = arith.mulf %328, %332 : vector<2x128xf32>
    %334 = vector.broadcast %313 : vector<1x128xf32> to vector<2x128xf32>
    %335 = arith.mulf %333, %334 : vector<2x128xf32>
    %336 = vector.broadcast %315 : vector<1x128xf32> to vector<2x128xf32>
    %337 = arith.addf %335, %336 : vector<2x128xf32>
    %338 = arith.truncf %337 : vector<2x128xf32> to vector<2x128xbf16>
    %c0_129 = arith.constant 0 : index
    %c0_130 = arith.constant 0 : index
    %c0_131 = arith.constant 0 : index
    %339 = vector.load %arg17[%c0_129, %c0_130, %c0_131] : memref<1x128x256xbf16, #tpu.memory_space<vmem>>, vector<1x128x256xbf16>
    %340 = vector.shape_cast %339 : vector<1x128x256xbf16> to vector<128x256xbf16>
    %cst_132 = arith.constant dense<0.000000e+00> : vector<2x256xf32>
    %341 = tpu.matmul %338, %340, %cst_132 {dimension_numbers = #tpu.dot_dimension_numbers<[1], [0], [0], [1], [0, 0, 1, 1], [], []>} : vector<2x128xbf16>, vector<128x256xbf16>, vector<2x256xf32> -> vector<2x256xf32>
    %c0_133 = arith.constant 0 : index
    %c0_134 = arith.constant 0 : index
    %c0_135 = arith.constant 0 : index
    %342 = vector.load %arg18[%c0_133, %c0_134, %c0_135] : memref<1x1x256xf32, #tpu.memory_space<vmem>>, vector<1x1x256xf32>
    %343 = vector.shape_cast %342 : vector<1x1x256xf32> to vector<1x256xf32>
    %344 = vector.broadcast %343 : vector<1x256xf32> to vector<2x256xf32>
    %345 = arith.addf %341, %344 : vector<2x256xf32>
    %cst_136 = arith.constant 5.000000e-01 : f32
    %346 = vector.broadcast %cst_136 : f32 to vector<2x256xf32>
    %347 = arith.mulf %346, %345 : vector<2x256xf32>
    %cst_137 = arith.constant 1.41421354 : f32
    %348 = vector.broadcast %cst_137 : f32 to vector<2x256xf32>
    %349 = arith.divf %345, %348 : vector<2x256xf32>
    %350 = math.erf %349 : vector<2x256xf32>
    %cst_138 = arith.constant 1.000000e+00 : f32
    %351 = vector.broadcast %cst_138 : f32 to vector<2x256xf32>
    %352 = arith.addf %351, %350 : vector<2x256xf32>
    %353 = arith.mulf %347, %352 : vector<2x256xf32>
    %354 = arith.truncf %353 : vector<2x256xf32> to vector<2x256xbf16>
    %c0_139 = arith.constant 0 : index
    %c0_140 = arith.constant 0 : index
    %c0_141 = arith.constant 0 : index
    %355 = vector.load %arg19[%c0_139, %c0_140, %c0_141] : memref<1x256x128xbf16, #tpu.memory_space<vmem>>, vector<1x256x128xbf16>
    %356 = vector.shape_cast %355 : vector<1x256x128xbf16> to vector<256x128xbf16>
    %cst_142 = arith.constant dense<0.000000e+00> : vector<2x128xf32>
    %357 = tpu.matmul %354, %356, %cst_142 {dimension_numbers = #tpu.dot_dimension_numbers<[1], [0], [0], [1], [0, 0, 1, 1], [], []>} : vector<2x256xbf16>, vector<256x128xbf16>, vector<2x128xf32> -> vector<2x128xf32>
    %c0_143 = arith.constant 0 : index
    %c0_144 = arith.constant 0 : index
    %c0_145 = arith.constant 0 : index
    %358 = vector.load %arg20[%c0_143, %c0_144, %c0_145] : memref<1x1x128xf32, #tpu.memory_space<vmem>>, vector<1x1x128xf32>
    %359 = vector.shape_cast %358 : vector<1x1x128xf32> to vector<1x128xf32>
    %360 = vector.broadcast %359 : vector<1x128xf32> to vector<2x128xf32>
    %361 = arith.addf %357, %360 : vector<2x128xf32>
    %362 = arith.addf %337, %361 : vector<2x128xf32>
    %c0_146 = arith.constant 0 : index
    %c0_147 = arith.constant 0 : index
    %c0_148 = arith.constant 0 : index
    %363 = vector.load %arg21[%c0_146, %c0_147, %c0_148] : memref<1x2x128xf32, #tpu.memory_space<vmem>>, vector<1x1x128xf32>
    %364 = vector.shape_cast %363 : vector<1x1x128xf32> to vector<1x128xf32>
    %c0_149 = arith.constant 0 : index
    %c1_150 = arith.constant 1 : index
    %c0_151 = arith.constant 0 : index
    %365 = vector.load %arg21[%c0_149, %c1_150, %c0_151] : memref<1x2x128xf32, #tpu.memory_space<vmem>>, vector<1x1x128xf32>
    %366 = vector.shape_cast %365 : vector<1x1x128xf32> to vector<1x128xf32>
    %cst_152 = arith.constant dense<0.000000e+00> : vector<2xf32>
    %367 = vector.multi_reduction <add>, %362, %cst_152 [1] : vector<2x128xf32> to vector<2xf32>
    %368 = vector.shape_cast %367 : vector<2xf32> to vector<2x1xf32>
    %cst_153 = arith.constant 1.280000e+02 : f32
    %369 = vector.broadcast %cst_153 : f32 to vector<2x1xf32>
    %370 = arith.divf %368, %369 : vector<2x1xf32>
    %371 = vector.broadcast %370 : vector<2x1xf32> to vector<2x128xf32>
    %372 = arith.subf %362, %371 : vector<2x128xf32>
    %373 = arith.mulf %372, %372 : vector<2x128xf32>
    %cst_154 = arith.constant dense<0.000000e+00> : vector<2xf32>
    %374 = vector.multi_reduction <add>, %373, %cst_154 [1] : vector<2x128xf32> to vector<2xf32>
    %375 = vector.shape_cast %374 : vector<2xf32> to vector<2x1xf32>
    %cst_155 = arith.constant 1.280000e+02 : f32
    %376 = vector.broadcast %cst_155 : f32 to vector<2x1xf32>
    %377 = arith.divf %375, %376 : vector<2x1xf32>
    %378 = vector.broadcast %370 : vector<2x1xf32> to vector<2x128xf32>
    %379 = arith.subf %362, %378 : vector<2x128xf32>
    %cst_156 = arith.constant 9.99999974E-6 : f32
    %380 = vector.broadcast %cst_156 : f32 to vector<2x1xf32>
    %381 = arith.addf %377, %380 : vector<2x1xf32>
    %382 = math.rsqrt %381 : vector<2x1xf32>
    %383 = vector.broadcast %382 : vector<2x1xf32> to vector<2x128xf32>
    %384 = arith.mulf %379, %383 : vector<2x128xf32>
    %385 = vector.broadcast %364 : vector<1x128xf32> to vector<2x128xf32>
    %386 = arith.mulf %384, %385 : vector<2x128xf32>
    %387 = vector.broadcast %366 : vector<1x128xf32> to vector<2x128xf32>
    %388 = arith.addf %386, %387 : vector<2x128xf32>
    %c0_157 = arith.constant 0 : index
    %c0_158 = arith.constant 0 : index
    %389 = vector.load %arg23[%c0_157, %c0_158] : memref<2x128xf32, #tpu.memory_space<vmem>>, vector<2x128xf32>
    tpu.vector_store %arg23[%c0_157, %c0_158], %388 {strides = array<i32>} : memref<2x128xf32, #tpu.memory_space<vmem>>, vector<2x128xf32>,
    %c1_i32 = arith.constant 1 : i32
    %390 = arith.cmpi eq, %arg0, %c1_i32 : i32
    %391 = arith.extui %390 : i1 to i32
    %c0_i32_159 = arith.constant 0 : i32
    %392 = arith.cmpi ne, %391, %c0_i32_159 : i32
    scf.if %392 {
      %393 = arith.truncf %388 : vector<2x128xf32> to vector<2x128xbf16>
      %c0_160 = arith.constant 0 : index
      %c0_161 = arith.constant 0 : index
      %394 = vector.load %arg3[%c0_160, %c0_161] : memref<128x256xbf16, #tpu.memory_space<vmem>>, vector<128x256xbf16>
      %cst_162 = arith.constant dense<0.000000e+00> : vector<2x256xf32>
      %395 = tpu.matmul %393, %394, %cst_162 {dimension_numbers = #tpu.dot_dimension_numbers<[1], [0], [0], [1], [0, 0, 1, 1], [], []>} : vector<2x128xbf16>, vector<128x256xbf16>, vector<2x256xf32> -> vector<2x256xf32>
      %c0_163 = arith.constant 0 : index
      %c0_164 = arith.constant 0 : index
      %396 = vector.load %arg4[%c0_163, %c0_164] : memref<1x256xf32, #tpu.memory_space<vmem>>, vector<1x256xf32>
      %397 = vector.broadcast %396 : vector<1x256xf32> to vector<2x256xf32>
      %398 = arith.addf %395, %397 : vector<2x256xf32>
      %c0_165 = arith.constant 0 : index
      %c0_166 = arith.constant 0 : index
      %399 = vector.load %arg22[%c0_165, %c0_166] : memref<2x256xf32, #tpu.memory_space<vmem>>, vector<2x256xf32>
      tpu.vector_store %arg22[%c0_165, %c0_166], %398 {strides = array<i32>} : memref<2x256xf32, #tpu.memory_space<vmem>>, vector<2x256xf32>,
    } else {
    }
    return
  }
  func.func @transform_0(%arg0: i32) -> (i32, i32) {
    %c0_i32 = arith.constant 0 : i32
    %c0_i32_0 = arith.constant 0 : i32
    %c0_i32_1 = arith.constant 0 : i32
    return %c0_i32, %c0_i32_0 : i32, i32
  }
  func.func @transform_1(%arg0: i32) -> (i32, i32) {
    %c0_i32 = arith.constant 0 : i32
    %c0_i32_0 = arith.constant 0 : i32
    %c0_i32_1 = arith.constant 0 : i32
    return %c0_i32, %c0_i32_0 : i32, i32
  }
  func.func @transform_2(%arg0: i32) -> (i32, i32) {
    %c0_i32 = arith.constant 0 : i32
    %c0_i32_0 = arith.constant 0 : i32
    %c0_i32_1 = arith.constant 0 : i32
    return %c0_i32, %c0_i32_0 : i32, i32
  }
  func.func @transform_3(%arg0: i32) -> (i32, i32) {
    %c0_i32 = arith.constant 0 : i32
    %c0_i32_0 = arith.constant 0 : i32
    %c0_i32_1 = arith.constant 0 : i32
    return %c0_i32, %c0_i32_0 : i32, i32
  }
  func.func @transform_4(%arg0: i32) -> (i32, i32, i32) {
    %c0_i32 = arith.constant 0 : i32
    %c0_i32_0 = arith.constant 0 : i32
    %c0_i32_1 = arith.constant 0 : i32
    return %arg0, %c0_i32, %c0_i32_0 : i32, i32, i32
  }
  func.func @transform_5(%arg0: i32) -> (i32, i32, i32) {
    %c0_i32 = arith.constant 0 : i32
    %c0_i32_0 = arith.constant 0 : i32
    %c0_i32_1 = arith.constant 0 : i32
    return %arg0, %c0_i32, %c0_i32_0 : i32, i32, i32
  }
  func.func @transform_6(%arg0: i32) -> (i32, i32, i32) {
    %c0_i32 = arith.constant 0 : i32
    %c0_i32_0 = arith.constant 0 : i32
    %c0_i32_1 = arith.constant 0 : i32
    return %arg0, %c0_i32, %c0_i32_0 : i32, i32, i32
  }
  func.func @transform_7(%arg0: i32) -> (i32, i32, i32) {
    %c0_i32 = arith.constant 0 : i32
    %c0_i32_0 = arith.constant 0 : i32
    %c0_i32_1 = arith.constant 0 : i32
    return %arg0, %c0_i32, %c0_i32_0 : i32, i32, i32
  }
  func.func @transform_8(%arg0: i32) -> (i32, i32, i32) {
    %c0_i32 = arith.constant 0 : i32
    %c0_i32_0 = arith.constant 0 : i32
    %c0_i32_1 = arith.constant 0 : i32
    return %arg0, %c0_i32, %c0_i32_0 : i32, i32, i32
  }
  func.func @transform_9(%arg0: i32) -> (i32, i32, i32) {
    %c0_i32 = arith.constant 0 : i32
    %c0_i32_0 = arith.constant 0 : i32
    %c0_i32_1 = arith.constant 0 : i32
    return %arg0, %c0_i32, %c0_i32_0 : i32, i32, i32
  }
  func.func @transform_10(%arg0: i32) -> (i32, i32, i32) {
    %c0_i32 = arith.constant 0 : i32
    %c0_i32_0 = arith.constant 0 : i32
    %c0_i32_1 = arith.constant 0 : i32
    return %arg0, %c0_i32, %c0_i32_0 : i32, i32, i32
  }
  func.func @transform_11(%arg0: i32) -> (i32, i32, i32) {
    %c0_i32 = arith.constant 0 : i32
    %c0_i32_0 = arith.constant 0 : i32
    %c0_i32_1 = arith.constant 0 : i32
    return %arg0, %c0_i32, %c0_i32_0 : i32, i32, i32
  }
  func.func @transform_12(%arg0: i32) -> (i32, i32, i32) {
    %c0_i32 = arith.constant 0 : i32
    %c0_i32_0 = arith.constant 0 : i32
    %c0_i32_1 = arith.constant 0 : i32
    return %arg0, %c0_i32, %c0_i32_0 : i32, i32, i32
  }
  func.func @transform_13(%arg0: i32) -> (i32, i32, i32) {
    %c0_i32 = arith.constant 0 : i32
    %c0_i32_0 = arith.constant 0 : i32
    %c0_i32_1 = arith.constant 0 : i32
    return %arg0, %c0_i32, %c0_i32_0 : i32, i32, i32
  }
  func.func @transform_14(%arg0: i32) -> (i32, i32, i32) {
    %c0_i32 = arith.constant 0 : i32
    %c0_i32_0 = arith.constant 0 : i32
    %c0_i32_1 = arith.constant 0 : i32
    return %arg0, %c0_i32, %c0_i32_0 : i32, i32, i32
  }
  func.func @transform_15(%arg0: i32) -> (i32, i32, i32) {
    %c0_i32 = arith.constant 0 : i32
    %c0_i32_0 = arith.constant 0 : i32
    %c0_i32_1 = arith.constant 0 : i32
    return %arg0, %c0_i32, %c0_i32_0 : i32, i32, i32
  }
  func.func @transform_16(%arg0: i32) -> (i32, i32, i32) {
    %c0_i32 = arith.constant 0 : i32
    %c0_i32_0 = arith.constant 0 : i32
    %c0_i32_1 = arith.constant 0 : i32
    return %arg0, %c0_i32, %c0_i32_0 : i32, i32, i32
  }
  func.func @transform_17(%arg0: i32) -> (i32, i32, i32) {
    %c0_i32 = arith.constant 0 : i32
    %c0_i32_0 = arith.constant 0 : i32
    %c0_i32_1 = arith.constant 0 : i32
    return %arg0, %c0_i32, %c0_i32_0 : i32, i32, i32
  }
  func.func @transform_18(%arg0: i32) -> (i32, i32, i32) {
    %c0_i32 = arith.constant 0 : i32
    %c0_i32_0 = arith.constant 0 : i32
    %c0_i32_1 = arith.constant 0 : i32
    return %arg0, %c0_i32, %c0_i32_0 : i32, i32, i32
  }
  func.func @transform_19(%arg0: i32) -> (i32, i32, i32) {
    %c0_i32 = arith.constant 0 : i32
    %c0_i32_0 = arith.constant 0 : i32
    %c0_i32_1 = arith.constant 0 : i32
    return %arg0, %c0_i32, %c0_i32_0 : i32, i32, i32
  }
  func.func @transform_20(%arg0: i32) -> (i32, i32, i32) {
    %c0_i32 = arith.constant 0 : i32
    %c0_i32_0 = arith.constant 0 : i32
    %c0_i32_1 = arith.constant 0 : i32
    return %arg0, %c0_i32, %c0_i32_0 : i32, i32, i32
  }
  func.func @transform_21(%arg0: i32) -> (i32, i32) {
    %c0_i32 = arith.constant 0 : i32
    %c0_i32_0 = arith.constant 0 : i32
    %c0_i32_1 = arith.constant 0 : i32
    return %c0_i32, %c0_i32_0 : i32, i32
  }
}

</mosaic_0001>

<bundles_post_ra>
// kernel: forward.2
= control target key start
LH: loop header
LB: loop body
LE: loop exit
PB: predicated region body
PF: predicated region fallthrough
CT: control target
= control target key end

     0   :  { %s3867_s18 = smov 0   ;;  %s4509_s0 = inlined_call_operand.vmem [shape: f32[16,896], index: 0, kind: input, shape index: {}]   ;;  %s4510_s1 = inlined_call_operand.vmem [shape: bf16[896,128], index: 1, kind: input, shape index: {}]   ;;  %s4511_s2 = inlined_call_operand.vmem [shape: f32[1,128], index: 2, kind: input, shape index: {}]   ;;  %s4512_s3 = inlined_call_operand.vmem [shape: f32[16,128], index: 3, kind: input, shape index: {}]   ;;  %s4513_s4 = inlined_call_operand.vmem [shape: f32[2,128], index: 4, kind: input, shape index: {}]   ;;  %s4514_s5 = inlined_call_operand.vmem [shape: bf16[2,128,384], index: 5, kind: input, shape index: {}]   ;;  %s4515_s6 = inlined_call_operand.vmem [shape: f32[2,1,384], index: 6, kind: input, shape index: {}]   ;;  %s4516_s7 = inlined_call_operand.vmem [shape: bf16[2,128,128], index: 7, kind: input, shape index: {}]   ;;  %s4517_s8 = inlined_call_operand.vmem [shape: f32[2,1,128], index: 8, kind: input, shape index: {}]   ;;  %s4518_s9 = inlined_call_operand.vmem [shape: f32[2,2,128], index: 9, kind: input, shape index: {}]   ;;  %s4519_s10 = inlined_call_operand.vmem [shape: bf16[2,128,256], index: 10, kind: input, shape index: {}]   ;;  %s4520_s11 = inlined_call_operand.vmem [shape: f32[2,1,256], index: 11, kind: input, shape index: {}]   ;;  %s4521_s12 = inlined_call_operand.vmem [shape: bf16[2,256,128], index: 12, kind: input, shape index: {}]   ;;  %s4522_s13 = inlined_call_operand.vmem [shape: f32[2,1,128], index: 13, kind: input, shape index: {}]   ;;  %s4523_s14 = inlined_call_operand.vmem [shape: f32[2,2,128], index: 14, kind: input, shape index: {}]   ;;  %s4524_s15 = inlined_call_operand.vmem [shape: f32[16,128], index: 15, kind: output, shape index: {}]  }
   0x1   :  { %4531 = sst [smem:[#allocation4_spill]] %s4512_s3 }
   0x2   :  { %4532 = sst [smem:[#allocation5_spill]] %s4513_s4 }
   0x3   :  { %4533 = sst [smem:[#allocation6_spill]] %s4514_s5 }
   0x4   :  { %4534 = sst [smem:[#allocation7_spill]] %s4515_s6 }
   0x5   :  { %4535 = sst [smem:[#allocation8_spill]] %s4516_s7 }
   0x6   :  { %4536 = sst [smem:[#allocation9_spill]] %s4518_s9 }
   0x7   :  { %4537 = sst [smem:[#allocation10_spill]] %s4524_s15 }
   0x8 LB: > { %4538 = sst [smem:[#allocation2_spill]] %s3780_s18  ;;  %s3087_s19 = sadd.s32 4294967295, %s3780_s18   ;;  %s3780_s18 = sphi %s3867_s18, %s25_s18  }
   0x9   : > { %p3090_p0 = scmp.ge.s32.totalorder %s3780_s18, 1  ;;  %p514_p1 = scmp.lt.s32.totalorder %s3780_s18, 3 }
   0xb   : > { %p515_p2 = pnand %p3090_p0, %p514_p1 }
   0xd   : > { %518 = sbr.rel (%p515_p2) target bundleno = 3518 (0xdbe), region = 80 }
  0x14   : > { %p594_p3 = scmp.lt.s32.totalorder %s3087_s19, 1  ;;  %s4539_s7 = sld [smem:[#allocation8_spill]] }
  0x15   : > { %s4540_s5 = sld [smem:[#allocation6_spill]]  ;;  %s4541_s6 = sld [smem:[#allocation7_spill]] }
  0x16   : > { %s3875_s20 = scalar_select %p594_p3, %s3087_s19, 1 }
  0x17   : > { %s4542_s9 = sld [smem:[#allocation9_spill]]  ;;  %p3101_p4 = scmp.ne.s32.totalorder %s3087_s19, 0 }
  0x18   : > { %s3571_s21 = smul.u32 192, %s3875_s20  ;;  %s3265_s22 = sshll.u32 %s3875_s20, 6  ;;  %v3586_v0 = vld [vmem:[%s4510_s1 + $0x40] sm:$0xff] (!%p3101_p4)   ;;  %v3590_v4 = vld [vmem:[%s4510_s1 + $0x48] sm:$0xff] (!%p3101_p4)   ;;  %v3594_v8 = vld [vmem:[%s4510_s1 + $0x50] sm:$0xff] (!%p3101_p4)   ;;  %v3782_v43 = vmov (!%p3101_p4), 0.0  }
  0x19   : > { %s3572_s23 = smul.u32 3, %s3875_s20  ;;  %s3900_s3 = sshll.u32 %s3875_s20, 1  ;;  %v3587_v1 = vld [vmem:[%s4510_s1] sm:$0xff] (!%p3101_p4)   ;;  %3268 = vmatprep.subr.bf16.mxu0 (!%p3101_p4), %v3586_v0  ;;  %v3591_v5 = vld [vmem:[%s4510_s1 + $0x8] sm:$0xff] (!%p3101_p4)   ;;  %v3595_v9 = vld [vmem:[%s4510_s1 + $0x10] sm:$0xff] (!%p3101_p4)   ;;  %vm3783_vm0 = vmmov (!%p3101_p4), 0  }
  0x1a   : > { %s3883_s26 = scalar_lea.vmem %s4539_s7, %s3265_s22  ;;  %s623_s18 = scalar_lea.vmem %s4520_s11, %s3900_s3  ;;  %v3588_v2 = vld [vmem:[%s4510_s1 + $0xc0] sm:$0xff] (!%p3101_p4)   ;;  %3269 = vmatpush3.bf16.msra.mxu0 (!%p3101_p4), %v3587_v1  ;;  %v3592_v6 = vld [vmem:[%s4510_s1 + $0xc8] sm:$0xff] (!%p3101_p4)   ;;  %v3596_v10 = vld [vmem:[%s4510_s1 + $0xd0] sm:$0xff] (!%p3101_p4)  }
  0x1b   : > { %s3888_s29 = scalar_lea.vmem %s4540_s5, %s3571_s21  ;;  %s3897_s4 = scalar_lea.vmem %s4541_s6, %s3572_s23  ;;  %v3589_v3 = vld [vmem:[%s4510_s1 + $0x80] sm:$0xff] (!%p3101_p4)   ;;  %3290 = vmatprep.subr.bf16.mxu1 (!%p3101_p4), %v3588_v2  ;;  %3270 = vmatprep.subr.bf16.mxu0 (!%p3101_p4), %v3590_v4  ;;  %v3593_v7 = vld [vmem:[%s4510_s1 + $0x88] sm:$0xff] (!%p3101_p4)   ;;  %v3597_v11 = vld [vmem:[%s4510_s1 + $0x90] sm:$0xff] (!%p3101_p4)  }
  0x1c   : > { %s3266_s21 = sshll.u32 %s3875_s20, 7  ;;  %s631_s6 = scalar_lea.vmem %s4522_s13, %s3875_s20  ;;  %3291 = vmatpush3.bf16.msra.mxu1 (!%p3101_p4), %v3589_v3  ;;  %v3598_v12 = vld [vmem:[%s4510_s1 + $0x58] sm:$0xff] (!%p3101_p4)   ;;  %v3602_v16 = vld [vmem:[%s4510_s1 + $0x60] sm:$0xff] (!%p3101_p4)   ;;  %v3606_v20 = vld [vmem:[%s4510_s1 + $0x68] sm:$0xff] (!%p3101_p4)  }
  0x1d   : > { %s3906_s25 = scalar_lea.vmem %s4542_s9, %s3900_s3  ;;  %s3912_s30 = scalar_lea.vmem %s4519_s10, %s3266_s21  ;;  %3292 = vmatprep.subr.bf16.mxu1 (!%p3101_p4), %v3592_v6  ;;  %v3599_v13 = vld [vmem:[%s4510_s1 + $0x18] sm:$0xff] (!%p3101_p4)   ;;  %v3603_v17 = vld [vmem:[%s4510_s1 + $0x20] sm:$0xff] (!%p3101_p4)   ;;  %v3607_v21 = vld [vmem:[%s4510_s1 + $0x28] sm:$0xff] (!%p3101_p4)  }
  0x1e   : > { %4543 = sst [smem:[#allocation3_spill]] %s3906_s25  ;;  %s3921_s5 = scalar_lea.vmem %s4521_s12, %s3266_s21  ;;  %3271 = vmatpush3.bf16.msra.mxu0 (!%p3101_p4), %v3591_v5  ;;  %v3600_v14 = vld [vmem:[%s4510_s1 + $0xd8] sm:$0xff] (!%p3101_p4)   ;;  %v3604_v18 = vld [vmem:[%s4510_s1 + $0xe0] sm:$0xff] (!%p3101_p4)   ;;  %v3608_v22 = vld [vmem:[%s4510_s1 + $0xe8] sm:$0xff] (!%p3101_p4)  }
  0x1f   : > { %s3931_s25 = scalar_lea.vmem %s4523_s14, %s3900_s3  ;;  %640 = sbr.rel (%p3101_p4) target bundleno = 626 (0x272), region = 84  ;;  %3272 = vmatprep.subr.bf16.mxu0 (!%p3101_p4), %v3594_v8  ;;  %v3601_v15 = vld [vmem:[%s4510_s1 + $0x98] sm:$0xff] (!%p3101_p4)   ;;  %v3605_v19 = vld [vmem:[%s4510_s1 + $0xa0] sm:$0xff] (!%p3101_p4)   ;;  %v3609_v23 = vld [vmem:[%s4510_s1 + $0xa8] sm:$0xff] (!%p3101_p4)  }
  0x20   : > { %3293 = vmatpush3.bf16.msra.mxu1 (!%p3101_p4), %v3593_v7  ;;  %v3610_v24 = vld [vmem:[%s4510_s1 + $0x70] sm:$0xff] (!%p3101_p4)   ;;  %v3614_v28 = vld [vmem:[%s4510_s1 + $0x78] sm:$0xff] (!%p3101_p4)   ;;  %v642_v31 = vld [vmem:[%s4509_s0 + $0x8] sm:$0xff] (!%p3101_p4)  ;;  %s4544_s27 = sld [smem:[#allocation4_spill]] (!%p3101_p4)  ;;  %s4545_s21 = sld [smem:[#allocation5_spill]] (!%p3101_p4) }
  0x21   : > { %3294 = vmatprep.subr.bf16.mxu1 (!%p3101_p4), %v3596_v10  ;;  %v3611_v25 = vld [vmem:[%s4510_s1 + $0x30] sm:$0xff] (!%p3101_p4)   ;;  %v3615_v29 = vld [vmem:[%s4510_s1 + $0x38] sm:$0xff] (!%p3101_p4)   ;;  %v649_v32 = vld [vmem:[%s4509_s0 + $0x40] sm:$0xff] (!%p3101_p4)  ;;  %s4546_s24 = sld [smem:[#allocation10_spill]] (!%p3101_p4) }
  0x22   : > { %3273 = vmatpush3.bf16.msra.mxu0 (!%p3101_p4), %v3595_v9  ;;  %v3612_v26 = vld [vmem:[%s4510_s1 + $0xf0] sm:$0xff] (!%p3101_p4)   ;;  %v3616_v30 = vld [vmem:[%s4510_s1 + $0xf8] sm:$0xff] (!%p3101_p4)   ;;  %v656_v33 = vpack.c.bf16 (!%p3101_p4), %v649_v32, %v642_v31  ;;  %v641_v35 = vld [vmem:[%s4509_s0] sm:$0xff] (!%p3101_p4) }
  0x23   : > { %3274 = vmatprep.subr.bf16.mxu0 (!%p3101_p4), %v3598_v12  ;;  %v3613_v27 = vld [vmem:[%s4510_s1 + $0xb0] sm:$0xff] (!%p3101_p4)   ;;  %v3617_v34 = vld [vmem:[%s4510_s1 + $0xb8] sm:$0xff] (!%p3101_p4)   ;;  %v3618_v38 = vld [vmem:[%s4510_s1 + $0x140] sm:$0xff] (!%p3101_p4)  }
  0x24   : > { %3295 = vmatpush3.bf16.msra.mxu1 (!%p3101_p4), %v3597_v11  ;;  %v648_v36 = vld [vmem:[%s4509_s0 + $0x38] sm:$0xff] (!%p3101_p4)  ;;  %1149 = vmatprep.mubr.bf16.mxu0 (!%p3101_p4), %v656_v33  ;;  %v651_v40 = vld [vmem:[%s4509_s0 + $0x50] sm:$0xff] (!%p3101_p4)  ;;  %v3619_v42 = vld [vmem:[%s4510_s1 + $0x100] sm:$0xff] (!%p3101_p4)  }
  0x25   : > { %3296 = vmatprep.subr.bf16.mxu1 (!%p3101_p4), %v3600_v14  ;;  %v655_v37 = vpack.c.bf16 (!%p3101_p4), %v648_v36, %v641_v35  ;;  %v644_v39 = vld [vmem:[%s4509_s0 + $0x18] sm:$0xff] (!%p3101_p4)  ;;  %v643_v44 = vld [vmem:[%s4509_s0 + $0x10] sm:$0xff] (!%p3101_p4)  ;;  %v650_v45 = vld [vmem:[%s4509_s0 + $0x48] sm:$0xff] (!%p3101_p4) }
  0x26   : > { %3275 = vmatpush3.bf16.msra.mxu0 %v3599_v13  ;;  %v658_v41 = vpack.c.bf16 %v651_v40, %v644_v39  ;;  %v657_v46 = vpack.c.bf16 %v650_v45, %v643_v44  ;;  %v3620_v47 = vld [vmem:[%s4510_s1 + $0x180] sm:$0xff]   ;;  %v3621_v48 = vld [vmem:[%s4510_s1 + $0x148] sm:$0xff]   ;;  %v3624_v51 = vld [vmem:[%s4510_s1 + $0x150] sm:$0xff]  }
  0x27   : > { %3276 = vmatprep.subr.bf16.mxu0 %v3602_v16  ;;  %v3622_v49 = vld [vmem:[%s4510_s1 + $0x108] sm:$0xff]   ;;  %v3625_v52 = vld [vmem:[%s4510_s1 + $0x110] sm:$0xff]   ;;  %v3627_v54 = vld [vmem:[%s4510_s1 + $0x158] sm:$0xff]  }
  0x28   : > { %3297 = vmatpush3.bf16.msra.mxu1 %v3601_v15  ;;  %1190 = vmatprep.mubr.bf16.mxu1 %v658_v41  ;;  %v3623_v50 = vld [vmem:[%s4510_s1 + $0x188] sm:$0xff]   ;;  %v3626_v53 = vld [vmem:[%s4510_s1 + $0x190] sm:$0xff]   ;;  %v3628_v55 = vld [vmem:[%s4510_s1 + $0x118] sm:$0xff]  }
  0x29   : > { %3298 = vmatprep.subr.bf16.mxu1 %v3604_v18  ;;  %v3630_v56 = vld [vmem:[%s4510_s1 + $0x160] sm:$0xff]   ;;  %v3629_v57 = vld [vmem:[%s4510_s1 + $0x198] sm:$0xff]   ;;  %v3633_v59 = vld [vmem:[%s4510_s1 + $0x168] sm:$0xff]  }
  0x2a   : > { %3277 = vmatpush3.bf16.msra.mxu0 %v3603_v17  ;;  %v3631_v58 = vld [vmem:[%s4510_s1 + $0x120] sm:$0xff]   ;;  %v3634_v61 = vld [vmem:[%s4510_s1 + $0x128] sm:$0xff]   ;;  %v3636_v62 = vld [vmem:[%s4510_s1 + $0x170] sm:$0xff]  }
  0x2b   : > { %3278 = vmatprep.subr.bf16.mxu0 %v3606_v20  ;;  %v3632_v60 = vld [vmem:[%s4510_s1 + $0x1a0] sm:$0xff]   ;;  %v3635_v63 = vld [vmem:[%s4510_s1 + $0x1a8] sm:$0xff]   ;;  %v3637_v0 = vld [vmem:[%s4510_s1 + $0x130] sm:$0xff]  }
  0x2c   : > { %3299 = vmatpush3.bf16.msra.mxu1 %v3605_v19  ;;  %v3639_v1 = vld [vmem:[%s4510_s1 + $0x178] sm:$0xff]   ;;  %v646_v2 = vld [vmem:[%s4509_s0 + $0x28] sm:$0xff]  ;;  %v653_v3 = vld [vmem:[%s4509_s0 + $0x60] sm:$0xff] }
  0x2d   : > { %3300 = vmatprep.subr.bf16.mxu1 %v3608_v22  ;;  %v660_v4 = vpack.c.bf16 %v653_v3, %v646_v2  ;;  %v3638_v5 = vld [vmem:[%s4510_s1 + $0x1b0] sm:$0xff]   ;;  %v3640_v6 = vld [vmem:[%s4510_s1 + $0x138] sm:$0xff]   ;;  %v645_v7 = vld [vmem:[%s4509_s0 + $0x20] sm:$0xff] }
  0x2e   : > { %3279 = vmatpush3.bf16.msra.mxu0 %v3607_v21  ;;  %v652_v8 = vld [vmem:[%s4509_s0 + $0x58] sm:$0xff]  ;;  %v647_v11 = vld [vmem:[%s4509_s0 + $0x30] sm:$0xff]  ;;  %v654_v12 = vld [vmem:[%s4509_s0 + $0x68] sm:$0xff] }
  0x2f   : > { %3280 = vmatprep.subr.bf16.mxu0 %v3610_v24  ;;  %v3641_v9 = vld [vmem:[%s4510_s1 + $0x1b8] sm:$0xff]   ;;  %v659_v10 = vpack.c.bf16 %v652_v8, %v645_v7  ;;  %v661_v13 = vpack.c.bf16 %v654_v12, %v647_v11  ;;  %v3102_v15 = vld [vmem:[%s4511_s2] ss:$0 sm:$0xff]  ;;  %v3160_v2 = vld [vmem:[%s4545_s21 + $0x1] ss:$0 sm:$0xff] }
  0x30   : > { %3301 = vmatpush3.bf16.msra.mxu1 %v3609_v23  ;;  %v1281_v41 = vld [vmem:[%s4544_s27] sm:$0xff] }
  0x31   : > { %3302 = vmatprep.subr.bf16.mxu1 %v3612_v26 }
  0x32   : > { %3281 = vmatpush3.bf16.msra.mxu0 %v3611_v25 }
  0x33   : > { %3282 = vmatprep.subr.bf16.mxu0 %v3614_v28 }
  0x34   : > { %3303 = vmatpush3.bf16.msra.mxu1 %v3613_v27 }
  0x35   : > { %3304 = vmatprep.subr.bf16.mxu1 %v3616_v30 }
  0x36   : > { %3283 = vmatpush3.bf16.msra.mxu0 %v3615_v29 }
  0x37   : > { %3312 = vmatprep.subr.bf16.mxu0 %v3618_v38 }
  0x38   : > { %3305 = vmatpush3.bf16.msra.mxu1 %v3617_v34 }
  0x39   : > { %3415 = vmatprep.subr.bf16.mxu1 %v3782_v43  ;;  %1150 = vmatmul.mubr.bf16.vlgmr.msra.gmra.mrb[0].mxu0 %v655_v37 }
  0x3a   : > { %3313 = vmatpush3.bf16.msra.mxu0 %v3619_v42  ;;  %1231 = vmatprep.mubr.bf16.mxu0 %v660_v4 }
  0x3b   : > { %1191 = vmatmul.mubr.bf16.vlgmr.msra.gmra.mrb[0].mxu1 %v657_v46  ;;  %3314 = vmatprep.subr.bf16.mxu0 %v3621_v48 }
  0x3c   : > { %3416 = vmatpush3.bf16.msra.mxu1 %v3620_v47  ;;  %3431 = vmatprep.mubr.msk.bf16.mxu1 %vm3783_vm0, %v3782_v43  ;;  %v1282_v47 = vld [vmem:[%s4544_s27 + $0x8] sm:$0xff] }
  0x3d   : > { %3417 = vmatprep.subr.bf16.mxu1 %v3782_v43 }
  0x3e   : > { %3315 = vmatpush3.bf16.msra.mxu0 %v3622_v49 }
  0x3f   : > { %3316 = vmatprep.subr.bf16.mxu0 %v3624_v51 }
  0x40   : > { %3418 = vmatpush3.bf16.msra.mxu1 %v3623_v50 }
  0x41   : > { %3419 = vmatprep.subr.bf16.mxu1 %v3782_v43 }
  0x42   : > { %3317 = vmatpush3.bf16.msra.mxu0 %v3625_v52 }
  0x43   : > { %3318 = vmatprep.subr.bf16.mxu0 %v3627_v54 }
  0x44   : > { %3420 = vmatpush3.bf16.msra.mxu1 %v3626_v53 }
  0x45   : > { %3421 = vmatprep.subr.bf16.mxu1 %v3782_v43 }
  0x46   : > { %3319 = vmatpush3.bf16.msra.mxu0 %v3628_v55 }
  0x47   : > { %3320 = vmatprep.subr.bf16.mxu0 %v3630_v56 }
  0x48   : > { %3422 = vmatpush3.bf16.msra.mxu1 %v3629_v57 }
  0x49   : > { %3423 = vmatprep.subr.bf16.mxu1 %v3782_v43 }
  0x4a   : > { %3321 = vmatpush3.bf16.msra.mxu0 %v3631_v58 }
  0x4b   : > { %3322 = vmatprep.subr.bf16.mxu0 %v3633_v59 }
  0x4c   : > { %3424 = vmatpush3.bf16.msra.mxu1 %v3632_v60 }
  0x4d   : > { %3425 = vmatprep.subr.bf16.mxu1 %v3782_v43 }
  0x4e   : > { %3323 = vmatpush3.bf16.msra.mxu0 %v3634_v61 }
  0x4f   : > { %3324 = vmatprep.subr.bf16.mxu0 %v3636_v62 }
  0x50   : > { %3426 = vmatpush3.bf16.msra.mxu1 %v3635_v63 }
  0x51   : > { %3427 = vmatprep.subr.bf16.mxu1 %v3782_v43 }
  0x52   : > { %3325 = vmatpush3.bf16.msra.mxu0 %v3637_v0  ;;  %v3159_v0 = vld [vmem:[%s4545_s21] ss:$0 sm:$0xff] }
  0x53   : > { %3326 = vmatprep.subr.bf16.mxu0 %v3639_v1 }
  0x54   : > { %3428 = vmatpush3.bf16.msra.mxu1 %v3638_v5 }
  0x55   : > { %3429 = vmatprep.subr.bf16.mxu1 %v3782_v43 }
  0x56   : > { %3327 = vmatpush3.bf16.msra.mxu0 %v3640_v6 }
  0x58   : > { %3430 = vmatpush3.bf16.msra.mxu1 %v3641_v9 }
  0x59   : > { %1232 = vmatmul.mubr.bf16.vlgmr.msra.gmra.mrb[4].mxu0 %v659_v10 }
  0x5b   : > { %3432 = vmatmul.mubr.bf16.vlgmr.msra.gmra.mrb[4].mxu1 %v661_v13 }
 0x10c   : > { %v3284_v14 = vpop.f32.mrb[0].mxu0 }
 0x10d   : > { %v3285_v16 = vpop.f32.mrb[1].mxu0 }
 0x10e   : > { %v3286_v17 = vadd.f32 %v3285_v16, %v3284_v14  ;;  %v3287_v18 = vpop.f32.mrb[2].mxu0  ;;  %v3306_v19 = vpop.f32.mrb[0].mxu1 }
 0x10f   : > { %v3288_v20 = vpop.f32.mrb[3].mxu0  ;;  %v3307_v23 = vpop.f32.mrb[1].mxu1 }
 0x110   : > { %v1152_v21 = vadd.f32 %v3286_v17, %v3102_v15  ;;  %v3289_v22 = vadd.f32 %v3288_v20, %v3287_v18  ;;  %v3308_v24 = vadd.f32 %v3307_v23, %v3306_v19  ;;  %v3309_v25 = vpop.f32.mrb[2].mxu1 }
 0x111   : > { %v3310_v27 = vpop.f32.mrb[3].mxu1 }
 0x112   : > { %v1155_v26 = vadd.f32 %v3289_v22, %v3102_v15  ;;  %v1193_v28 = vadd.f32 %v3308_v24, %v1152_v21  ;;  %v3311_v29 = vadd.f32 %v3310_v27, %v3309_v25 }
 0x114   : > { %v1196_v30 = vadd.f32 %v3311_v29, %v1155_v26 }
 0x12c   : > { %v3328_v31 = vpop.f32.mrb[4].mxu0 }
 0x12d   : > { %v3329_v32 = vpop.f32.mrb[5].mxu0 }
 0x12e   : > { %v3330_v33 = vadd.f32 %v3329_v32, %v3328_v31  ;;  %v3331_v34 = vpop.f32.mrb[6].mxu0  ;;  %v1274_v35 = vpop.f32.mrb[4].mxu1 }
 0x12f   : > { %v3332_v36 = vpop.f32.mrb[7].mxu0  ;;  %v3433_v39 = vpop.f32.mrb[5].mxu1 }
 0x130   : > { %v1234_v37 = vadd.f32 %v3330_v33, %v1193_v28  ;;  %v3333_v38 = vadd.f32 %v3332_v36, %v3331_v34  ;;  %v1277_v40 = vpop.f32.mrb[6].mxu1 }
 0x131   : > { %v3434_v44 = vpop.f32.mrb[7].mxu1 }
 0x132   : > { %v1275_v42 = vadd.f32 %v1274_v35, %v1234_v37  ;;  %v1237_v43 = vadd.f32 %v3333_v38, %v1196_v30 }
 0x134   : > { %v1278_v45 = vadd.f32 %v1277_v40, %v1237_v43  ;;  %v1283_v46 = vadd.f32 %v1281_v41, %v1275_v42 }
 0x136   : > { %1287 = vadd.xlane.f32.xlu0 %v1283_v46  ;;  %v1284_v48 = vadd.f32 %v1282_v47, %v1278_v45 }
 0x13a   : > { %1289 = vadd.xlane.f32.xlu0 %v1284_v48 }
 0x1c3   : > { %v1288_v49 = vpop.xlane.xlu0 %1287 }
 0x1c4   : > { %v1292_v50 = vmul.f32 0.0078125, %v1288_v49 }
 0x1c6   : > { %v1294_v51 = vsub.f32 %v1283_v46, %v1292_v50 }
 0x1c7   : > { %v1290_v52 = vpop.xlane.xlu0 %1289 }
 0x1c8   : > { %v1293_v53 = vmul.f32 0.0078125, %v1290_v52  ;;  %v1296_v54 = vmul.f32 %v1294_v51, %v1294_v51 }
 0x1ca   : > { %v1295_v55 = vsub.f32 %v1284_v48, %v1293_v53  ;;  %1298 = vadd.xlane.f32.xlu1 %v1296_v54 }
 0x1cc   : > { %v1297_v56 = vmul.f32 %v1295_v55, %v1295_v55 }
 0x1ce   : > { %1300 = vadd.xlane.f32.xlu1 %v1297_v56 }
 0x257   : > { %v1299_v57 = vpop.xlane.xlu1 %1298 }
 0x258   : > { %v1302_v58 = vmul.f32 0.0078125, %v1299_v57 }
 0x25a   : > { %v1304_v59 = vadd.f32 1e-05, %v1302_v58 }
 0x25b   : > { %v1301_v60 = vpop.xlane.xlu1 %1300 }
 0x25c   : > { %3642 = vrsqrt.f32 %v1304_v59  ;;  %v1303_v61 = vmul.f32 0.0078125, %v1301_v60 }
 0x25e   : > { %v1305_v62 = vadd.f32 1e-05, %v1303_v61 }
 0x260   : > { %3644 = vrsqrt.f32 %v1305_v62 }
 0x266   : > { %v3643_v63 = vpop.eup %3642 }
 0x267   : > { %v1308_v1 = vmul.f32 %v3643_v63, %v1294_v51 }
 0x269   : > { %v1314_v3 = vmul.f32 %v3159_v0, %v1308_v1 }
 0x26a   : > { %v3645_v4 = vpop.eup %3644 }
 0x26b   : > { %v1320_v5 = vadd.f32 %v3160_v2, %v1314_v3  ;;  %v1309_v6 = vmul.f32 %v3645_v4, %v1295_v55 }
 0x26d   : > { %1322 = vst [vmem:[%s4546_s24] sm:$0xff] %v1320_v5  ;;  %v1315_v7 = vmul.f32 %v3159_v0, %v1309_v6 }
 0x26f   : > { %v1321_v8 = vadd.f32 %v3160_v2, %v1315_v7 }
 0x271   : > { %1323 = vst [vmem:[%s4546_s24 + $0x8] sm:$0xff] %v1321_v8 }
 0x272 PF: > { %v3646_v9 = vld [vmem:[%s3888_s29 + $0x4] ss:$12 sps:$4 sm:$0xff]   ;;  %v3648_v10 = vld [vmem:[%s3888_s29] ss:$12 sps:$4 sm:$0xff]   ;;  %v3784_v11 = vmov 0   ;;  %v3785_v12 = vmov 0.0   ;;  %v1361_v38 = vlaneseq }
 0x273   : > { %1536 = vmatprep.mubr.bf16.mxu0 %v3784_v11  ;;  %3435 = vmatprep.subr.bf16.mxu1 %v3785_v12  ;;  %v3649_v13 = vld [vmem:[%s3888_s29 + $0x1c] ss:$12 sps:$4 sm:$0xff]   ;;  %v3651_v14 = vld [vmem:[%s3888_s29 + $0x18] ss:$12 sps:$4 sm:$0xff]   ;;  %v3652_v15 = vld [vmem:[%s3888_s29 + $0x34] ss:$12 sps:$4 sm:$0xff]  }
 0x274   : > { %1504 = vmatprep.subr.bf16.mxu0 %v3646_v9  ;;  %v3654_v16 = vld [vmem:[%s3888_s29 + $0x30] ss:$12 sps:$4 sm:$0xff]   ;;  %v3655_v17 = vld [vmem:[%s3888_s29 + $0x4c] ss:$12 sps:$4 sm:$0xff]   ;;  %v3657_v18 = vld [vmem:[%s3888_s29 + $0x48] ss:$12 sps:$4 sm:$0xff]  }
 0x275   : > { %1505 = vmatpush1.bf16.msra.mxu0 %v3648_v10  ;;  %v3658_v19 = vld [vmem:[%s3888_s29 + $0x64] ss:$12 sps:$4 sm:$0xff]   ;;  %v3670_v20 = vld [vmem:[%s3888_s29 + $0x8] ss:$12 sps:$4 sm:$0xff]   ;;  %v3671_v21 = vld [vmem:[%s3888_s29 + $0x20] ss:$12 sps:$4 sm:$0xff]  }
 0x276   : > { %1506 = vmatprep.subr.bf16.mxu0 %v3649_v13  ;;  %3436 = vmatpush3.bf16.msra.mxu1 %v3670_v20  ;;  %v3660_v22 = vld [vmem:[%s3888_s29 + $0x60] ss:$12 sps:$4 sm:$0xff]   ;;  %v3661_v23 = vld [vmem:[%s3888_s29 + $0x7c] ss:$12 sps:$4 sm:$0xff]   ;;  %v3672_v24 = vld [vmem:[%s3888_s29 + $0x38] ss:$12 sps:$4 sm:$0xff]  }
 0x277   : > { %3437 = vmatprep.subr.bf16.mxu1 %v3785_v12  ;;  %v3663_v25 = vld [vmem:[%s3888_s29 + $0x78] ss:$12 sps:$4 sm:$0xff]   ;;  %v3664_v26 = vld [vmem:[%s3888_s29 + $0x94] ss:$12 sps:$4 sm:$0xff]   ;;  %v3673_v27 = vld [vmem:[%s3888_s29 + $0x50] ss:$12 sps:$4 sm:$0xff]  }
 0x278   : > { %v3666_v28 = vld [vmem:[%s3888_s29 + $0x90] ss:$12 sps:$4 sm:$0xff]   ;;  %v3667_v29 = vld [vmem:[%s3888_s29 + $0xac] ss:$12 sps:$4 sm:$0xff]   ;;  %v3674_v30 = vld [vmem:[%s3888_s29 + $0x68] ss:$12 sps:$4 sm:$0xff]  }
 0x279   : > { %1507 = vmatpush1.bf16.msra.mxu0 %v3651_v14  ;;  %v3669_v31 = vld [vmem:[%s3888_s29 + $0xa8] ss:$12 sps:$4 sm:$0xff]   ;;  %s4547_s17 = sld [smem:[#allocation10_spill]]  ;;  %v3675_v34 = vld [vmem:[%s3888_s29 + $0x80] ss:$12 sps:$4 sm:$0xff]   ;;  %vm3786_vm1 = vmmov 0  }
 0x27a   : > { %1508 = vmatprep.subr.bf16.mxu0 %v3652_v15  ;;  %3438 = vmatpush3.bf16.msra.mxu1 %v3671_v21  ;;  %v3676_v36 = vld [vmem:[%s3888_s29 + $0x98] ss:$12 sps:$4 sm:$0xff]   ;;  %v3677_v37 = vld [vmem:[%s3888_s29 + $0xb0] ss:$12 sps:$4 sm:$0xff]   ;;  %v4226_v39 = vshrl.u32 %v1361_v38, 7  ;;  %v4233_v45 = vand.u32 127, %v1361_v38  ;;  %s4556_s29 = scalar_lea.vmem %s4517_s8, %s3875_s20 }
 0x27b   : > { %3439 = vmatprep.subr.bf16.mxu1 %v3785_v12  ;;  %3451 = vmatprep.mubr.msk.bf16.mxu1 %vm3786_vm1, %v3785_v12  ;;  %v1359_v41 = vld [vmem:[%s3897_s4] sm:$0x7]  ;;  %vm1663_vm14 = vcmask 1043456   ;;  %vm1647_vm15 = vcmask 64512   ;;  %s4557_s9 = sld [smem:[#allocation3_spill]] }
 0x27c   : > { %v1367_v40 = vsub.s32 1, %v4226_v39  ;;  %v1363_v43 = vsub.s32 0, %v4226_v39  ;;  %vm1596_vm2 = vcmp.ge.s32.totalorder %v4233_v45, 64  ;;  %vm1597_vm3 = vcmp.lt.s32.totalorder %v4233_v45, 96  ;;  %v3217_v53 = vld [vmem:[%s4556_s29] ss:$0 sm:$0xff] }
 0x27d   : > { %1509 = vmatpush1.bf16.msra.mxu0 %v3654_v16  ;;  %vm1591_vm4 = vcmp.lt.s32.totalorder %v4233_v45, 32  ;;  %vm4244_vm5 = vmand %vm1596_vm2, %vm1597_vm3  ;;  %vm1599_vm8 = vcmp.ge.s32.totalorder %v4233_v45, 96  ;;  %vm1593_vm10 = vcmp.ge.s32.totalorder %v4233_v45, 32  ;;  %vm1594_vm11 = vcmp.lt.s32.totalorder %v4233_v45, 64 }
 0x27e   : > { %1510 = vmatprep.subr.bf16.mxu0 %v3655_v17  ;;  %3440 = vmatpush3.bf16.msra.mxu1 %v3672_v24  ;;  %v1368_v42 = vrot.slane %v1359_v41, %v1367_v40  ;;  %v1364_v49 = vrot.slane %v1359_v41, %v1363_v43  ;;  %vm4253_vm6 = vmpackc.low %vm1591_vm4, %vm1591_vm4  ;;  %v1371_v62 = vsub.s32 2, %v4226_v39 }
 0x27f   : > { %3441 = vmatprep.subr.bf16.mxu1 %v3785_v12  ;;  %v4202_v32 = vld [vmem:[%s4547_s17] sm:$0xff]  ;;  %v4207_v33 = vld [vmem:[%s4547_s17 + $0x8] sm:$0xff]  ;;  %vm3193_vm7 = vmpackc.low %vm4244_vm5, %vm4244_vm5 }
 0x280   : > { %v1326_v35 = vpack.c.bf16 %v4207_v33, %v4202_v32  ;;  %vm4281_vm9 = vmpackc.low %vm1599_vm8, %vm1599_vm8  ;;  %v1372_v63 = vrot.slane %v1359_v41, %v1371_v62 }
 0x281   : > { %1511 = vmatpush1.bf16.msra.mxu0 %v3657_v18  ;;  %vm4297_vm12 = vmand %vm1593_vm10, %vm1594_vm11 }
 0x282   : > { %1512 = vmatprep.subr.bf16.mxu0 %v3658_v19  ;;  %3442 = vmatpush3.bf16.msra.mxu1 %v3673_v27  ;;  %vm3189_vm13 = vmpackc.low %vm4297_vm12, %vm4297_vm12 }
 0x283   : > { %3443 = vmatprep.subr.bf16.mxu1 %v3785_v12 }
 0x285   : > { %1513 = vmatpush1.bf16.msra.mxu0 %v3660_v22 }
 0x286   : > { %1514 = vmatprep.subr.bf16.mxu0 %v3661_v23  ;;  %3444 = vmatpush3.bf16.msra.mxu1 %v3674_v30 }
 0x287   : > { %3445 = vmatprep.subr.bf16.mxu1 %v3785_v12 }
 0x289   : > { %1515 = vmatpush1.bf16.msra.mxu0 %v3663_v25 }
 0x28a   : > { %1516 = vmatprep.subr.bf16.mxu0 %v3664_v26  ;;  %3446 = vmatpush3.bf16.msra.mxu1 %v3675_v34 }
 0x28b   : > { %3447 = vmatprep.subr.bf16.mxu1 %v3785_v12 }
 0x28d   : > { %1517 = vmatpush1.bf16.msra.mxu0 %v3666_v28 }
 0x28e   : > { %1518 = vmatprep.subr.bf16.mxu0 %v3667_v29  ;;  %3448 = vmatpush3.bf16.msra.mxu1 %v3676_v36 }
 0x28f   : > { %3449 = vmatprep.subr.bf16.mxu1 %v3785_v12 }
 0x291   : > { %1519 = vmatpush1.bf16.msra.mxu0 %v3669_v31 }
 0x292   : > { %3479 = vmatprep.subr.bf16.mxu0 %v3785_v12  ;;  %3450 = vmatpush3.bf16.msra.mxu1 %v3677_v37 }
 0x293   : > { %3455 = vmatprep.subr.bf16.mxu1 %v3785_v12 }
 0x294   : > { %1537 = vmatmul.mubr.bf16.vlgmr.msra.gmra.mrb[0].mxu0 %v1326_v35 }
 0x295   : > { %3481 = vmatprep.mubr.msk.bf16.mxu0 %vm3786_vm1, %v3785_v12  ;;  %3452 = vmatmul.mubr.bf16.vlgmr.msra.gmra.mrb[0].mxu1 %v1326_v35 }
 0x296   : > { %3457 = vmatprep.mubr.msk.bf16.mxu1 %vm3786_vm1, %v3785_v12 }
 0x367   : > { %v1538_v44 = vpop.f32.mrb[0].mxu0 }
 0x368   : > { %v1540_v46 = vpop.f32.mrb[1].mxu0  ;;  %v1539_v52 = vadd.f32 %v1538_v44, %v1364_v49  ;;  %v1581_v0 = vpop.f32.mrb[0].mxu1 }
 0x369   : > { %v1541_v47 = vadd.f32 %v1540_v46, %v1368_v42  ;;  %v1542_v48 = vpop.f32.mrb[2].mxu0  ;;  %v1582_v1 = vadd.f32 %v1581_v0, %v1372_v63  ;;  %v3453_v2 = vpop.f32.mrb[1].mxu1 }
 0x36a   : > { %v1544_v50 = vpop.f32.mrb[3].mxu0  ;;  %v4260_v55 = vpack.c.bf16 %v1539_v52, %v1539_v52  ;;  %v1543_v59 = vadd.f32 %v1542_v48, %v1364_v49  ;;  %v1584_v3 = vpop.f32.mrb[2].mxu1 }
 0x36b   : > { %v4237_v51 = vpack.c.bf16 %v1541_v47, %v1541_v47  ;;  %v1545_v56 = vadd.f32 %v1544_v50, %v1368_v42  ;;  %v1603_v4 = vpack.c.bf16 %v1582_v1, %v1582_v1  ;;  %v1585_v5 = vadd.f32 %v1584_v3, %v1372_v63  ;;  %v3454_v6 = vpop.f32.mrb[3].mxu1 }
 0x36c   : > { %v3202_v60 = vpack.c.bf16 %v1543_v59, %v1543_v59 }
 0x36d   : > { %3456 = vmatpush3.bf16.xpose.msra.mxu1 %v4237_v51  ;;  %3480 = vmatpush3.bf16.xpose.msra.mxu0 %v4237_v51  ;;  %v2009_v58 = vpack.c.bf16 %v1545_v56, %v1545_v56  ;;  %v4326_v7 = vsel %vm1663_vm14, %v1603_v4, 0  ;;  %v2010_v8 = vpack.c.bf16 %v1585_v5, %v1585_v5 }
 0x36e   : > { %3491 = vmatprep.subr.bf16.mxu0 %v3785_v12  ;;  %3461 = vmatprep.subr.bf16.mxu1 %v3785_v12 }
 0x36f   : > { %v4329_v9 = vsel %vm1663_vm14, %v2010_v8, 0 }
 0x374   : > { %3458 = vmatmul.mubr.msk.bf16.vlgmr.msra.gmra.mrb[4].mxu1 %vm4253_vm6, %v4260_v55  ;;  %3482 = vmatmul.mubr.msk.bf16.vlgmr.msra.gmra.mrb[4].mxu0 %vm3193_vm7, %v4260_v55 }
 0x375   : > { %3492 = vmatpush3.bf16.xpose.msra.mxu0 %v4237_v51  ;;  %3493 = vmatprep.mubr.msk.bf16.mxu0 %vm3786_vm1, %v3785_v12 }
 0x376   : > { %3503 = vmatprep.subr.bf16.mxu0 %v3785_v12  ;;  %3463 = vmatprep.mubr.msk.bf16.mxu1 %vm3786_vm1, %v3785_v12 }
 0x377   : > { %3462 = vmatpush3.bf16.msra.mxu1 %v4326_v7 }
 0x378   : > { %3467 = vmatprep.subr.bf16.mxu1 %v3785_v12 }
 0x37c   : > { %3494 = vmatmul.mubr.msk.bf16.vlgmr.msra.gmra.mrb[8].mxu0 %vm4281_vm9, %v4260_v55 }
 0x37d   : > { %3504 = vmatpush3.bf16.xpose.msra.mxu0 %v2009_v58  ;;  %3505 = vmatprep.mubr.msk.bf16.mxu0 %vm3786_vm1, %v3785_v12 }
 0x37e   : > { %3515 = vmatprep.subr.bf16.mxu0 %v3785_v12 }
 0x384   : > { %3506 = vmatmul.mubr.msk.bf16.vlgmr.msra.gmra.mrb[12].mxu0 %vm4253_vm6, %v3202_v60 }
 0x385   : > { %3516 = vmatpush3.bf16.xpose.msra.mxu0 %v2009_v58  ;;  %3517 = vmatprep.mubr.msk.bf16.mxu0 %vm3786_vm1, %v3785_v12 }
 0x386   : > { %3527 = vmatprep.subr.bf16.mxu0 %v3785_v12 }
 0x38c   : > { %3518 = vmatmul.mubr.msk.bf16.vlgmr.msra.gmra.mrb[16].mxu0 %vm3189_vm13, %v3202_v60 }
 0x38d   : > { %3528 = vmatpush3.bf16.xpose.msra.mxu0 %v2009_v58  ;;  %3529 = vmatprep.mubr.msk.bf16.mxu0 %vm3786_vm1, %v3785_v12 }
 0x38e   : > { %3539 = vmatprep.subr.bf16.mxu0 %v3785_v12 }
 0x394   : > { %3530 = vmatmul.mubr.msk.bf16.vlgmr.msra.gmra.mrb[20].mxu0 %vm3193_vm7, %v3202_v60 }
 0x395   : > { %3540 = vmatpush3.bf16.xpose.msra.mxu0 %v2009_v58  ;;  %3541 = vmatprep.mubr.msk.bf16.mxu0 %vm3786_vm1, %v3785_v12 }
 0x396   : > { %3551 = vmatprep.subr.bf16.mxu0 %v3785_v12 }
 0x39c   : > { %3542 = vmatmul.mubr.msk.bf16.vlgmr.msra.gmra.mrb[24].mxu0 %vm4281_vm9, %v3202_v60 }
 0x39d   : > { %3567 = vmatprep.mubr.msk.bf16.mxu0 %vm3786_vm1, %v3785_v12 }
 0x447   : > { %v1640_v10 = vpop.f32.mrb[4].mxu1  ;;  %v4332_v13 = vpop.f32.mrb[4].mxu0 }
 0x448   : > { %v1646_v14 = vmul.f32 0.17677669, %v1640_v10  ;;  %v3459_v15 = vpop.f32.mrb[5].mxu1  ;;  %v3483_v16 = vpop.f32.mrb[5].mxu0 }
 0x449   : > { %v1643_v17 = vpop.f32.mrb[6].mxu1  ;;  %v1848_v18 = vpop.f32.mrb[6].mxu0  ;;  %v1851_v15 = vmul.f32 0.17677669, %v4332_v13 }
 0x44a   : > { %v3460_v19 = vpop.f32.mrb[7].mxu1  ;;  %v3484_v20 = vpop.f32.mrb[7].mxu0  ;;  %v1648_v21 = vsel %vm1647_vm15, %v1646_v14, -inf }
 0x44b   : > { %1649 = vmax.xlane.f32.xlu0 %v1648_v21  ;;  %v1852_v18 = vsel %vm1647_vm15, %v1851_v15, -inf }
 0x44f   : > { %v1945_v22 = vpop.f32.mrb[8].mxu0 }
 0x450   : > { %v3495_v23 = vpop.f32.mrb[9].mxu0  ;;  %v1951_v54 = vmul.f32 0.17677669, %v1945_v22 }
 0x451   : > { %v1948_v24 = vpop.f32.mrb[10].mxu0 }
 0x452   : > { %v3496_v25 = vpop.f32.mrb[11].mxu0  ;;  %v1952_v58 = vsel %vm1647_vm15, %v1951_v54, -inf }
 0x457   : > { %v2047_v26 = vpop.f32.mrb[12].mxu0 }
 0x458   : > { %v3507_v27 = vpop.f32.mrb[13].mxu0  ;;  %v2053_v17 = vmul.f32 0.17677669, %v2047_v26 }
 0x459   : > { %v2050_v28 = vpop.f32.mrb[14].mxu0 }
 0x45a   : > { %v3508_v29 = vpop.f32.mrb[15].mxu0  ;;  %v2054_v20 = vsel %vm1647_vm15, %v2053_v17, -inf }
 0x45f   : > { %v2150_v30 = vpop.f32.mrb[16].mxu0 }
 0x460   : > { %v3519_v31 = vpop.f32.mrb[17].mxu0  ;;  %v2156_v57 = vmul.f32 0.17677669, %v2150_v30 }
 0x461   : > { %v2153_v34 = vpop.f32.mrb[18].mxu0 }
 0x462   : > { %v3520_v35 = vpop.f32.mrb[19].mxu0  ;;  %v2157_v60 = vsel %vm1647_vm15, %v2156_v57, -inf }
 0x467   : > { %v2250_v36 = vpop.f32.mrb[20].mxu0 }
 0x468   : > { %v3531_v37 = vpop.f32.mrb[21].mxu0  ;;  %v2256_v19 = vmul.f32 0.17677669, %v2250_v36 }
 0x469   : > { %v2253_v38 = vpop.f32.mrb[22].mxu0 }
 0x46a   : > { %v3532_v41 = vpop.f32.mrb[23].mxu0  ;;  %v2257_v21 = vsel %vm1647_vm15, %v2256_v19, -inf }
 0x46f   : > { %v2350_v42 = vpop.f32.mrb[24].mxu0 }
 0x470   : > { %v3543_v44 = vpop.f32.mrb[25].mxu0  ;;  %v2356_v59 = vmul.f32 0.17677669, %v2350_v42 }
 0x471   : > { %v2353_v46 = vpop.f32.mrb[26].mxu0 }
 0x472   : > { %v3544_v47 = vpop.f32.mrb[27].mxu0  ;;  %v2357_v62 = vsel %vm1647_vm15, %v2356_v59, -inf }
 0x4d8   : > { %v1650_v48 = vpop.xlane.xlu0 %1649 }
 0x4d9   : > { %v1651_v49 = vsub.f32 %v1646_v14, %v1650_v48 }
 0x4db   : > { %v1652_v50 = vmul.f32 1.442695, %v1651_v49 }
 0x4dd   : > { %3726 = vpow2.f32 %v1652_v50 }
 0x4e7   : > { %v3727_v52 = vpop.eup %3726 }
 0x4e8   : > { %v1654_v56 = vsel %vm1647_vm15, %v3727_v52, 0.0 }
 0x4e9   : > { %1655 = vadd.xlane.f32.xlu0 %v1654_v56 }
 0x4ed   : > { %1953 = vmax.xlane.f32.xlu0 %v1952_v58 }
 0x4f1   : > { %2158 = vmax.xlane.f32.xlu0 %v2157_v60 }
 0x4f5   : > { %2358 = vmax.xlane.f32.xlu0 %v2357_v62 }
 0x576   : > { %v1656_v63 = vpop.xlane.xlu0 %1655 }
 0x577   : > { %3728 = vrcp.f32 %v1656_v63 }
 0x57a   : > { %v1954_v22 = vpop.xlane.xlu0 %1953 }
 0x57b   : > { %v1955_v24 = vsub.f32 %v1951_v54, %v1954_v22 }
 0x57d   : > { %v1956_v27 = vmul.f32 1.442695, %v1955_v24 }
 0x57e   : > { %v2159_v23 = vpop.xlane.xlu0 %2158 }
 0x57f   : > { %v2160_v28 = vsub.f32 %v2156_v57, %v2159_v23 }
 0x581   : > { %v3729_v0 = vpop.eup %3728  ;;  %v2161_v34 = vmul.f32 1.442695, %v2160_v28 }
 0x582   : > { %v1658_v1 = vmul.f32 %v3729_v0, %v3727_v52  ;;  %v2359_v30 = vpop.xlane.xlu0 %2358 }
 0x583   : > { %v2360_v35 = vsub.f32 %v2356_v59, %v2359_v30 }
 0x584   : > { %v1659_v2 = vpack.c.bf16 %v1658_v1, %v1658_v1 }
 0x585   : > { %v2361_v41 = vmul.f32 1.442695, %v2360_v35  ;;  %v3679_v35 = vld [vmem:[%s3883_s26 + $0x8] sm:$0xff]  }
 0x586   : > { %3464 = vmatmul.mubr.msk.bf16.vlgmr.msra.gmra.mrb[8].mxu1 %vm1647_vm15, %v1659_v2 }
 0x587   : > { %3468 = vmatpush3.bf16.xpose.msra.mxu1 %v4237_v51  ;;  %3469 = vmatprep.mubr.msk.bf16.mxu1 %vm3786_vm1, %v3785_v12 }
 0x588   : > { %3473 = vmatprep.subr.bf16.mxu1 %v3785_v12 }
 0x58e   : > { %3470 = vmatmul.mubr.msk.bf16.vlgmr.msra.gmra.mrb[12].mxu1 %vm3189_vm13, %v4260_v55 }
 0x58f   : > { %3474 = vmatpush3.bf16.msra.mxu1 %v4326_v7  ;;  %3475 = vmatprep.mubr.msk.bf16.mxu1 %vm3786_vm1, %v3785_v12 }
 0x590   : > { %3485 = vmatprep.subr.bf16.mxu1 %v3785_v12 }
 0x659   : > { %v4354_v51 = vpop.f32.mrb[8].mxu1 }
 0x65a   : > { %v3465_v3 = vpop.f32.mrb[9].mxu1 }
 0x65b   : > { %v1704_v4 = vpop.f32.mrb[10].mxu1 }
 0x65c   : > { %v3466_v5 = vpop.f32.mrb[11].mxu1 }
 0x661   : > { %v1745_v6 = vpop.f32.mrb[12].mxu1 }
 0x662   : > { %v1751_v8 = vmul.f32 0.17677669, %v1745_v6  ;;  %v3471_v10 = vpop.f32.mrb[13].mxu1 }
 0x663   : > { %v1748_v14 = vpop.f32.mrb[14].mxu1 }
 0x664   : > { %v3472_v16 = vpop.f32.mrb[15].mxu1  ;;  %v1752_v55 = vsel %vm1647_vm15, %v1751_v8, -inf }
 0x665   : > { %1753 = vmax.xlane.f32.xlu1 %v1752_v55 }
 0x669   : > { %1853 = vmax.xlane.f32.xlu1 %v1852_v18 }
 0x66d   : > { %2055 = vmax.xlane.f32.xlu1 %v2054_v20 }
 0x671   : > { %2258 = vmax.xlane.f32.xlu1 %v2257_v21 }
 0x6f2   : > { %v1754_v25 = vpop.xlane.xlu1 %1753 }
 0x6f3   : > { %v1755_v13 = vsub.f32 %v1751_v8, %v1754_v25 }
 0x6f5   : > { %v1756_v29 = vmul.f32 1.442695, %v1755_v13 }
 0x6f6   : > { %v1854_v26 = vpop.xlane.xlu1 %1853 }
 0x6f7   : > { %3730 = vpow2.f32 %v1756_v29  ;;  %v1855_v31 = vsub.f32 %v1851_v15, %v1854_v26 }
 0x6f8   : > { %3732 = vpow2.f32 %v1956_v27 }
 0x6f9   : > { %v1856_v36 = vmul.f32 1.442695, %v1855_v31 }
 0x6fa   : > { %v2056_v37 = vpop.xlane.xlu1 %2055 }
 0x6fb   : > { %3734 = vpow2.f32 %v1856_v36  ;;  %v2057_v38 = vsub.f32 %v2053_v17, %v2056_v37  ;;  %v3681_v36 = vld [vmem:[%s3883_s26 + $0x18] sm:$0xff]   ;;  %v3682_v37 = vld [vmem:[%s3883_s26 + $0x20] sm:$0xff]  }
 0x6fc   : > { %3736 = vpow2.f32 %v2161_v34  ;;  %v3678_v34 = vld [vmem:[%s3883_s26] sm:$0xff]  }
 0x6fd   : > { %v2058_v42 = vmul.f32 1.442695, %v2057_v38  ;;  %3552 = vmatpush3.bf16.msra.mxu0 %v3678_v34  ;;  %v3684_v38 = vld [vmem:[%s3883_s26 + $0x30] sm:$0xff]  }
 0x6fe   : > { %v2259_v44 = vpop.xlane.xlu1 %2258  ;;  %3553 = vmatprep.subr.bf16.mxu0 %v3785_v12 }
 0x6ff   : > { %3738 = vpow2.f32 %v2058_v42  ;;  %v2260_v46 = vsub.f32 %v2256_v19, %v2259_v44  ;;  %v1707_v44 = vsel %vm1591_vm4, %v4354_v51, 0.0 }
 0x700   : > { %3740 = vpow2.f32 %v2361_v41  ;;  %v3685_v41 = vld [vmem:[%s3883_s26 + $0x38] sm:$0xff]  }
 0x701   : > { %v3731_v47 = vpop.eup %3730  ;;  %v2261_v48 = vmul.f32 1.442695, %v2260_v46  ;;  %3554 = vmatpush3.bf16.msra.mxu0 %v3679_v35  ;;  %v3686_v35 = vld [vmem:[%s3912_s30] ss:$8 sps:$4 sm:$0xff]  }
 0x702   : > { %v1758_v49 = vsel %vm1647_vm15, %v3731_v47, 0.0  ;;  %v3733_v50 = vpop.eup %3732  ;;  %3555 = vmatprep.subr.bf16.mxu0 %v3785_v12 }
 0x703   : > { %3742 = vpow2.f32 %v2261_v48  ;;  %1759 = vadd.xlane.f32.xlu1 %v1758_v49  ;;  %v1958_v54 = vsel %vm1647_vm15, %v3733_v50, 0.0 }
 0x705   : > { %v3735_v52 = vpop.eup %3734 }
 0x706   : > { %v1858_v56 = vsel %vm1647_vm15, %v3735_v52, 0.0  ;;  %v3737_v57 = vpop.eup %3736 }
 0x707   : > { %1959 = vadd.xlane.f32.xlu1 %v1958_v54  ;;  %1859 = vadd.xlane.f32.xlu0 %v1858_v56  ;;  %v2163_v59 = vsel %vm1647_vm15, %v3737_v57, 0.0 }
 0x709   : > { %v3739_v58 = vpop.eup %3738 }
 0x70a   : > { %v2060_v60 = vsel %vm1647_vm15, %v3739_v58, 0.0  ;;  %v4366_v62 = vpop.eup %3740 }
 0x70b   : > { %2164 = vadd.xlane.f32.xlu1 %v2163_v59  ;;  %2061 = vadd.xlane.f32.xlu0 %v2060_v60  ;;  %v2363_v0 = vsel %vm1647_vm15, %v4366_v62, 0.0 }
 0x70d   : > { %v3743_v63 = vpop.eup %3742 }
 0x70e   : > { %v2263_v1 = vsel %vm1647_vm15, %v3743_v63, 0.0 }
 0x70f   : > { %2364 = vadd.xlane.f32.xlu1 %v2363_v0  ;;  %2264 = vadd.xlane.f32.xlu0 %v2263_v1 }
 0x790   : > { %v1760_v2 = vpop.xlane.xlu1 %1759 }
 0x791   : > { %3744 = vrcp.f32 %v1760_v2 }
 0x794   : > { %v1860_v3 = vpop.xlane.xlu0 %1859  ;;  %v1960_v4 = vpop.xlane.xlu1 %1959 }
 0x795   : > { %3746 = vrcp.f32 %v1860_v3 }
 0x796   : > { %3748 = vrcp.f32 %v1960_v4 }
 0x798   : > { %v2062_v15 = vpop.xlane.xlu0 %2061  ;;  %v2165_v18 = vpop.xlane.xlu1 %2164 }
 0x799   : > { %3750 = vrcp.f32 %v2062_v15 }
 0x79a   : > { %3752 = vrcp.f32 %v2165_v18 }
 0x79b   : > { %v3745_v5 = vpop.eup %3744 }
 0x79c   : > { %v1762_v6 = vmul.f32 %v3745_v5, %v3731_v47  ;;  %v2265_v22 = vpop.xlane.xlu0 %2264  ;;  %v2365_v25 = vpop.xlane.xlu1 %2364 }
 0x79d   : > { %3754 = vrcp.f32 %v2265_v22 }
 0x79e   : > { %v1763_v8 = vpack.c.bf16 %v1762_v6, %v1762_v6  ;;  %3756 = vrcp.f32 %v2365_v25 }
 0x79f   : > { %v3747_v10 = vpop.eup %3746 }
 0x7a0   : > { %3476 = vmatmul.mubr.msk.bf16.vlgmr.msra.gmra.mrb[16].mxu1 %vm1647_vm15, %v1763_v8  ;;  %v1862_v14 = vmul.f32 %v3747_v10, %v3735_v52  ;;  %v3749_v55 = vpop.eup %3748 }
 0x7a1   : > { %3486 = vmatpush3.bf16.msra.mxu1 %v4326_v7  ;;  %3487 = vmatprep.mubr.msk.bf16.mxu1 %vm3786_vm1, %v3785_v12  ;;  %v1962_v17 = vmul.f32 %v3749_v55, %v3733_v50 }
 0x7a2   : > { %3497 = vmatprep.subr.bf16.mxu1 %v3785_v12  ;;  %v1863_v16 = vpack.c.bf16 %v1862_v14, %v1862_v14 }
 0x7a3   : > { %v1963_v19 = vpack.c.bf16 %v1962_v17, %v1962_v17  ;;  %v3751_v20 = vpop.eup %3750 }
 0x7a4   : > { %v2064_v21 = vmul.f32 %v3751_v20, %v3739_v58  ;;  %v3753_v23 = vpop.eup %3752 }
 0x7a5   : > { %v2167_v24 = vmul.f32 %v3753_v23, %v3737_v57 }
 0x7a7   : > { %v2168_v13 = vpack.c.bf16 %v2167_v24, %v2167_v24  ;;  %v3755_v27 = vpop.eup %3754 }
 0x7a8   : > { %3488 = vmatmul.mubr.msk.bf16.vlgmr.msra.gmra.mrb[20].mxu1 %vm1647_vm15, %v1863_v16  ;;  %v2267_v28 = vmul.f32 %v3755_v27, %v3743_v63  ;;  %v3757_v30 = vpop.eup %3756 }
 0x7a9   : > { %3498 = vmatpush3.bf16.msra.mxu1 %v4326_v7  ;;  %3499 = vmatprep.mubr.msk.bf16.mxu1 %vm3786_vm1, %v3785_v12  ;;  %v2065_v7 = vpack.c.bf16 %v2064_v21, %v2064_v21  ;;  %v2367_v26 = vmul.f32 %v3757_v30, %v4366_v62 }
 0x7aa   : > { %3509 = vmatprep.subr.bf16.mxu1 %v3785_v12  ;;  %v2268_v29 = vpack.c.bf16 %v2267_v28, %v2267_v28 }
 0x7ab   : > { %v2368_v31 = vpack.c.bf16 %v2367_v26, %v2367_v26 }
 0x7b0   : > { %3500 = vmatmul.mubr.msk.bf16.vlgmr.msra.gmra.mrb[24].mxu1 %vm1647_vm15, %v1963_v19 }
 0x7b1   : > { %3510 = vmatpush3.bf16.msra.mxu1 %v4329_v9  ;;  %3511 = vmatprep.mubr.msk.bf16.mxu1 %vm3786_vm1, %v3785_v12 }
 0x7b2   : > { %3521 = vmatprep.subr.bf16.mxu1 %v3785_v12 }
 0x7b8   : > { %3512 = vmatmul.mubr.msk.bf16.vlgmr.msra.gmra.mrb[28].mxu1 %vm1647_vm15, %v2065_v7 }
 0x7b9   : > { %3522 = vmatpush3.bf16.msra.mxu1 %v4329_v9  ;;  %3523 = vmatprep.mubr.msk.bf16.mxu1 %vm3786_vm1, %v3785_v12 }
 0x7ba   : > { %3533 = vmatprep.subr.bf16.mxu1 %v3785_v12 }
 0x7c0   : > { %3524 = vmatmul.mubr.msk.bf16.vlgmr.msra.gmra.mrb[32].mxu1 %vm1647_vm15, %v2168_v13 }
 0x7c1   : > { %3534 = vmatpush3.bf16.msra.mxu1 %v4329_v9  ;;  %3535 = vmatprep.mubr.msk.bf16.mxu1 %vm3786_vm1, %v3785_v12 }
 0x7c2   : > { %3545 = vmatprep.subr.bf16.mxu1 %v3785_v12 }
 0x7c8   : > { %3536 = vmatmul.mubr.msk.bf16.vlgmr.msra.gmra.mrb[36].mxu1 %vm1647_vm15, %v2268_v29 }
 0x7c9   : > { %3546 = vmatpush3.bf16.msra.mxu1 %v4329_v9  ;;  %3547 = vmatprep.mubr.msk.bf16.mxu1 %vm3786_vm1, %v3785_v12  ;;  %v3680_v9 = vld [vmem:[%s3883_s26 + $0x10] sm:$0xff]  }
 0x7ca   : > { %3556 = vmatpush3.bf16.msra.mxu0 %v3680_v9  ;;  %v3688_v9 = vld [vmem:[%s3912_s30 + $0x4] ss:$8 sps:$4 sm:$0xff]  }
 0x7cb   : > { %3557 = vmatprep.subr.bf16.mxu0 %v3785_v12  ;;  %2675 = vmatprep.subr.bf16.mxu1 %v3688_v9 }
 0x7ce   : > { %3558 = vmatpush3.bf16.msra.mxu0 %v3681_v36  ;;  %v3691_v36 = vld [vmem:[%s3912_s30 + $0x14] ss:$8 sps:$4 sm:$0xff]  }
 0x7cf   : > { %3559 = vmatprep.subr.bf16.mxu0 %v3785_v12 }
 0x7d0   : > { %3548 = vmatmul.mubr.msk.bf16.vlgmr.msra.gmra.mrb[40].mxu1 %vm1647_vm15, %v2368_v31 }
 0x7d1   : > { %2707 = vmatprep.mubr.bf16.mxu1 %v3784_v11  ;;  %v3683_v11 = vld [vmem:[%s3883_s26 + $0x28] sm:$0xff]   ;;  %2676 = vmatpush1.bf16.msra.mxu1 %v3686_v35 }
 0x7d2   : > { %3560 = vmatpush3.bf16.msra.mxu0 %v3682_v37  ;;  %v3689_v37 = vld [vmem:[%s3912_s30 + $0x10] ss:$8 sps:$4 sm:$0xff]   ;;  %2677 = vmatprep.subr.bf16.mxu1 %v3691_v36 }
 0x7d3   : > { %3561 = vmatprep.subr.bf16.mxu0 %v3785_v12 }
 0x7d5   : > { %2678 = vmatpush1.bf16.msra.mxu1 %v3689_v37 }
 0x7d6   : > { %3562 = vmatpush3.bf16.msra.mxu0 %v3683_v11 }
 0x7d7   : > { %3563 = vmatprep.subr.bf16.mxu0 %v3785_v12 }
 0x7da   : > { %3564 = vmatpush3.bf16.msra.mxu0 %v3684_v38 }
 0x7db   : > { %3565 = vmatprep.subr.bf16.mxu0 %v3785_v12 }
 0x7de   : > { %3566 = vmatpush3.bf16.msra.mxu0 %v3685_v41 }
 0x873   : > { %v1801_v42 = vpop.f32.mrb[16].mxu1 }
 0x874   : > { %v1807_v46 = vsel %vm4297_vm12, %v1801_v42, 0.0  ;;  %v3477_v47 = vpop.f32.mrb[17].mxu1 }
 0x875   : > { %v1808_v48 = vadd.f32 %v1807_v46, %v1707_v44  ;;  %v1804_v49 = vpop.f32.mrb[18].mxu1  ;;  %v3694_v47 = vld [vmem:[%s3912_s30 + $0x24] ss:$8 sps:$4 sm:$0xff]  }
 0x876   : > { %v3478_v50 = vpop.f32.mrb[19].mxu1  ;;  %2679 = vmatprep.subr.bf16.mxu1 %v3694_v47  ;;  %v3697_v49 = vld [vmem:[%s3912_s30 + $0x34] ss:$8 sps:$4 sm:$0xff]  }
 0x877   : > { %v3695_v50 = vld [vmem:[%s3912_s30 + $0x30] ss:$8 sps:$4 sm:$0xff]  }
 0x87b   : > { %v1901_v52 = vpop.f32.mrb[20].mxu1 }
 0x87c   : > { %v1907_v54 = vsel %vm4244_vm5, %v1901_v52, 0.0  ;;  %v3489_v56 = vpop.f32.mrb[21].mxu1  ;;  %v3700_v52 = vld [vmem:[%s3912_s30 + $0x44] ss:$8 sps:$4 sm:$0xff]  }
 0x87d   : > { %v1908_v12 = vadd.f32 %v1907_v54, %v1808_v48  ;;  %v1904_v57 = vpop.f32.mrb[22].mxu1  ;;  %v3692_v48 = vld [vmem:[%s3912_s30 + $0x20] ss:$8 sps:$4 sm:$0xff]   ;;  %v3703_v56 = vld [vmem:[%s3912_s30 + $0x54] ss:$8 sps:$4 sm:$0xff]  }
 0x87e   : > { %v3490_v58 = vpop.f32.mrb[23].mxu1  ;;  %2680 = vmatpush1.bf16.msra.mxu1 %v3692_v48  ;;  %v3698_v54 = vld [vmem:[%s3912_s30 + $0x40] ss:$8 sps:$4 sm:$0xff]   ;;  %v3706_v57 = vld [vmem:[%s3912_s30 + $0x64] ss:$8 sps:$4 sm:$0xff]  }
 0x87f   : > { %2681 = vmatprep.subr.bf16.mxu1 %v3697_v49  ;;  %v3704_v58 = vld [vmem:[%s3912_s30 + $0x60] ss:$8 sps:$4 sm:$0xff]  }
 0x882   : > { %2682 = vmatpush1.bf16.msra.mxu1 %v3695_v50 }
 0x883   : > { %v2001_v59 = vpop.f32.mrb[24].mxu1  ;;  %2683 = vmatprep.subr.bf16.mxu1 %v3700_v52 }
 0x884   : > { %v2007_v60 = vsel %vm1599_vm8, %v2001_v59, 0.0  ;;  %v3501_v51 = vpop.f32.mrb[25].mxu1  ;;  %v3709_v59 = vld [vmem:[%s3912_s30 + $0x74] ss:$8 sps:$4 sm:$0xff]  }
 0x885   : > { %v2008_v62 = vadd.f32 %v2007_v60, %v1908_v12  ;;  %v2004_v63 = vpop.f32.mrb[26].mxu1  ;;  %v3701_v12 = vld [vmem:[%s3912_s30 + $0x50] ss:$8 sps:$4 sm:$0xff]   ;;  %v3710_v51 = vld [vmem:[%s3921_s5 + $0x40] sm:$0xff]  }
 0x886   : > { %v3502_v0 = vpop.f32.mrb[27].mxu1  ;;  %2684 = vmatpush1.bf16.msra.mxu1 %v3698_v54  ;;  %v3707_v60 = vld [vmem:[%s3912_s30 + $0x70] ss:$8 sps:$4 sm:$0xff]   ;;  %v3712_v63 = vld [vmem:[%s3921_s5 + $0x48] sm:$0xff]   ;;  %3393 = vmatprep.subr.bf16.mxu0 %v3710_v51 }
 0x887   : > { %2685 = vmatprep.subr.bf16.mxu1 %v3703_v56  ;;  %v3713_v0 = vld [vmem:[%s3921_s5 + $0x8] sm:$0xff]  }
 0x88a   : > { %2686 = vmatpush1.bf16.msra.mxu1 %v3701_v12 }
 0x88b   : > { %v2106_v1 = vpop.f32.mrb[28].mxu1  ;;  %2687 = vmatprep.subr.bf16.mxu1 %v3706_v57 }
 0x88c   : > { %v3513_v2 = vpop.f32.mrb[29].mxu1  ;;  %v2112_v6 = vsel %vm1591_vm4, %v2106_v1, 0.0 }
 0x88d   : > { %v2109_v3 = vpop.f32.mrb[30].mxu1 }
 0x88e   : > { %v3514_v4 = vpop.f32.mrb[31].mxu1  ;;  %2688 = vmatpush1.bf16.msra.mxu1 %v3704_v58 }
 0x88f   : > { %2689 = vmatprep.subr.bf16.mxu1 %v3709_v59 }
 0x892   : > { %2690 = vmatpush1.bf16.msra.mxu1 %v3707_v60 }
 0x893   : > { %v2206_v5 = vpop.f32.mrb[32].mxu1 }
 0x894   : > { %v2212_v8 = vsel %vm4297_vm12, %v2206_v5, 0.0  ;;  %v3525_v10 = vpop.f32.mrb[33].mxu1 }
 0x895   : > { %v2213_v14 = vadd.f32 %v2212_v8, %v2112_v6  ;;  %v2209_v15 = vpop.f32.mrb[34].mxu1  ;;  %v3226_v10 = vld [vmem:[%s4557_s9] ss:$0 sm:$0xff] }
 0x896   : > { %v3526_v16 = vpop.f32.mrb[35].mxu1 }
 0x89b   : > { %v2306_v55 = vpop.f32.mrb[36].mxu1 }
 0x89c   : > { %v2312_v17 = vsel %vm4244_vm5, %v2306_v55, 0.0  ;;  %v3537_v18 = vpop.f32.mrb[37].mxu1 }
 0x89d   : > { %v2313_v19 = vadd.f32 %v2312_v17, %v2213_v14  ;;  %v2309_v20 = vpop.f32.mrb[38].mxu1  ;;  %v3227_v17 = vld [vmem:[%s4557_s9 + $0x1] ss:$0 sm:$0xff] }
 0x89e   : > { %v3538_v21 = vpop.f32.mrb[39].mxu1 }
 0x8a3   : > { %v2406_v22 = vpop.f32.mrb[40].mxu1 }
 0x8a4   : > { %v2412_v7 = vsel %vm1599_vm8, %v2406_v22, 0.0  ;;  %v3549_v23 = vpop.f32.mrb[41].mxu1  ;;  %v3714_v22 = vld [vmem:[%s3921_s5 + $0x50] sm:$0xff]  }
 0x8a5   : > { %v2413_v61 = vadd.f32 %v2412_v7, %v2313_v19  ;;  %v2409_v24 = vpop.f32.mrb[42].mxu1  ;;  %v3715_v7 = vld [vmem:[%s3921_s5 + $0x10] sm:$0xff]   ;;  %v3716_v23 = vld [vmem:[%s3921_s5 + $0x58] sm:$0xff]  }
 0x8a6   : > { %v3550_v25 = vpop.f32.mrb[43].mxu1  ;;  %v3718_v24 = vld [vmem:[%s3921_s5 + $0x60] sm:$0xff]  }
 0x8a7   : > { %v2414_v13 = vpack.c.bf16 %v2413_v61, %v2008_v62  ;;  %v3711_v62 = vld [vmem:[%s3921_s5] sm:$0xff]   ;;  %v3717_v61 = vld [vmem:[%s3921_s5 + $0x18] sm:$0xff]  }
 0x8a8   : > { %v3719_v25 = vld [vmem:[%s3921_s5 + $0x20] sm:$0xff]  }
 0x8a9   : > { %3568 = vmatmul.mubr.bf16.vlgmr.msra.gmra.mrb[28].mxu0 %v2414_v13  ;;  %v3720_v13 = vld [vmem:[%s3921_s5 + $0x68] sm:$0xff]  }
 0x8aa   : > { %3394 = vmatpush3.bf16.msra.mxu0 %v3711_v62 }
 0x8ab   : > { %3395 = vmatprep.subr.bf16.mxu0 %v3712_v63 }
 0x8ae   : > { %3396 = vmatpush3.bf16.msra.mxu0 %v3713_v0  ;;  %v3244_v0 = vld [vmem:[%s631_s6] ss:$0 sm:$0xff] }
 0x8af   : > { %3397 = vmatprep.subr.bf16.mxu0 %v3714_v22 }
 0x8b2   : > { %3398 = vmatpush3.bf16.msra.mxu0 %v3715_v7 }
 0x8b3   : > { %3399 = vmatprep.subr.bf16.mxu0 %v3716_v23 }
 0x8b6   : > { %3400 = vmatpush3.bf16.msra.mxu0 %v3717_v61 }
 0x8b7   : > { %3401 = vmatprep.subr.bf16.mxu0 %v3718_v24 }
 0x8ba   : > { %3402 = vmatpush3.bf16.msra.mxu0 %v3719_v25 }
 0x8bb   : > { %3403 = vmatprep.subr.bf16.mxu0 %v3720_v13 }
 0x97c   : > { %v2520_v27 = vpop.f32.mrb[28].mxu0 }
 0x97d   : > { %v2521_v28 = vadd.f32 %v3217_v53, %v2520_v27  ;;  %v3569_v29 = vpop.f32.mrb[29].mxu0  ;;  %v3722_v27 = vld [vmem:[%s3921_s5 + $0x70] sm:$0xff]  }
 0x97e   : > { %v2523_v45 = vpop.f32.mrb[30].mxu0  ;;  %v3724_v29 = vld [vmem:[%s3921_s5 + $0x78] sm:$0xff]  }
 0x97f   : > { %v2524_v30 = vadd.f32 %v3217_v53, %v2523_v45  ;;  %v3570_v26 = vpop.f32.mrb[31].mxu0  ;;  %v2527_v31 = vadd.f32 %v2521_v28, %v4202_v32  ;;  %v3721_v53 = vld [vmem:[%s3921_s5 + $0x28] sm:$0xff]   ;;  %v3723_v28 = vld [vmem:[%s3921_s5 + $0x30] sm:$0xff]   ;;  %v3725_v45 = vld [vmem:[%s3921_s5 + $0x38] sm:$0xff]  }
 0x980   : > { %3404 = vmatpush3.bf16.msra.mxu0 %v3721_v53  ;;  %v3261_v53 = vld [vmem:[%s3931_s25] ss:$0 sm:$0xff] }
 0x981   : > { %2531 = vadd.xlane.f32.xlu0 %v2527_v31  ;;  %v2528_v34 = vadd.f32 %v2524_v30, %v4207_v33  ;;  %3405 = vmatprep.subr.bf16.mxu0 %v3722_v27  ;;  %v2583_v30 = vld [vmem:[%s623_s18] sm:$0x3] }
 0x982   : > { %v2588_v26 = vrot.slane %v2583_v30, %v1363_v43 }
 0x983   : > { %2533 = vadd.xlane.f32.xlu1 %v2528_v34 }
 0x984   : > { %3406 = vmatpush3.bf16.msra.mxu0 %v3723_v28 }
 0x985   : > { %3407 = vmatprep.subr.bf16.mxu0 %v3724_v29  ;;  %v3262_v29 = vld [vmem:[%s3931_s25 + $0x1] ss:$0 sm:$0xff] }
 0x988   : > { %3408 = vmatpush3.bf16.msra.mxu0 %v3725_v45 }
 0xa0e   : > { %v2532_v11 = vpop.xlane.xlu0 %2531 }
 0xa0f   : > { %v2536_v38 = vmul.f32 0.0078125, %v2532_v11 }
 0xa10   : > { %v2534_v41 = vpop.xlane.xlu1 %2533 }
 0xa11   : > { %v2538_v32 = vsub.f32 %v2527_v31, %v2536_v38  ;;  %v2537_v33 = vmul.f32 0.0078125, %v2534_v41  ;;  %v2592_v31 = vrot.slane %v2583_v30, %v1367_v40 }
 0xa13   : > { %v2539_v42 = vsub.f32 %v2528_v34, %v2537_v33  ;;  %v2540_v44 = vmul.f32 %v2538_v32, %v2538_v32 }
 0xa15   : > { %2542 = vadd.xlane.f32.xlu0 %v2540_v44  ;;  %v2541_v46 = vmul.f32 %v2539_v42, %v2539_v42 }
 0xa17   : > { %2544 = vadd.xlane.f32.xlu1 %v2541_v46 }
 0xaa2   : > { %v2543_v1 = vpop.xlane.xlu0 %2542 }
 0xaa3   : > { %v2546_v2 = vmul.f32 0.0078125, %v2543_v1 }
 0xaa4   : > { %v2545_v3 = vpop.xlane.xlu1 %2544 }
 0xaa5   : > { %v2548_v4 = vadd.f32 1e-05, %v2546_v2  ;;  %v2547_v5 = vmul.f32 0.0078125, %v2545_v3 }
 0xaa7   : > { %3758 = vrsqrt.f32 %v2548_v4  ;;  %v2549_v6 = vadd.f32 1e-05, %v2547_v5 }
 0xaa9   : > { %3760 = vrsqrt.f32 %v2549_v6 }
 0xab1   : > { %v3759_v8 = vpop.eup %3758 }
 0xab2   : > { %v2552_v14 = vmul.f32 %v3759_v8, %v2538_v32 }
 0xab3   : > { %v3761_v15 = vpop.eup %3760 }
 0xab4   : > { %v2553_v16 = vmul.f32 %v3761_v15, %v2539_v42  ;;  %v2558_v55 = vmul.f32 %v3226_v10, %v2552_v14 }
 0xab6   : > { %v2559_v18 = vmul.f32 %v3226_v10, %v2553_v16  ;;  %v4464_v19 = vadd.f32 %v3227_v17, %v2558_v55 }
 0xab8   : > { %v4466_v20 = vadd.f32 %v3227_v17, %v2559_v18 }
 0xaba   : > { %v2566_v21 = vpack.c.bf16 %v4466_v20, %v4464_v19 }
 0xabc   : > { %2708 = vmatmul.mubr.bf16.vlgmr.msra.gmra.mrb[44].mxu1 %v2566_v21 }
 0xb8f   : > { %v2709_v34 = vpop.f32.mrb[44].mxu1 }
 0xb90   : > { %v2710_v35 = vadd.f32 %v2709_v34, %v2588_v26  ;;  %v2711_v9 = vpop.f32.mrb[45].mxu1 }
 0xb91   : > { %v2712_v36 = vadd.f32 %v2711_v9, %v2592_v31  ;;  %v2713_v37 = vpop.f32.mrb[46].mxu1 }
 0xb92   : > { %v2723_v11 = vmul.f32 0.70710677, %v2710_v35  ;;  %v2714_v38 = vadd.f32 %v2713_v37, %v2588_v26  ;;  %v2715_v41 = vpop.f32.mrb[47].mxu1  ;;  %v2718_v49 = vmul.f32 0.5, %v2710_v35 }
 0xb93   : > { %v2724_v32 = vmul.f32 0.70710677, %v2712_v36  ;;  %v2716_v33 = vadd.f32 %v2715_v41, %v2592_v31  ;;  %v2719_v54 = vmul.f32 0.5, %v2712_v36 }
 0xb94   : > { %3762 = verf.f32 %v2723_v11  ;;  %v2725_v42 = vmul.f32 0.70710677, %v2714_v38  ;;  %v2720_v50 = vmul.f32 0.5, %v2714_v38 }
 0xb95   : > { %3764 = verf.f32 %v2724_v32  ;;  %v2726_v44 = vmul.f32 0.70710677, %v2716_v33  ;;  %v2721_v56 = vmul.f32 0.5, %v2716_v33 }
 0xb96   : > { %3766 = verf.f32 %v2725_v42 }
 0xb97   : > { %3768 = verf.f32 %v2726_v44 }
 0xb9e   : > { %v3763_v43 = vpop.eup %3762 }
 0xb9f   : > { %v3765_v46 = vpop.eup %3764  ;;  %v2731_v39 = vadd.f32 1.0, %v3763_v43 }
 0xba0   : > { %v3767_v40 = vpop.eup %3766  ;;  %v2732_v47 = vadd.f32 1.0, %v3765_v46 }
 0xba1   : > { %v3769_v48 = vpop.eup %3768  ;;  %v2733_v52 = vadd.f32 1.0, %v3767_v40  ;;  %v2735_v57 = vmul.f32 %v2731_v39, %v2718_v49 }
 0xba2   : > { %v2734_v12 = vadd.f32 1.0, %v3769_v48  ;;  %v2736_v59 = vmul.f32 %v2732_v47, %v2719_v54 }
 0xba3   : > { %v2737_v58 = vmul.f32 %v2733_v52, %v2720_v50 }
 0xba4   : > { %v2738_v60 = vmul.f32 %v2734_v12, %v2721_v56 }
 0xba5   : > { %v2739_v51 = vpack.c.bf16 %v2737_v58, %v2735_v57 }
 0xba6   : > { %v2740_v62 = vpack.c.bf16 %v2738_v60, %v2736_v59 }
 0xba8   : > { %2908 = vmatprep.mubr.bf16.mxu0 %v2740_v62 }
 0xba9   : > { %2909 = vmatmul.mubr.bf16.vlgmr.msra.gmra.mrb[32].mxu0 %v2739_v51 }
 0xc7c   : > { %v3409_v63 = vpop.f32.mrb[32].mxu0 }
 0xc7d   : > { %v3410_v1 = vpop.f32.mrb[33].mxu0 }
 0xc7e   : > { %v3411_v2 = vadd.f32 %v3410_v1, %v3409_v63  ;;  %v3412_v3 = vpop.f32.mrb[34].mxu0 }
 0xc7f   : > { %v3413_v4 = vpop.f32.mrb[35].mxu0 }
 0xc80   : > { %v2911_v5 = vadd.f32 %v3411_v2, %v3244_v0  ;;  %v3414_v6 = vadd.f32 %v3413_v4, %v3412_v3 }
 0xc82   : > { %v2914_v8 = vadd.f32 %v3414_v6, %v3244_v0  ;;  %v2917_v10 = vadd.f32 %v2911_v5, %v4464_v19 }
 0xc84   : > { %2921 = vadd.xlane.f32.xlu0 %v2917_v10  ;;  %v2918_v14 = vadd.f32 %v2914_v8, %v4466_v20 }
 0xc86   : > { %2923 = vadd.xlane.f32.xlu1 %v2918_v14 }
 0xd11   : > { %v2922_v15 = vpop.xlane.xlu0 %2921 }
 0xd12   : > { %v2925_v16 = vmul.f32 0.0078125, %v2922_v15 }
 0xd13   : > { %v2924_v55 = vpop.xlane.xlu1 %2923 }
 0xd14   : > { %v2927_v17 = vsub.f32 %v2917_v10, %v2925_v16  ;;  %v2926_v18 = vmul.f32 0.0078125, %v2924_v55 }
 0xd16   : > { %v2928_v21 = vsub.f32 %v2918_v14, %v2926_v18  ;;  %v2929_v22 = vmul.f32 %v2927_v17, %v2927_v17 }
 0xd18   : > { %2931 = vadd.xlane.f32.xlu0 %v2929_v22  ;;  %v2930_v7 = vmul.f32 %v2928_v21, %v2928_v21 }
 0xd1a   : > { %2933 = vadd.xlane.f32.xlu1 %v2930_v7 }
 0xda5   : > { %v2932_v23 = vpop.xlane.xlu0 %2931 }
 0xda6   : > { %v2935_v61 = vmul.f32 0.0078125, %v2932_v23 }
 0xda7   : > { %v2934_v24 = vpop.xlane.xlu1 %2933 }
 0xda8   : > { %v2937_v19 = vadd.f32 1e-05, %v2935_v61  ;;  %v2936_v25 = vmul.f32 0.0078125, %v2934_v24 }
 0xdaa   : > { %3770 = vrsqrt.f32 %v2937_v19  ;;  %v2938_v20 = vadd.f32 1e-05, %v2936_v25 }
 0xdac   : > { %3772 = vrsqrt.f32 %v2938_v20 }
 0xdb4   : > { %v3771_v13 = vpop.eup %3770 }
 0xdb5   : > { %v2941_v27 = vmul.f32 %v3771_v13, %v2927_v17 }
 0xdb6   : > { %v3773_v28 = vpop.eup %3772 }
 0xdb7   : > { %v2947_v45 = vmul.f32 %v3261_v53, %v2941_v27  ;;  %v2942_v30 = vmul.f32 %v3773_v28, %v2928_v21 }
 0xdb9   : > { %v2953_v26 = vadd.f32 %v3262_v29, %v2947_v45  ;;  %v2948_v31 = vmul.f32 %v3261_v53, %v2942_v30 }
 0xdbb   : > { %2955 = vst [vmem:[%s4547_s17] sm:$0xff] %v2953_v26  ;;  %v2954_v34 = vadd.f32 %v3262_v29, %v2948_v31 }
 0xdbd   : > { %2956 = vst [vmem:[%s4547_s17 + $0x8] sm:$0xff] %v2954_v34 }
 0xdbe PF: > { %s4558_s22 = sld [smem:[#allocation2_spill]] }
 0xdc4   : > { %s25_s18 = sadd.s32 1, %s4558_s22  }
 0xdc5   : > { %p22_p5 = scmp.ge.s32.totalorder %s25_s18, 4  }
 0xdc7   :  { %24 = sbr.rel (!%p22_p5) target bundleno = 8 (0x8), region = 137 }

// kernel: forward.3
= control target key start
LH: loop header
LB: loop body
LE: loop exit
PB: predicated region body
PF: predicated region fallthrough
CT: control target
= control target key end

     0   :  { %s3688_s0 = inlined_call_operand.vmem [shape: f32[2,128], index: 0, kind: input, shape index: {}]   ;;  %s3689_s1 = inlined_call_operand.vmem [shape: f32[16,128], index: 1, kind: input, shape index: {}]   ;;  %s3690_s2 = inlined_call_operand.vmem [shape: bf16[128,256], index: 2, kind: input, shape index: {}]   ;;  %s3691_s3 = inlined_call_operand.vmem [shape: f32[1,256], index: 3, kind: input, shape index: {}]   ;;  %s3692_s4 = inlined_call_operand.vmem [shape: bf16[2,128,128], index: 4, kind: input, shape index: {}]   ;;  %s3693_s5 = inlined_call_operand.vmem [shape: f32[2,1,128], index: 5, kind: input, shape index: {}]   ;;  %s3694_s6 = inlined_call_operand.vmem [shape: bf16[2,128,128], index: 6, kind: input, shape index: {}]   ;;  %s3695_s7 = inlined_call_operand.vmem [shape: f32[2,1,128], index: 7, kind: input, shape index: {}]   ;;  %s3696_s8 = inlined_call_operand.vmem [shape: f32[2,2,128], index: 8, kind: input, shape index: {}]   ;;  %s3697_s9 = inlined_call_operand.vmem [shape: bf16[2,128,128], index: 9, kind: input, shape index: {}]   ;;  %s3698_s10 = inlined_call_operand.vmem [shape: f32[2,1,128], index: 10, kind: input, shape index: {}]   ;;  %s3699_s11 = inlined_call_operand.vmem [shape: bf16[2,128,256], index: 11, kind: input, shape index: {}]   ;;  %s3700_s12 = inlined_call_operand.vmem [shape: f32[2,1,256], index: 12, kind: input, shape index: {}]   ;;  %s3701_s13 = inlined_call_operand.vmem [shape: bf16[2,128,128], index: 13, kind: input, shape index: {}]   ;;  %s3702_s14 = inlined_call_operand.vmem [shape: f32[2,1,128], index: 14, kind: input, shape index: {}]   ;;  %s3703_s15 = inlined_call_operand.vmem [shape: f32[2,2,128], index: 15, kind: input, shape index: {}]   ;;  %s3704_s16 = inlined_call_operand.vmem [shape: bf16[2,128,256], index: 16, kind: input, shape index: {}]   ;;  %s3705_s17 = inlined_call_operand.vmem [shape: f32[2,1,256], index: 17, kind: input, shape index: {}]   ;;  %s3706_s18 = inlined_call_operand.vmem [shape: bf16[2,256,128], index: 18, kind: input, shape index: {}]   ;;  %s3707_s19 = inlined_call_operand.vmem [shape: f32[2,1,128], index: 19, kind: input, shape index: {}]   ;;  %s3708_s20 = inlined_call_operand.vmem [shape: f32[2,2,128], index: 20, kind: input, shape index: {}]   ;;  %s3709_s21 = inlined_call_operand.hbm [shape: f32[2,256], index: 21, kind: output, shape index: {}]  }
   0x1   :  { %3717 = sst [smem:[#allocation9_spill]] %s3688_s0 }
   0x2   :  { %3718 = sst [smem:[#allocation10_spill]] %s3689_s1 }
   0x3   :  { %3719 = sst [smem:[#allocation11_spill]] %s3690_s2 }
   0x4   :  { %3720 = sst [smem:[#allocation12_spill]] %s3691_s3 }
   0x5   :  { %3721 = sst [smem:[#allocation13_spill]] %s3692_s4 }
   0x6   :  { %3722 = sst [smem:[#allocation14_spill]] %s3693_s5 }
   0x7   :  { %3723 = sst [smem:[#allocation15_spill]] %s3694_s6 }
   0x8   :  { %3724 = sst [smem:[#allocation16_spill]] %s3695_s7 }
   0x9   :  { %3725 = sst [smem:[#allocation17_spill]] %s3696_s8 }
   0xa   :  { %3726 = sst [smem:[#allocation18_spill]] %s3697_s9 }
   0xb   :  { %3727 = sst [smem:[#allocation19_spill]] %s3698_s10 }
   0xc   :  { %3728 = sst [smem:[#allocation20_spill]] %s3699_s11 }
   0xd   :  { %3729 = sst [smem:[#allocation21_spill]] %s3701_s13 }
   0xe   :  { %3730 = sst [smem:[#allocation22_spill]] %s3703_s15 }
   0xf   :  { %3731 = sst [smem:[#allocation23_spill]] %s3708_s20 }
  0x10   :  { %3732 = sst [smem:[#allocation24_spill]] %s3709_s21 }
  0x11   :  { %26 = vsyncpa [#allocation4], 0  ;;  %s3218_s2 = smov 0  }
  0x12 LB: > { %3733 = sst [smem:[#allocation6_spill]] %s3101_s2  ;;  %s3224_s25 = sadd.s32 4294967295, %s3101_s2   ;;  %s3101_s2 = sphi %s3218_s2, %s32_s2  }
  0x13   : > { %3734 = sst [smem:[#allocation7_spill]] %s3224_s25  ;;  %p2605_p0 = scmp.ge.s32.totalorder %s3101_s2, 1 }
  0x14   : > { %p728_p1 = scmp.lt.s32.totalorder %s3101_s2, 3 }
  0x16   : > { %p729_p2 = pnand %p2605_p0, %p728_p1 }
  0x18   : > { %732 = sbr.rel (%p729_p2) target bundleno = 2844 (0xb1c), region = 104 }
  0x1f   : > { %p848_p3 = scmp.lt.s32.totalorder %s3224_s25, 1  ;;  %s3736_s5 = sld [smem:[#allocation13_spill]] }
  0x20   : > { %s3737_s6 = sld [smem:[#allocation15_spill]]  ;;  %s3739_s8 = sld [smem:[#allocation17_spill]] }
  0x21   : > { %s3230_s26 = scalar_select %p848_p3, %s3224_s25, 1 }
  0x22   : > { %s3741_s9 = sld [smem:[#allocation18_spill]]  ;;  %s3743_s11 = sld [smem:[#allocation20_spill]] }
  0x23   : > { %s2739_s27 = sshll.u32 %s3230_s26, 6  ;;  %s3252_s20 = sshll.u32 %s3230_s26, 1 }
  0x24   : > { %s2742_s1 = sshll.u32 %s3230_s26, 7  ;;  %s3744_s13 = sld [smem:[#allocation21_spill]] }
  0x25   : > { %s3240_s22 = scalar_lea.vmem %s3736_s5, %s2739_s27  ;;  %s3745_s15 = sld [smem:[#allocation22_spill]] }
  0x26   : > { %s3245_s24 = scalar_lea.vmem %s3737_s6, %s2739_s27  ;;  %s3258_s29 = scalar_lea.vmem %s3739_s8, %s3252_s20 }
  0x27   : > { %3740 = sst [smem:[#allocation8_spill]] %s3258_s29  ;;  %s905_s7 = scalar_lea.vmem %s3705_s17, %s3252_s20 }
  0x28   : > { %s3263_s5 = scalar_lea.vmem %s3741_s9, %s2739_s27  ;;  %s3273_s3 = scalar_lea.vmem %s3743_s11, %s2742_s1 }
  0x29   : > { %s3297_s11 = scalar_lea.vmem %s3704_s16, %s2742_s1  ;;  %s3306_s8 = scalar_lea.vmem %s3706_s18, %s2742_s1 }
  0x2a   : > { %s3282_s4 = scalar_lea.vmem %s3744_s13, %s2739_s27  ;;  %s913_s2 = scalar_lea.vmem %s3707_s19, %s3230_s26 }
  0x2b   : > { %s3292_s10 = scalar_lea.vmem %s3745_s15, %s3252_s20  ;;  %s3746_s13 = sld [smem:[#allocation23_spill]] }
  0x2c   : > { %s3747_s25 = sld [smem:[#allocation7_spill]] }
  0x31   : > { %s3316_s15 = scalar_lea.vmem %s3746_s13, %s3252_s20 }
  0x32   : > { %p2625_p4 = scmp.ne.s32.totalorder %s3747_s25, 0 }
  0x33   : > { %s3748_s28 = sld [smem:[#allocation9_spill]] (!%p2625_p4) }
  0x34   : > { %922 = sbr.rel (%p2625_p4) target bundleno = 59 (0x3b), region = 108 }
  0x39   : > { %v923_v0 = vld [vmem:[%s3748_s28] sm:$0x3] (!%p2625_p4) }
  0x3a   : > { %924 = vst [vmem:[#allocation2] sm:$0x3] (!%p2625_p4), %v923_v0 }
  0x3b PF: > { %v2903_v1 = vld [vmem:[%s3240_s22] sm:$0xff]   ;;  %v3103_v2 = vmov 0.0   ;;  %v2904_v3 = vld [vmem:[%s3240_s22 + $0x8] sm:$0xff]   ;;  %vm3104_vm0 = vmmov 0   ;;  %v2905_v4 = vld [vmem:[%s3240_s22 + $0x10] sm:$0xff]   ;;  %s3749_s1 = sld [smem:[#allocation14_spill]]  ;;  %s3755_s13 = scalar_lea.vmem %s3700_s12, %s3252_s20 }
  0x3c   : > { %2804 = vmatprep.subr.bf16.mxu0 %v3103_v2  ;;  %2824 = vmatprep.subr.bf16.mxu1 %v3103_v2  ;;  %v2911_v5 = vld [vmem:[%s3245_s24] sm:$0xff]   ;;  %v2906_v6 = vld [vmem:[%s3240_s22 + $0x18] sm:$0xff]   ;;  %v2912_v7 = vld [vmem:[%s3245_s24 + $0x8] sm:$0xff]   ;;  %vm1153_vm1 = vcmask 1041408   ;;  %v3105_v0 = vmov 0   ;;  %s3753_s25 = sld [smem:[#allocation10_spill]] }
  0x3d   : > { %2805 = vmatpush3.bf16.msra.mxu0 %v2903_v1  ;;  %2820 = vmatprep.mubr.msk.bf16.mxu0 %vm3104_vm0, %v3103_v2  ;;  %v2907_v8 = vld [vmem:[%s3240_s22 + $0x20] sm:$0xff]   ;;  %v2913_v9 = vld [vmem:[%s3245_s24 + $0x10] sm:$0xff]   ;;  %v2908_v10 = vld [vmem:[%s3240_s22 + $0x28] sm:$0xff]   ;;  %s3754_s0 = sld [smem:[#allocation8_spill]]  ;;  %vm1708_vm10 = vcmask 1040384  }
  0x3e   : > { %2806 = vmatprep.subr.bf16.mxu0 %v3103_v2  ;;  %2840 = vmatprep.mubr.msk.bf16.mxu1 %vm3104_vm0, %v3103_v2  ;;  %v2914_v11 = vld [vmem:[%s3245_s24 + $0x18] sm:$0xff]   ;;  %v2909_v12 = vld [vmem:[%s3240_s22 + $0x30] sm:$0xff]   ;;  %v2915_v13 = vld [vmem:[%s3245_s24 + $0x20] sm:$0xff]  }
  0x3f   : > { %2825 = vmatpush3.bf16.msra.mxu1 %v2911_v5  ;;  %v2910_v14 = vld [vmem:[%s3240_s22 + $0x38] sm:$0xff]   ;;  %v2916_v16 = vld [vmem:[%s3245_s24 + $0x28] sm:$0xff]   ;;  %v2917_v18 = vld [vmem:[%s3245_s24 + $0x30] sm:$0xff]  }
  0x40   : > { %2826 = vmatprep.subr.bf16.mxu1 %v3103_v2  ;;  %v2918_v19 = vld [vmem:[%s3245_s24 + $0x38] sm:$0xff]   ;;  %s3751_s24 = sld [smem:[#allocation16_spill]]  ;;  %v2919_v35 = vld [vmem:[%s3273_s3] ss:$8 sps:$4 sm:$0xff]   ;;  %v2921_v36 = vld [vmem:[%s3273_s3 + $0x4] ss:$8 sps:$4 sm:$0xff]  }
  0x41   : > { %2807 = vmatpush3.bf16.msra.mxu0 %v2904_v3  ;;  %v925_v15 = vld [vmem:[#allocation2] sm:$0x3]  ;;  %s3750_s23 = scalar_lea.vmem %s3749_s1, %s3230_s26  ;;  %v2925_v38 = vld [vmem:[%s3273_s3 + $0x14] ss:$8 sps:$4 sm:$0xff]   ;;  %v2926_v39 = vld [vmem:[%s3263_s5 + $0x8] sm:$0xff]  }
  0x42   : > { %2808 = vmatprep.subr.bf16.mxu0 %v3103_v2  ;;  %v926_v17 = vpack.c.bf16 %v925_v15, %v925_v15  ;;  %v2626_v20 = vld [vmem:[%s3750_s23] ss:$0 sm:$0xff]  ;;  %v2923_v40 = vld [vmem:[%s3273_s3 + $0x10] ss:$8 sps:$4 sm:$0xff]   ;;  %v2929_v41 = vld [vmem:[%s3273_s3 + $0x24] ss:$8 sps:$4 sm:$0xff]  }
  0x43   : > { %2827 = vmatpush3.bf16.msra.mxu1 %v2912_v7  ;;  %v2922_v37 = vld [vmem:[%s3263_s5] sm:$0xff]   ;;  %v2930_v48 = vld [vmem:[%s3263_s5 + $0x10] sm:$0xff]   ;;  %v2934_v51 = vld [vmem:[%s3263_s5 + $0x18] sm:$0xff]   ;;  %s3756_s23 = sld [smem:[#allocation19_spill]] }
  0x44   : > { %2828 = vmatprep.subr.bf16.mxu1 %v3103_v2  ;;  %v2927_v42 = vld [vmem:[%s3273_s3 + $0x20] ss:$8 sps:$4 sm:$0xff]   ;;  %v2933_v49 = vld [vmem:[%s3273_s3 + $0x34] ss:$8 sps:$4 sm:$0xff]   ;;  %v2931_v50 = vld [vmem:[%s3273_s3 + $0x30] ss:$8 sps:$4 sm:$0xff]  }
  0x45   : > { %2809 = vmatpush3.bf16.msra.mxu0 %v2905_v4  ;;  %v2937_v52 = vld [vmem:[%s3273_s3 + $0x44] ss:$8 sps:$4 sm:$0xff]   ;;  %v2935_v53 = vld [vmem:[%s3273_s3 + $0x40] ss:$8 sps:$4 sm:$0xff]   ;;  %v2941_v55 = vld [vmem:[%s3273_s3 + $0x54] ss:$8 sps:$4 sm:$0xff]  }
  0x46   : > { %2810 = vmatprep.subr.bf16.mxu0 %v3103_v2  ;;  %s3752_s9 = scalar_lea.vmem %s3751_s24, %s3230_s26  ;;  %v2938_v54 = vld [vmem:[%s3263_s5 + $0x20] sm:$0xff]   ;;  %v2939_v56 = vld [vmem:[%s3273_s3 + $0x50] ss:$8 sps:$4 sm:$0xff]   ;;  %v2942_v57 = vld [vmem:[%s3263_s5 + $0x28] sm:$0xff]   ;;  %s3762_s24 = scalar_lea.vmem %s3702_s14, %s3230_s26 }
  0x47   : > { %2829 = vmatpush3.bf16.msra.mxu1 %v2913_v9  ;;  %v2635_v27 = vld [vmem:[%s3752_s9] ss:$0 sm:$0xff]  ;;  %v2945_v58 = vld [vmem:[%s3273_s3 + $0x64] ss:$8 sps:$4 sm:$0xff]   ;;  %v2946_v60 = vld [vmem:[%s3263_s5 + $0x30] sm:$0xff]  }
  0x48   : > { %2830 = vmatprep.subr.bf16.mxu1 %v3103_v2  ;;  %v2943_v59 = vld [vmem:[%s3273_s3 + $0x60] ss:$8 sps:$4 sm:$0xff]   ;;  %v2947_v61 = vld [vmem:[%s3273_s3 + $0x70] ss:$8 sps:$4 sm:$0xff]   ;;  %v2949_v62 = vld [vmem:[%s3273_s3 + $0x74] ss:$8 sps:$4 sm:$0xff]  }
  0x49   : > { %2811 = vmatpush3.bf16.msra.mxu0 %v2906_v6  ;;  %v2950_v63 = vld [vmem:[%s3263_s5 + $0x38] sm:$0xff]   ;;  %v1290_v1 = vld [vmem:[%s3753_s25] sm:$0xff]  ;;  %v1291_v3 = vld [vmem:[%s3753_s25 + $0x8] sm:$0xff]  ;;  %s3757_s27 = scalar_lea.vmem %s3756_s23, %s3230_s26  ;;  %s3763_s26 = sld [smem:[#allocation7_spill]] }
  0x4a   : > { %2812 = vmatprep.subr.bf16.mxu0 %v3103_v2  ;;  %v1292_v4 = vpack.c.bf16 %v1291_v3, %v1290_v1  ;;  %v2644_v9 = vld [vmem:[%s3754_s0] ss:$0 sm:$0xff] }
  0x4b   : > { %2831 = vmatpush3.bf16.msra.mxu1 %v2914_v11  ;;  %v2645_v11 = vld [vmem:[%s3754_s0 + $0x1] ss:$0 sm:$0xff] }
  0x4c   : > { %2832 = vmatprep.subr.bf16.mxu1 %v3103_v2 }
  0x4d   : > { %2813 = vmatpush3.bf16.msra.mxu0 %v2907_v8 }
  0x4e   : > { %2814 = vmatprep.subr.bf16.mxu0 %v3103_v2 }
  0x4f   : > { %2833 = vmatpush3.bf16.msra.mxu1 %v2915_v13  ;;  %p2717_p5 = scmp.ne.s32.totalorder %s3763_s26, 1 }
  0x50   : > { %2834 = vmatprep.subr.bf16.mxu1 %v3103_v2  ;;  %s3764_s9 = sld [smem:[#allocation11_spill]] (!%p2717_p5)  ;;  %s3765_s22 = sld [smem:[#allocation12_spill]] (!%p2717_p5) }
  0x51   : > { %2815 = vmatpush3.bf16.msra.mxu0 %v2908_v10 }
  0x52   : > { %2816 = vmatprep.subr.bf16.mxu0 %v3103_v2 }
  0x53   : > { %2835 = vmatpush3.bf16.msra.mxu1 %v2916_v16 }
  0x54   : > { %2836 = vmatprep.subr.bf16.mxu1 %v3103_v2 }
  0x55   : > { %2817 = vmatpush3.bf16.msra.mxu0 %v2909_v12 }
  0x56   : > { %2818 = vmatprep.subr.bf16.mxu0 %v3103_v2 }
  0x57   : > { %2837 = vmatpush3.bf16.msra.mxu1 %v2917_v18 }
  0x58   : > { %2838 = vmatprep.subr.bf16.mxu1 %v3103_v2 }
  0x59   : > { %2819 = vmatpush3.bf16.msra.mxu0 %v2910_v14 }
  0x5a   : > { %2844 = vmatprep.subr.bf16.mxu0 %v3103_v2 }
  0x5b   : > { %2839 = vmatpush3.bf16.msra.mxu1 %v2918_v19  ;;  %v1311_v19 = vlaneseq }
  0x5c   : > { %2821 = vmatmul.mubr.bf16.vlgmr.msra.gmra.mrb[0].mxu0 %v926_v17  ;;  %1401 = vmatprep.subr.bf16.mxu1 %v2921_v36 }
  0x5d   : > { %2860 = vmatprep.mubr.msk.bf16.mxu0 %vm3104_vm0, %v3103_v2  ;;  %2845 = vmatpush3.bf16.msra.mxu0 %v2922_v37 }
  0x5e   : > { %2846 = vmatprep.subr.bf16.mxu0 %v3103_v2 }
  0x61   : > { %2847 = vmatpush3.bf16.msra.mxu0 %v2926_v39 }
  0x62   : > { %2848 = vmatprep.subr.bf16.mxu0 %v3103_v2 }
  0x65   : > { %2849 = vmatpush3.bf16.msra.mxu0 %v2930_v48  ;;  %v2951_v48 = vld [vmem:[%s3282_s4] sm:$0xff]  }
  0x66   : > { %2850 = vmatprep.subr.bf16.mxu0 %v3103_v2 }
  0x69   : > { %2851 = vmatpush3.bf16.msra.mxu0 %v2934_v51  ;;  %v2954_v51 = vld [vmem:[%s3282_s4 + $0x18] sm:$0xff]  }
  0x6a   : > { %2852 = vmatprep.subr.bf16.mxu0 %v3103_v2 }
  0x6d   : > { %2853 = vmatpush3.bf16.msra.mxu0 %v2938_v54  ;;  %v2957_v54 = vld [vmem:[%s3282_s4 + $0x30] sm:$0xff]  }
  0x6e   : > { %2854 = vmatprep.subr.bf16.mxu0 %v3103_v2 }
  0x71   : > { %2855 = vmatpush3.bf16.msra.mxu0 %v2942_v57 }
  0x72   : > { %2856 = vmatprep.subr.bf16.mxu0 %v3103_v2 }
  0x75   : > { %2857 = vmatpush3.bf16.msra.mxu0 %v2946_v60 }
  0x76   : > { %2858 = vmatprep.subr.bf16.mxu0 %v3103_v2 }
  0x79   : > { %2859 = vmatpush3.bf16.msra.mxu0 %v2950_v63 }
  0x7a   : > { %2864 = vmatprep.subr.bf16.mxu0 %v3103_v2 }
 0x12f   : > { %v1032_v21 = vpop.f32.mrb[0].mxu0 }
 0x130   : > { %v1033_v22 = vadd.f32 %v2626_v20, %v1032_v21  ;;  %v2822_v23 = vpop.f32.mrb[1].mxu0  ;;  %v1312_v20 = vshrl.u32 %v1311_v19, 7 }
 0x131   : > { %v1035_v24 = vpop.f32.mrb[2].mxu0 }
 0x132   : > { %v1038_v25 = vpack.c.bf16 %v1033_v22, %v1033_v22  ;;  %v2823_v26 = vpop.f32.mrb[3].mxu0  ;;  %v3423_v21 = vsub.s32 0, %v1312_v20  ;;  %v3430_v22 = vld [vmem:[%s3755_s13] sm:$0x3] }
 0x133   : > { %v2646_v24 = vld [vmem:[%s3757_s27] ss:$0 sm:$0xff] }
 0x134   : > { %2841 = vmatmul.mubr.bf16.vlgmr.msra.gmra.mrb[0].mxu1 %v1038_v25  ;;  %v1314_v23 = vrot.slane %v3430_v22, %v3423_v21  ;;  %v3439_v25 = vand.u32 127, %v1311_v19 }
 0x135   : > { %1402 = vmatpush1.bf16.msra.mxu1 %v2919_v35  ;;  %1433 = vmatprep.mubr.bf16.mxu1 %v3105_v0 }
 0x136   : > { %1403 = vmatprep.subr.bf16.mxu1 %v2925_v38  ;;  %vm1447_vm2 = vcmp.lt.s32.totalorder %v3439_v25, 32  ;;  %vm1452_vm3 = vcmp.ge.s32.totalorder %v3439_v25, 64  ;;  %vm1453_vm4 = vcmp.lt.s32.totalorder %v3439_v25, 96  ;;  %vm1449_vm5 = vcmp.ge.s32.totalorder %v3439_v25, 32 }
 0x137   : > { %vm1450_vm6 = vcmp.lt.s32.totalorder %v3439_v25, 64  ;;  %vm3454_vm7 = vmand %vm1452_vm3, %vm1453_vm4  ;;  %vm1455_vm9 = vcmp.ge.s32.totalorder %v3439_v25, 96 }
 0x138   : > { %vm3458_vm8 = vmand %vm1449_vm5, %vm1450_vm6 }
 0x139   : > { %1404 = vmatpush1.bf16.msra.mxu1 %v2923_v40 }
 0x13a   : > { %1405 = vmatprep.subr.bf16.mxu1 %v2929_v41 }
 0x13d   : > { %1406 = vmatpush1.bf16.msra.mxu1 %v2927_v42 }
 0x13e   : > { %1407 = vmatprep.subr.bf16.mxu1 %v2933_v49  ;;  %v2952_v49 = vld [vmem:[%s3282_s4 + $0x8] sm:$0xff]  }
 0x141   : > { %1408 = vmatpush1.bf16.msra.mxu1 %v2931_v50  ;;  %v2953_v50 = vld [vmem:[%s3282_s4 + $0x10] sm:$0xff]  }
 0x142   : > { %1409 = vmatprep.subr.bf16.mxu1 %v2937_v52  ;;  %v2955_v52 = vld [vmem:[%s3282_s4 + $0x20] sm:$0xff]  }
 0x145   : > { %1410 = vmatpush1.bf16.msra.mxu1 %v2935_v53  ;;  %v2956_v53 = vld [vmem:[%s3282_s4 + $0x28] sm:$0xff]  }
 0x146   : > { %1411 = vmatprep.subr.bf16.mxu1 %v2941_v55  ;;  %v2958_v55 = vld [vmem:[%s3282_s4 + $0x38] sm:$0xff]  }
 0x149   : > { %1412 = vmatpush1.bf16.msra.mxu1 %v2939_v56 }
 0x14a   : > { %1413 = vmatprep.subr.bf16.mxu1 %v2945_v58 }
 0x14d   : > { %1414 = vmatpush1.bf16.msra.mxu1 %v2943_v59 }
 0x14e   : > { %1415 = vmatprep.subr.bf16.mxu1 %v2949_v62 }
 0x151   : > { %1416 = vmatpush1.bf16.msra.mxu1 %v2947_v61 }
 0x154   : > { %1434 = vmatmul.mubr.bf16.vlgmr.msra.gmra.mrb[4].mxu1 %v1292_v4 }
 0x155   : > { %1989 = vmatprep.mubr.bf16.mxu1 %v3105_v0 }
 0x207   : > { %v1144_v28 = vpop.f32.mrb[0].mxu1 }
 0x208   : > { %v1145_v29 = vadd.f32 %v2635_v27, %v1144_v28  ;;  %v2842_v30 = vpop.f32.mrb[1].mxu1 }
 0x209   : > { %v1147_v31 = vpop.f32.mrb[2].mxu1 }
 0x20a   : > { %v2843_v32 = vpop.f32.mrb[3].mxu1  ;;  %v1150_v33 = vadd.f32 %v1145_v29, %v925_v15  ;;  %v3441_v29 = vsub.s32 1, %v1312_v20 }
 0x20c   : > { %v1154_v34 = vsel %vm1153_vm1, %v1150_v33, 0.0 }
 0x20d   : > { %1155 = vadd.xlane.f32.xlu0 %v1154_v34 }
 0x227   : > { %v1435_v15 = vpop.f32.mrb[4].mxu1 }
 0x228   : > { %v3419_v16 = vpop.f32.mrb[5].mxu1  ;;  %v1436_v27 = vadd.f32 %v1435_v15, %v1314_v23 }
 0x229   : > { %v1439_v17 = vpop.f32.mrb[6].mxu1 }
 0x22a   : > { %v3421_v18 = vpop.f32.mrb[7].mxu1  ;;  %v1440_v31 = vadd.f32 %v1439_v17, %v1314_v23 }
 0x29a   : > { %v1156_v43 = vpop.xlane.xlu0 %1155 }
 0x29b   : > { %v1158_v44 = vmul.f32 0.0078125, %v1156_v43 }
 0x29d   : > { %v1159_v45 = vsub.f32 %v1150_v33, %v1158_v44 }
 0x29f   : > { %v1160_v46 = vmul.f32 %v1159_v45, %v1159_v45 }
 0x2a1   : > { %v1161_v47 = vsel %vm1153_vm1, %v1160_v46, 0.0 }
 0x2a2   : > { %1162 = vadd.xlane.f32.xlu0 %v1161_v47 }
 0x32f   : > { %v1163_v5 = vpop.xlane.xlu0 %1162 }
 0x330   : > { %v1164_v6 = vmul.f32 0.0078125, %v1163_v5 }
 0x332   : > { %v1165_v7 = vadd.f32 1e-05, %v1164_v6 }
 0x334   : > { %2999 = vrsqrt.f32 %v1165_v7 }
 0x33e   : > { %v3000_v8 = vpop.eup %2999 }
 0x33f   : > { %v1167_v10 = vmul.f32 %v3000_v8, %v1159_v45 }
 0x341   : > { %v1172_v12 = vmul.f32 %v2644_v9, %v1167_v10 }
 0x343   : > { %v3413_v13 = vadd.f32 %v2645_v11, %v1172_v12 }
 0x345   : > { %v1178_v14 = vpack.c.bf16 %v3413_v13, %v3413_v13 }
 0x347   : > { %2861 = vmatmul.mubr.bf16.vlgmr.msra.gmra.mrb[4].mxu0 %v1178_v14 }
 0x348   : > { %2880 = vmatprep.mubr.msk.bf16.mxu0 %vm3104_vm0, %v3103_v2  ;;  %2865 = vmatpush3.bf16.msra.mxu0 %v2951_v48 }
 0x349   : > { %2866 = vmatprep.subr.bf16.mxu0 %v3103_v2 }
 0x34c   : > { %2867 = vmatpush3.bf16.msra.mxu0 %v2952_v49 }
 0x34d   : > { %2868 = vmatprep.subr.bf16.mxu0 %v3103_v2 }
 0x350   : > { %2869 = vmatpush3.bf16.msra.mxu0 %v2953_v50 }
 0x351   : > { %2870 = vmatprep.subr.bf16.mxu0 %v3103_v2 }
 0x354   : > { %2871 = vmatpush3.bf16.msra.mxu0 %v2954_v51 }
 0x355   : > { %2872 = vmatprep.subr.bf16.mxu0 %v3103_v2 }
 0x358   : > { %2873 = vmatpush3.bf16.msra.mxu0 %v2955_v52 }
 0x359   : > { %2874 = vmatprep.subr.bf16.mxu0 %v3103_v2 }
 0x35c   : > { %2875 = vmatpush3.bf16.msra.mxu0 %v2956_v53 }
 0x35d   : > { %2876 = vmatprep.subr.bf16.mxu0 %v3103_v2 }
 0x360   : > { %2877 = vmatpush3.bf16.msra.mxu0 %v2957_v54 }
 0x361   : > { %2878 = vmatprep.subr.bf16.mxu0 %v3103_v2 }
 0x364   : > { %2879 = vmatpush3.bf16.msra.mxu0 %v2958_v55 }
 0x41a   : > { %v1284_v26 = vpop.f32.mrb[4].mxu0 }
 0x41b   : > { %v1285_v28 = vadd.f32 %v2646_v24, %v1284_v26  ;;  %v2862_v30 = vpop.f32.mrb[5].mxu0 }
 0x41c   : > { %v1287_v32 = vpop.f32.mrb[6].mxu0 }
 0x41d   : > { %v1461_v33 = vrot.slane %v1285_v28, %v3423_v21  ;;  %v1586_v34 = vrot.slane %v1285_v28, %v3441_v29  ;;  %v2863_v35 = vpop.f32.mrb[7].mxu0 }
 0x41f   : > { %v1462_v36 = vmul.f32 %v1461_v33, %v1436_v27  ;;  %v1587_v37 = vmul.f32 %v1586_v34, %v1440_v31 }
 0x421   : > { %v1588_v38 = vsel %vm1447_vm2, %v1587_v37, 0.0  ;;  %v1463_v39 = vsel %vm1447_vm2, %v1462_v36, 0.0  ;;  %v1523_v42 = vsel %vm3454_vm7, %v1462_v36, 0.0  ;;  %v1493_v43 = vsel %vm3458_vm8, %v1462_v36, 0.0 }
 0x422   : > { %1589 = vadd.xlane.f32.xlu0 %v1588_v38  ;;  %1464 = vadd.xlane.f32.xlu1 %v1463_v39  ;;  %v1553_v44 = vsel %vm1455_vm9, %v1462_v36, 0.0  ;;  %v1618_v45 = vsel %vm3458_vm8, %v1587_v37, 0.0  ;;  %v1648_v46 = vsel %vm3454_vm7, %v1587_v37, 0.0  ;;  %v1678_v47 = vsel %vm1455_vm9, %v1587_v37, 0.0 }
 0x426   : > { %1524 = vadd.xlane.f32.xlu0 %v1523_v42  ;;  %1494 = vadd.xlane.f32.xlu1 %v1493_v43 }
 0x42a   : > { %1554 = vadd.xlane.f32.xlu0 %v1553_v44  ;;  %1619 = vadd.xlane.f32.xlu1 %v1618_v45 }
 0x42e   : > { %1649 = vadd.xlane.f32.xlu1 %v1648_v46 }
 0x432   : > { %1679 = vadd.xlane.f32.xlu1 %v1678_v47 }
 0x4af   : > { %v1590_v56 = vpop.xlane.xlu0 %1589  ;;  %v1465_v57 = vpop.xlane.xlu1 %1464 }
 0x4b0   : > { %v1591_v58 = vmul.f32 0.17677669, %v1590_v56  ;;  %v1466_v59 = vmul.f32 0.17677669, %v1465_v57 }
 0x4b2   : > { %v1592_v60 = vrot.slane %v1591_v58, 4  ;;  %v1467_v61 = vrot.slane %v1466_v59, 4 }
 0x4b3   : > { %v1525_v62 = vpop.xlane.xlu0 %1524  ;;  %v1495_v63 = vpop.xlane.xlu1 %1494 }
 0x4b4   : > { %v1593_v0 = vmax.f32 %v1591_v58, %v1592_v60  ;;  %v1468_v1 = vmax.f32 %v1466_v59, %v1467_v61  ;;  %v1526_v3 = vmul.f32 0.17677669, %v1525_v62  ;;  %v1496_v4 = vmul.f32 0.17677669, %v1495_v63 }
 0x4b6   : > { %v1594_v5 = vrot.slane %v1593_v0, 2  ;;  %v1469_v6 = vrot.slane %v1468_v1, 2  ;;  %v1527_v7 = vrot.slane %v1526_v3, 4  ;;  %v1497_v8 = vrot.slane %v1496_v4, 4 }
 0x4b7   : > { %v1555_v9 = vpop.xlane.xlu0 %1554  ;;  %v1620_v10 = vpop.xlane.xlu1 %1619 }
 0x4b8   : > { %v1595_v2 = vmax.f32 %v1593_v0, %v1594_v5  ;;  %v1470_v11 = vmax.f32 %v1468_v1, %v1469_v6  ;;  %v1528_v12 = vmax.f32 %v1526_v3, %v1527_v7  ;;  %v1498_v14 = vmax.f32 %v1496_v4, %v1497_v8 }
 0x4b9   : > { %v1556_v15 = vmul.f32 0.17677669, %v1555_v9  ;;  %v1621_v17 = vmul.f32 0.17677669, %v1620_v10 }
 0x4ba   : > { %v1596_v19 = vrot.slane %v1595_v2, 1  ;;  %v1471_v20 = vrot.slane %v1470_v11, 1  ;;  %v1529_v23 = vrot.slane %v1528_v12, 2  ;;  %v1499_v24 = vrot.slane %v1498_v14, 2 }
 0x4bb   : > { %v1557_v26 = vrot.slane %v1556_v15, 4  ;;  %v1622_v27 = vrot.slane %v1621_v17, 4  ;;  %v1650_v28 = vpop.xlane.xlu1 %1649 }
 0x4bc   : > { %v1597_v30 = vmax.f32 %v1595_v2, %v1596_v19  ;;  %v1472_v31 = vmax.f32 %v1470_v11, %v1471_v20  ;;  %v1530_v32 = vmax.f32 %v1528_v12, %v1529_v23  ;;  %v1500_v33 = vmax.f32 %v1498_v14, %v1499_v24 }
 0x4bd   : > { %v1558_v34 = vmax.f32 %v1556_v15, %v1557_v26  ;;  %v1623_v35 = vmax.f32 %v1621_v17, %v1622_v27  ;;  %v1651_v36 = vmul.f32 0.17677669, %v1650_v28 }
 0x4be   : > { %v1598_v37 = vsub.f32 %v1591_v58, %v1597_v30  ;;  %v1473_v38 = vsub.f32 %v1466_v59, %v1472_v31  ;;  %v1531_v39 = vrot.slane %v1530_v32, 1  ;;  %v1501_v42 = vrot.slane %v1500_v33, 1 }
 0x4bf   : > { %v1559_v43 = vrot.slane %v1558_v34, 2  ;;  %v1624_v44 = vrot.slane %v1623_v35, 2  ;;  %v1652_v45 = vrot.slane %v1651_v36, 4  ;;  %v1680_v46 = vpop.xlane.xlu1 %1679 }
 0x4c0   : > { %v1599_v47 = vmul.f32 1.442695, %v1598_v37  ;;  %v1474_v48 = vmul.f32 1.442695, %v1473_v38  ;;  %v1532_v49 = vmax.f32 %v1530_v32, %v1531_v39  ;;  %v1502_v50 = vmax.f32 %v1500_v33, %v1501_v42 }
 0x4c1   : > { %v1560_v51 = vmax.f32 %v1558_v34, %v1559_v43  ;;  %v1625_v52 = vmax.f32 %v1623_v35, %v1624_v44  ;;  %v1653_v53 = vmax.f32 %v1651_v36, %v1652_v45  ;;  %v1681_v54 = vmul.f32 0.17677669, %v1680_v46 }
 0x4c2   : > { %3001 = vpow2.f32 %v1599_v47  ;;  %v1533_v55 = vsub.f32 %v1526_v3, %v1532_v49  ;;  %v1503_v56 = vsub.f32 %v1496_v4, %v1502_v50 }
 0x4c3   : > { %3003 = vpow2.f32 %v1474_v48  ;;  %v1561_v57 = vrot.slane %v1560_v51, 1  ;;  %v1626_v58 = vrot.slane %v1625_v52, 1  ;;  %v1654_v59 = vrot.slane %v1653_v53, 2 }
 0x4c4   : > { %v1534_v60 = vmul.f32 1.442695, %v1533_v55  ;;  %v1504_v61 = vmul.f32 1.442695, %v1503_v56  ;;  %v1682_v62 = vrot.slane %v1681_v54, 4 }
 0x4c5   : > { %v1562_v63 = vmax.f32 %v1560_v51, %v1561_v57  ;;  %v1627_v0 = vmax.f32 %v1625_v52, %v1626_v58  ;;  %v1655_v1 = vmax.f32 %v1653_v53, %v1654_v59 }
 0x4c6   : > { %3005 = vpow2.f32 %v1534_v60  ;;  %v1683_v5 = vmax.f32 %v1681_v54, %v1682_v62 }
 0x4c7   : > { %3007 = vpow2.f32 %v1504_v61  ;;  %v1563_v6 = vsub.f32 %v1556_v15, %v1562_v63  ;;  %v1628_v7 = vsub.f32 %v1621_v17, %v1627_v0  ;;  %v1656_v8 = vrot.slane %v1655_v1, 1 }
 0x4c8   : > { %v1684_v9 = vrot.slane %v1683_v5, 2 }
 0x4c9   : > { %v1564_v10 = vmul.f32 1.442695, %v1563_v6  ;;  %v1629_v3 = vmul.f32 1.442695, %v1628_v7  ;;  %v1657_v4 = vmax.f32 %v1655_v1, %v1656_v8 }
 0x4ca   : > { %v1685_v2 = vmax.f32 %v1683_v5, %v1684_v9 }
 0x4cb   : > { %3009 = vpow2.f32 %v1564_v10  ;;  %v1658_v11 = vsub.f32 %v1651_v36, %v1657_v4 }
 0x4cc   : > { %v3490_v12 = vpop.eup %3001  ;;  %3011 = vpow2.f32 %v1629_v3  ;;  %v1686_v14 = vrot.slane %v1685_v2, 1  ;;  %v1318_v3 = vrot.slane %v3430_v22, %v3441_v29 }
 0x4cd   : > { %v3492_v19 = vpop.eup %3003  ;;  %v1601_v20 = vrot.slane %v3490_v12, 4  ;;  %v1659_v23 = vmul.f32 1.442695, %v1658_v11 }
 0x4ce   : > { %v1476_v15 = vrot.slane %v3492_v19, 4  ;;  %v1687_v17 = vmax.f32 %v1685_v2, %v1686_v14 }
 0x4cf   : > { %v1602_v24 = vadd.f32 %v3490_v12, %v1601_v20  ;;  %3013 = vpow2.f32 %v1659_v23 }
 0x4d0   : > { %v3497_v26 = vpop.eup %3005  ;;  %v1477_v27 = vadd.f32 %v3492_v19, %v1476_v15  ;;  %v1688_v28 = vsub.f32 %v1681_v54, %v1687_v17 }
 0x4d1   : > { %v3500_v30 = vpop.eup %3007  ;;  %v1603_v31 = vrot.slane %v1602_v24, 2  ;;  %v1536_v32 = vrot.slane %v3497_v26, 4 }
 0x4d2   : > { %v1478_v33 = vrot.slane %v1477_v27, 2  ;;  %v1506_v34 = vrot.slane %v3500_v30, 4  ;;  %v1689_v35 = vmul.f32 1.442695, %v1688_v28 }
 0x4d3   : > { %v1604_v36 = vadd.f32 %v1603_v31, %v1602_v24  ;;  %v1537_v37 = vadd.f32 %v3497_v26, %v1536_v32  ;;  %v1442_v24 = vadd.f32 %v3421_v18, %v1318_v3  ;;  %v1438_v31 = vadd.f32 %v3419_v16, %v1318_v3 }
 0x4d4   : > { %v1479_v38 = vadd.f32 %v1478_v33, %v1477_v27  ;;  %v1507_v39 = vadd.f32 %v3500_v30, %v1506_v34  ;;  %3015 = vpow2.f32 %v1689_v35 }
 0x4d5   : > { %v3506_v42 = vpop.eup %3009  ;;  %v1605_v43 = vrot.slane %v1604_v36, 1  ;;  %v1538_v44 = vrot.slane %v1537_v37, 2 }
 0x4d6   : > { %v3508_v45 = vpop.eup %3011  ;;  %v1480_v46 = vrot.slane %v1479_v38, 1  ;;  %v1508_v47 = vrot.slane %v1507_v39, 2  ;;  %v1566_v48 = vrot.slane %v3506_v42, 4 }
 0x4d7   : > { %v1606_v49 = vadd.f32 %v1605_v43, %v1604_v36  ;;  %v1539_v50 = vadd.f32 %v1538_v44, %v1537_v37  ;;  %v1631_v51 = vrot.slane %v3508_v45, 4 }
 0x4d8   : > { %v1481_v52 = vadd.f32 %v1480_v46, %v1479_v38  ;;  %v1509_v53 = vadd.f32 %v1508_v47, %v1507_v39  ;;  %v1567_v54 = vadd.f32 %v3506_v42, %v1566_v48 }
 0x4d9   : > { %v3513_v55 = vpop.eup %3013  ;;  %3017 = vrcp.f32 %v1606_v49  ;;  %v1540_v56 = vrot.slane %v1539_v50, 1  ;;  %v1632_v57 = vadd.f32 %v3508_v45, %v1631_v51 }
 0x4da   : > { %3019 = vrcp.f32 %v1481_v52  ;;  %v1510_v58 = vrot.slane %v1509_v53, 1  ;;  %v1568_v59 = vrot.slane %v1567_v54, 2  ;;  %v1661_v60 = vrot.slane %v3513_v55, 4 }
 0x4db   : > { %v1541_v61 = vadd.f32 %v1540_v56, %v1539_v50  ;;  %v1633_v62 = vrot.slane %v1632_v57, 2 }
 0x4dc   : > { %v1511_v63 = vadd.f32 %v1510_v58, %v1509_v53  ;;  %v1569_v0 = vadd.f32 %v1568_v59, %v1567_v54  ;;  %v1662_v1 = vadd.f32 %v3513_v55, %v1661_v60 }
 0x4dd   : > { %3021 = vrcp.f32 %v1541_v61  ;;  %v1634_v5 = vadd.f32 %v1633_v62, %v1632_v57 }
 0x4de   : > { %v3518_v6 = vpop.eup %3015  ;;  %3023 = vrcp.f32 %v1511_v63  ;;  %v1570_v7 = vrot.slane %v1569_v0, 1  ;;  %v1663_v8 = vrot.slane %v1662_v1, 2 }
 0x4df   : > { %v1635_v9 = vrot.slane %v1634_v5, 1  ;;  %v1691_v10 = vrot.slane %v3518_v6, 4 }
 0x4e0   : > { %v1664_v4 = vadd.f32 %v1663_v8, %v1662_v1  ;;  %v1571_v2 = vadd.f32 %v1570_v7, %v1569_v0 }
 0x4e1   : > { %v1636_v11 = vadd.f32 %v1635_v9, %v1634_v5  ;;  %v1692_v14 = vadd.f32 %v3518_v6, %v1691_v10 }
 0x4e2   : > { %v1665_v20 = vrot.slane %v1664_v4, 1  ;;  %3025 = vrcp.f32 %v1571_v2 }
 0x4e3   : > { %v3018_v23 = vpop.eup %3017  ;;  %3027 = vrcp.f32 %v1636_v11  ;;  %v1693_v15 = vrot.slane %v1692_v14, 2 }
 0x4e4   : > { %v3020_v17 = vpop.eup %3019  ;;  %v1666_v27 = vadd.f32 %v1665_v20, %v1664_v4  ;;  %v1608_v28 = vmul.f32 %v3018_v23, %v3490_v12 }
 0x4e5   : > { %v1694_v32 = vadd.f32 %v1693_v15, %v1692_v14  ;;  %v1483_v22 = vmul.f32 %v3020_v17, %v3492_v19 }
 0x4e6   : > { %3029 = vrcp.f32 %v1666_v27  ;;  %v1609_v33 = vmul.f32 %v1608_v28, %v1442_v24 }
 0x4e7   : > { %v3022_v34 = vpop.eup %3021  ;;  %v1695_v35 = vrot.slane %v1694_v32, 1  ;;  %v1484_v36 = vmul.f32 %v1483_v22, %v1438_v31 }
 0x4e8   : > { %v3024_v37 = vpop.eup %3023  ;;  %v1543_v38 = vmul.f32 %v3022_v34, %v3497_v26  ;;  %v1610_v18 = vrot.slane %v1609_v33, 4 }
 0x4e9   : > { %v1485_v39 = vrot.slane %v1484_v36, 4  ;;  %v1513_v43 = vmul.f32 %v3024_v37, %v3500_v30  ;;  %v1696_v44 = vadd.f32 %v1695_v35, %v1694_v32 }
 0x4ea   : > { %v1544_v46 = vmul.f32 %v1543_v38, %v1438_v31  ;;  %v1611_v51 = vadd.f32 %v1610_v18, %v1609_v33 }
 0x4eb   : > { %v1486_v12 = vadd.f32 %v1485_v39, %v1484_v36  ;;  %v1514_v47 = vmul.f32 %v1513_v43, %v1438_v31  ;;  %3031 = vrcp.f32 %v1696_v44 }
 0x4ec   : > { %v3026_v16 = vpop.eup %3025  ;;  %v1545_v48 = vrot.slane %v1544_v46, 4  ;;  %v1612_v60 = vrot.slane %v1611_v51, 2 }
 0x4ed   : > { %v3028_v19 = vpop.eup %3027  ;;  %v1515_v49 = vrot.slane %v1514_v47, 4  ;;  %v1573_v50 = vmul.f32 %v3026_v16, %v3506_v42  ;;  %v1487_v52 = vrot.slane %v1486_v12, 2 }
 0x4ee   : > { %v1546_v53 = vadd.f32 %v1545_v48, %v1544_v46  ;;  %v1638_v26 = vmul.f32 %v3028_v19, %v3508_v45  ;;  %v1613_v45 = vadd.f32 %v1612_v60, %v1611_v51 }
 0x4ef   : > { %v1516_v54 = vadd.f32 %v1515_v49, %v1514_v47  ;;  %v1574_v56 = vmul.f32 %v1573_v50, %v1438_v31  ;;  %v1488_v62 = vadd.f32 %v1487_v52, %v1486_v12 }
 0x4f0   : > { %v3030_v30 = vpop.eup %3029  ;;  %v1639_v57 = vmul.f32 %v1638_v26, %v1442_v24  ;;  %v1547_v63 = vrot.slane %v1546_v53, 2  ;;  %v1614_v27 = vrot.slane %v1613_v45, 1 }
 0x4f1   : > { %v1517_v58 = vrot.slane %v1516_v54, 2  ;;  %v1575_v59 = vrot.slane %v1574_v56, 4  ;;  %v1668_v61 = vmul.f32 %v3030_v30, %v3513_v55  ;;  %v1489_v4 = vrot.slane %v1488_v62, 1 }
 0x4f2   : > { %v1640_v0 = vrot.slane %v1639_v57, 4  ;;  %v1548_v2 = vadd.f32 %v1547_v63, %v1546_v53  ;;  %v1615_v18 = vadd.f32 %v1614_v27, %v1613_v45  ;;  %v2982_v27 = vld [vmem:[%s3297_s11 + $0x74] ss:$8 sps:$4 sm:$0xff]  }
 0x4f3   : > { %v1518_v1 = vadd.f32 %v1517_v58, %v1516_v54  ;;  %v1576_v5 = vadd.f32 %v1575_v59, %v1574_v56  ;;  %v1669_v42 = vmul.f32 %v1668_v61, %v1442_v24  ;;  %v1490_v31 = vadd.f32 %v1489_v4, %v1488_v62  ;;  %v2671_v58 = vld [vmem:[%s3762_s24] ss:$0 sm:$0xff] }
 0x4f4   : > { %v1641_v7 = vadd.f32 %v1640_v0, %v1639_v57  ;;  %v1549_v32 = vrot.slane %v1548_v2, 1  ;;  %v1616_v19 = vsel %vm1447_vm2, %v1615_v18, 0.0 }
 0x4f5   : > { %v3032_v8 = vpop.eup %3031  ;;  %v1519_v9 = vrot.slane %v1518_v1, 1  ;;  %v1577_v10 = vrot.slane %v1576_v5, 2  ;;  %v1670_v3 = vrot.slane %v1669_v42, 4 }
 0x4f6   : > { %v1642_v11 = vrot.slane %v1641_v7, 2  ;;  %v1698_v14 = vmul.f32 %v3032_v8, %v3518_v6  ;;  %v1491_v6 = vsel %vm1447_vm2, %v1490_v31, 0.0  ;;  %v1550_v43 = vadd.f32 %v1549_v32, %v1548_v2  ;;  %v2967_v8 = vld [vmem:[%s3297_s11 + $0x24] ss:$8 sps:$4 sm:$0xff]   ;;  %v2970_v2 = vld [vmem:[%s3297_s11 + $0x34] ss:$8 sps:$4 sm:$0xff]  }
 0x4f7   : > { %v1671_v20 = vadd.f32 %v1670_v3, %v1669_v42  ;;  %v1520_v23 = vadd.f32 %v1519_v9, %v1518_v1  ;;  %v1578_v55 = vadd.f32 %v1577_v10, %v1576_v5  ;;  %v2959_v1 = vld [vmem:[%s3297_s11] ss:$8 sps:$4 sm:$0xff]   ;;  %v2961_v5 = vld [vmem:[%s3297_s11 + $0x4] ss:$8 sps:$4 sm:$0xff]   ;;  %v2964_v42 = vld [vmem:[%s3297_s11 + $0x14] ss:$8 sps:$4 sm:$0xff]  }
 0x4f8   : > { %v1643_v15 = vadd.f32 %v1642_v11, %v1641_v7  ;;  %v1699_v17 = vmul.f32 %v1698_v14, %v1442_v24  ;;  %v1551_v48 = vsel %vm3454_vm7, %v1550_v43, 0.0  ;;  %1957 = vmatprep.subr.bf16.mxu1 %v2961_v5  ;;  %v2962_v7 = vld [vmem:[%s3297_s11 + $0x10] ss:$8 sps:$4 sm:$0xff]   ;;  %v2965_v9 = vld [vmem:[%s3297_s11 + $0x20] ss:$8 sps:$4 sm:$0xff]  }
 0x4f9   : > { %v1672_v28 = vrot.slane %v1671_v20, 2  ;;  %v1521_v35 = vsel %vm3458_vm8, %v1520_v23, 0.0  ;;  %v1579_v36 = vrot.slane %v1578_v55, 1  ;;  %1958 = vmatpush1.bf16.msra.mxu1 %v2959_v1  ;;  %v2968_v11 = vld [vmem:[%s3297_s11 + $0x30] ss:$8 sps:$4 sm:$0xff]   ;;  %v2983_v31 = vld [vmem:[%s3306_s8 + $0x40] sm:$0xff]  }
 0x4fa   : > { %v1644_v22 = vrot.slane %v1643_v15, 1  ;;  %v1700_v33 = vrot.slane %v1699_v17, 4  ;;  %v1522_v44 = vadd.f32 %v1521_v35, %v1491_v6  ;;  %1959 = vmatprep.subr.bf16.mxu1 %v2964_v42  ;;  %v2973_v14 = vld [vmem:[%s3297_s11 + $0x44] ss:$8 sps:$4 sm:$0xff]   ;;  %v2976_v23 = vld [vmem:[%s3297_s11 + $0x54] ss:$8 sps:$4 sm:$0xff]   ;;  %2782 = vmatprep.subr.bf16.mxu0 %v2983_v31 }
 0x4fb   : > { %v1673_v34 = vadd.f32 %v1672_v28, %v1671_v20  ;;  %v1580_v12 = vadd.f32 %v1579_v36, %v1578_v55  ;;  %v2971_v20 = vld [vmem:[%s3297_s11 + $0x40] ss:$8 sps:$4 sm:$0xff]   ;;  %v2974_v55 = vld [vmem:[%s3297_s11 + $0x50] ss:$8 sps:$4 sm:$0xff]  }
 0x4fc   : > { %v1645_v37 = vadd.f32 %v1644_v22, %v1643_v15  ;;  %v1701_v38 = vadd.f32 %v1700_v33, %v1699_v17  ;;  %v1552_v51 = vadd.f32 %v1551_v48, %v1522_v44  ;;  %v2979_v15 = vld [vmem:[%s3297_s11 + $0x64] ss:$8 sps:$4 sm:$0xff]   ;;  %v2977_v17 = vld [vmem:[%s3297_s11 + $0x60] ss:$8 sps:$4 sm:$0xff]   ;;  %v2980_v28 = vld [vmem:[%s3297_s11 + $0x70] ss:$8 sps:$4 sm:$0xff]  }
 0x4fd   : > { %v1674_v39 = vrot.slane %v1673_v34, 1  ;;  %v1581_v53 = vsel %vm1455_vm9, %v1580_v12, 0.0  ;;  %1960 = vmatpush1.bf16.msra.mxu1 %v2962_v7  ;;  %v2984_v32 = vld [vmem:[%s3306_s8] sm:$0xff]   ;;  %v2985_v22 = vld [vmem:[%s3306_s8 + $0x48] sm:$0xff]   ;;  %v2987_v44 = vld [vmem:[%s3306_s8 + $0x50] sm:$0xff]  }
 0x4fe   : > { %v1702_v24 = vrot.slane %v1701_v38, 2  ;;  %v1646_v47 = vsel %vm3458_vm8, %v1645_v37, 0.0  ;;  %v1582_v56 = vadd.f32 %v1581_v53, %v1552_v51  ;;  %1961 = vmatprep.subr.bf16.mxu1 %v2967_v8  ;;  %v2986_v33 = vld [vmem:[%s3306_s8 + $0x8] sm:$0xff]   ;;  %v2681_v6 = vld [vmem:[%s3292_s10 + $0x1] ss:$0 sm:$0xff]  ;;  %v2989_v12 = vld [vmem:[%s3306_s8 + $0x58] sm:$0xff]  }
 0x4ff   : > { %v1675_v46 = vadd.f32 %v1674_v39, %v1673_v34  ;;  %v1647_v52 = vadd.f32 %v1646_v47, %v1616_v19  ;;  %v2990_v47 = vld [vmem:[%s3306_s8 + $0x18] sm:$0xff]   ;;  %v2992_v48 = vld [vmem:[%s3306_s8 + $0x20] sm:$0xff]   ;;  %v2993_v19 = vld [vmem:[%s3306_s8 + $0x68] sm:$0xff]  }
 0x500   : > { %v1703_v16 = vadd.f32 %v1702_v24, %v1701_v38  ;;  %v2680_v38 = vld [vmem:[%s3292_s10] ss:$0 sm:$0xff]  ;;  %v2996_v51 = vld [vmem:[%s3306_s8 + $0x30] sm:$0xff]   ;;  %v2998_v53 = vld [vmem:[%s3306_s8 + $0x38] sm:$0xff]  }
 0x501   : > { %v1676_v49 = vsel %vm3454_vm7, %v1675_v46, 0.0  ;;  %1962 = vmatpush1.bf16.msra.mxu1 %v2965_v9  ;;  %v2988_v46 = vld [vmem:[%s3306_s8 + $0x10] sm:$0xff]  }
 0x502   : > { %v1704_v50 = vrot.slane %v1703_v16, 1  ;;  %v1677_v41 = vadd.f32 %v1676_v49, %v1647_v52  ;;  %1963 = vmatprep.subr.bf16.mxu1 %v2970_v2  ;;  %v2994_v49 = vld [vmem:[%s3306_s8 + $0x28] sm:$0xff]   ;;  %v2997_v52 = vld [vmem:[%s3306_s8 + $0x78] sm:$0xff]  }
 0x504   : > { %v1705_v26 = vadd.f32 %v1704_v50, %v1703_v16  ;;  %v2991_v16 = vld [vmem:[%s3306_s8 + $0x60] sm:$0xff]   ;;  %v2995_v50 = vld [vmem:[%s3306_s8 + $0x70] sm:$0xff]  }
 0x505   : > { %1964 = vmatpush1.bf16.msra.mxu1 %v2968_v11 }
 0x506   : > { %v1706_v54 = vsel %vm1455_vm9, %v1705_v26, 0.0  ;;  %1965 = vmatprep.subr.bf16.mxu1 %v2973_v14  ;;  %v1865_v26 = vld [vmem:[%s905_s7] sm:$0x3] }
 0x507   : > { %v1707_v30 = vadd.f32 %v1706_v54, %v1677_v41  ;;  %v1870_v41 = vrot.slane %v1865_v26, %v3423_v21  ;;  %v1874_v54 = vrot.slane %v1865_v26, %v3441_v29  ;;  %v2234_v26 = vld [vmem:[%s3765_s22] sm:$0x3] (!%p2717_p5) }
 0x509   : > { %v1709_v57 = vsel %vm1708_vm10, %v1582_v56, %v1707_v30  ;;  %1966 = vmatpush1.bf16.msra.mxu1 %v2971_v20 }
 0x50a   : > { %v1710_v40 = vpack.c.bf16 %v1709_v57, %v1709_v57  ;;  %1967 = vmatprep.subr.bf16.mxu1 %v2976_v23 }
 0x50c   : > { %2881 = vmatmul.mubr.bf16.vlgmr.msra.gmra.mrb[8].mxu0 %v1710_v40 }
 0x50d   : > { %1968 = vmatpush1.bf16.msra.mxu1 %v2974_v55  ;;  %2783 = vmatpush3.bf16.msra.mxu0 %v2984_v32 }
 0x50e   : > { %1969 = vmatprep.subr.bf16.mxu1 %v2979_v15  ;;  %2784 = vmatprep.subr.bf16.mxu0 %v2985_v22 }
 0x511   : > { %1970 = vmatpush1.bf16.msra.mxu1 %v2977_v17  ;;  %2785 = vmatpush3.bf16.msra.mxu0 %v2986_v33  ;;  %v2715_v33 = vld [vmem:[%s3316_s15] ss:$0 sm:$0xff] }
 0x512   : > { %1971 = vmatprep.subr.bf16.mxu1 %v2982_v27  ;;  %2786 = vmatprep.subr.bf16.mxu0 %v2987_v44  ;;  %v3049_v44 = vld [vmem:[%s3764_s9 + $0x20] ss:$8 sps:$4 sm:$0xff] (!%p2717_p5)  }
 0x515   : > { %1972 = vmatpush1.bf16.msra.mxu1 %v2980_v28  ;;  %2787 = vmatpush3.bf16.msra.mxu0 %v2988_v46  ;;  %v3050_v46 = vld [vmem:[%s3764_s9 + $0x34] ss:$8 sps:$4 sm:$0xff] (!%p2717_p5)  }
 0x516   : > { %2788 = vmatprep.subr.bf16.mxu0 %v2989_v12  ;;  %v3052_v12 = vld [vmem:[%s3764_s9 + $0x30] ss:$8 sps:$4 sm:$0xff] (!%p2717_p5)  }
 0x519   : > { %2789 = vmatpush3.bf16.msra.mxu0 %v2990_v47  ;;  %v3053_v47 = vld [vmem:[%s3764_s9 + $0x44] ss:$8 sps:$4 sm:$0xff] (!%p2717_p5)  }
 0x51a   : > { %2790 = vmatprep.subr.bf16.mxu0 %v2991_v16  ;;  %v3055_v16 = vld [vmem:[%s3764_s9 + $0x40] ss:$8 sps:$4 sm:$0xff] (!%p2717_p5)  }
 0x51d   : > { %2791 = vmatpush3.bf16.msra.mxu0 %v2992_v48  ;;  %v3056_v48 = vld [vmem:[%s3764_s9 + $0x54] ss:$8 sps:$4 sm:$0xff] (!%p2717_p5)  }
 0x51e   : > { %2792 = vmatprep.subr.bf16.mxu0 %v2993_v19  ;;  %v3058_v19 = vld [vmem:[%s3764_s9 + $0x50] ss:$8 sps:$4 sm:$0xff] (!%p2717_p5)  }
 0x521   : > { %2793 = vmatpush3.bf16.msra.mxu0 %v2994_v49  ;;  %v3059_v49 = vld [vmem:[%s3764_s9 + $0x64] ss:$8 sps:$4 sm:$0xff] (!%p2717_p5)  }
 0x522   : > { %2794 = vmatprep.subr.bf16.mxu0 %v2995_v50  ;;  %v3061_v50 = vld [vmem:[%s3764_s9 + $0x60] ss:$8 sps:$4 sm:$0xff] (!%p2717_p5)  }
 0x525   : > { %2795 = vmatpush3.bf16.msra.mxu0 %v2996_v51  ;;  %v3062_v51 = vld [vmem:[%s3764_s9 + $0x74] ss:$8 sps:$4 sm:$0xff] (!%p2717_p5)  }
 0x526   : > { %2796 = vmatprep.subr.bf16.mxu0 %v2997_v52  ;;  %v3064_v52 = vld [vmem:[%s3764_s9 + $0x70] ss:$8 sps:$4 sm:$0xff] (!%p2717_p5)  }
 0x529   : > { %2797 = vmatpush3.bf16.msra.mxu0 %v2998_v53 }
 0x5df   : > { %v1816_v59 = vpop.f32.mrb[8].mxu0 }
 0x5e0   : > { %v1817_v60 = vadd.f32 %v2671_v58, %v1816_v59  ;;  %v2882_v25 = vpop.f32.mrb[9].mxu0 }
 0x5e1   : > { %v1819_v61 = vpop.f32.mrb[10].mxu0 }
 0x5e2   : > { %v2883_v62 = vpop.f32.mrb[11].mxu0  ;;  %v1822_v63 = vadd.f32 %v1817_v60, %v3413_v13 }
 0x5e4   : > { %v1825_v0 = vsel %vm1153_vm1, %v1822_v63, 0.0 }
 0x5e5   : > { %1826 = vadd.xlane.f32.xlu0 %v1825_v0 }
 0x672   : > { %v1827_v13 = vpop.xlane.xlu0 %1826 }
 0x673   : > { %v1828_v10 = vmul.f32 0.0078125, %v1827_v13 }
 0x675   : > { %v1829_v45 = vsub.f32 %v1822_v63, %v1828_v10  ;;  %v2698_v10 = vld [vmem:[%s913_s2] ss:$0 sm:$0xff] }
 0x677   : > { %v1830_v3 = vmul.f32 %v1829_v45, %v1829_v45 }
 0x679   : > { %v1831_v4 = vsel %vm1153_vm1, %v1830_v3, 0.0 }
 0x67a   : > { %1832 = vadd.xlane.f32.xlu1 %v1831_v4 }
 0x707   : > { %v1833_v34 = vpop.xlane.xlu1 %1832 }
 0x708   : > { %v1834_v35 = vmul.f32 0.0078125, %v1833_v34 }
 0x70a   : > { %v1835_v36 = vadd.f32 1e-05, %v1834_v35  ;;  %v2716_v35 = vld [vmem:[%s3316_s15 + $0x1] ss:$0 sm:$0xff] }
 0x70c   : > { %3033 = vrsqrt.f32 %v1835_v36 }
 0x716   : > { %v3034_v37 = vpop.eup %3033 }
 0x717   : > { %v1837_v39 = vmul.f32 %v3034_v37, %v1829_v45 }
 0x719   : > { %v1842_v43 = vmul.f32 %v2680_v38, %v1837_v39  ;;  %v3041_v38 = vld [vmem:[%s3764_s9 + $0x4] ss:$8 sps:$4 sm:$0xff] (!%p2717_p5)   ;;  %v3043_v39 = vld [vmem:[%s3764_s9] ss:$8 sps:$4 sm:$0xff] (!%p2717_p5)  }
 0x71a   : > { %2326 = vmatprep.subr.bf16.mxu0 (!%p2717_p5), %v3041_v38 }
 0x71b   : > { %v1847_v18 = vadd.f32 %v2681_v6, %v1842_v43  ;;  %v3106_v6 = vmov (!%p2717_p5), 0   ;;  %v3044_v43 = vld [vmem:[%s3764_s9 + $0x14] ss:$8 sps:$4 sm:$0xff] (!%p2717_p5)  }
 0x71d   : > { %v1848_v24 = vpack.c.bf16 %v1847_v18, %v1847_v18 }
 0x71f   : > { %1990 = vmatmul.mubr.bf16.vlgmr.msra.gmra.mrb[8].mxu1 %v1848_v24  ;;  %v3047_v24 = vld [vmem:[%s3764_s9 + $0x24] ss:$8 sps:$4 sm:$0xff] (!%p2717_p5)  }
 0x7f2   : > { %v1991_v56 = vpop.f32.mrb[8].mxu1 }
 0x7f3   : > { %v1992_v30 = vadd.f32 %v1991_v56, %v1870_v41  ;;  %v1993_v57 = vpop.f32.mrb[9].mxu1  ;;  %v2239_v41 = vrot.slane (!%p2717_p5), %v2234_v26, %v3423_v21 }
 0x7f4   : > { %v1994_v40 = vadd.f32 %v1993_v57, %v1874_v54  ;;  %v1995_v58 = vpop.f32.mrb[10].mxu1  ;;  %v2243_v54 = vrot.slane (!%p2717_p5), %v2234_v26, %v3441_v29 }
 0x7f5   : > { %v2001_v59 = vmul.f32 0.70710677, %v1992_v30  ;;  %v1996_v60 = vpop.f32.mrb[11].mxu1  ;;  %v1998_v63 = vmul.f32 0.5, %v1992_v30 }
 0x7f6   : > { %v2002_v25 = vmul.f32 0.70710677, %v1994_v40  ;;  %v1999_v1 = vmul.f32 0.5, %v1994_v40 }
 0x7f7   : > { %3035 = verf.f32 %v2001_v59 }
 0x7f8   : > { %3037 = verf.f32 %v2002_v25 }
 0x801   : > { %v3036_v61 = vpop.eup %3035 }
 0x802   : > { %v3038_v62 = vpop.eup %3037  ;;  %v2005_v0 = vadd.f32 1.0, %v3036_v61 }
 0x803   : > { %v2006_v5 = vadd.f32 1.0, %v3038_v62 }
 0x804   : > { %v2007_v42 = vmul.f32 %v2005_v0, %v1998_v63 }
 0x805   : > { %v2008_v7 = vmul.f32 %v2006_v5, %v1999_v1 }
 0x806   : > { %v2009_v9 = vpack.c.bf16 %v2007_v42, %v2007_v42 }
 0x807   : > { %v2010_v8 = vpack.c.bf16 %v2008_v7, %v2008_v7 }
 0x809   : > { %2178 = vmatprep.mubr.bf16.mxu0 %v2010_v8 }
 0x80a   : > { %2179 = vmatmul.mubr.bf16.vlgmr.msra.gmra.mrb[12].mxu0 %v2009_v9 }
 0x80b   : > { %2358 = vmatprep.mubr.bf16.mxu0 (!%p2717_p5), %v3106_v6  ;;  %2327 = vmatpush1.bf16.msra.mxu0 (!%p2717_p5), %v3043_v39 }
 0x80c   : > { %2328 = vmatprep.subr.bf16.mxu0 (!%p2717_p5), %v3044_v43 }
 0x8dd   : > { %v2798_v13 = vpop.f32.mrb[12].mxu0 }
 0x8de   : > { %v2799_v45 = vpop.f32.mrb[13].mxu0 }
 0x8df   : > { %v2800_v3 = vadd.f32 %v2799_v45, %v2798_v13  ;;  %v2801_v4 = vpop.f32.mrb[14].mxu0 }
 0x8e0   : > { %v2802_v2 = vpop.f32.mrb[15].mxu0 }
 0x8e1   : > { %v2181_v11 = vadd.f32 %v2800_v3, %v2698_v10 }
 0x8e3   : > { %v2186_v14 = vadd.f32 %v2181_v11, %v1847_v18  ;;  %v3046_v18 = vld [vmem:[%s3764_s9 + $0x10] ss:$8 sps:$4 sm:$0xff] (!%p2717_p5)  }
 0x8e4   : > { %2329 = vmatpush1.bf16.msra.mxu0 (!%p2717_p5), %v3046_v18 }
 0x8e5   : > { %v2189_v20 = vsel %vm1153_vm1, %v2186_v14, 0.0  ;;  %2330 = vmatprep.subr.bf16.mxu0 (!%p2717_p5), %v3047_v24 }
 0x8e6   : > { %2190 = vadd.xlane.f32.xlu0 %v2189_v20 }
 0x8e8   : > { %2331 = vmatpush1.bf16.msra.mxu0 (!%p2717_p5), %v3049_v44 }
 0x8e9   : > { %2332 = vmatprep.subr.bf16.mxu0 (!%p2717_p5), %v3050_v46 }
 0x8ec   : > { %2333 = vmatpush1.bf16.msra.mxu0 (!%p2717_p5), %v3052_v12 }
 0x8ed   : > { %2334 = vmatprep.subr.bf16.mxu0 (!%p2717_p5), %v3053_v47 }
 0x8f0   : > { %2335 = vmatpush1.bf16.msra.mxu0 (!%p2717_p5), %v3055_v16 }
 0x8f1   : > { %2336 = vmatprep.subr.bf16.mxu0 (!%p2717_p5), %v3056_v48 }
 0x8f4   : > { %2337 = vmatpush1.bf16.msra.mxu0 (!%p2717_p5), %v3058_v19 }
 0x8f5   : > { %2338 = vmatprep.subr.bf16.mxu0 (!%p2717_p5), %v3059_v49 }
 0x8f8   : > { %2339 = vmatpush1.bf16.msra.mxu0 (!%p2717_p5), %v3061_v50 }
 0x8f9   : > { %2340 = vmatprep.subr.bf16.mxu0 (!%p2717_p5), %v3062_v51 }
 0x8fc   : > { %2341 = vmatpush1.bf16.msra.mxu0 (!%p2717_p5), %v3064_v52 }
 0x973   : > { %v2191_v23 = vpop.xlane.xlu0 %2190 }
 0x974   : > { %v2192_v55 = vmul.f32 0.0078125, %v2191_v23 }
 0x976   : > { %v2193_v15 = vsub.f32 %v2186_v14, %v2192_v55 }
 0x978   : > { %v2194_v17 = vmul.f32 %v2193_v15, %v2193_v15 }
 0x97a   : > { %v2195_v27 = vsel %vm1153_vm1, %v2194_v17, 0.0 }
 0x97b   : > { %2196 = vadd.xlane.f32.xlu1 %v2195_v27 }
 0xa08   : > { %v2197_v28 = vpop.xlane.xlu1 %2196 }
 0xa09   : > { %v2198_v31 = vmul.f32 0.0078125, %v2197_v28 }
 0xa0b   : > { %v2199_v32 = vadd.f32 1e-05, %v2198_v31 }
 0xa0d   : > { %3039 = vrsqrt.f32 %v2199_v32 }
 0xa17   : > { %v3040_v22 = vpop.eup %3039 }
 0xa18   : > { %v2201_v34 = vmul.f32 %v3040_v22, %v2193_v15  ;;  %2216 = sbr.rel (%p2717_p5) target bundleno = 2810 (0xafa), region = 112 }
 0xa1a   : > { %v2206_v36 = vmul.f32 %v2715_v33, %v2201_v34 }
 0xa1c   : > { %v2211_v37 = vadd.f32 %v2716_v35, %v2206_v36 }
 0xa1e   : > { %2212 = vst [vmem:[#allocation2] sm:$0x3] %v2211_v37  ;;  %v2217_v53 = vpack.c.bf16 (!%p2717_p5), %v2211_v37, %v2211_v37 }
 0xa20   : > { %2359 = vmatmul.mubr.bf16.vlgmr.msra.gmra.mrb[0].mxu0 %v2217_v53 }
 0xaf3   : > { %v2360_v56 = vpop.f32.mrb[0].mxu0 }
 0xaf4   : > { %v2361_v30 = vadd.f32 %v2360_v56, %v2239_v41  ;;  %v2362_v57 = vpop.f32.mrb[1].mxu0 }
 0xaf5   : > { %v2363_v40 = vadd.f32 %v2362_v57, %v2243_v54  ;;  %v2364_v58 = vpop.f32.mrb[2].mxu0 }
 0xaf6   : > { %v2365_v59 = vpop.f32.mrb[3].mxu0 }
 0xaf7   : > { %v2369_v60 = vcombine.low %v2361_v30, %v2363_v40 }
 0xaf9   : > { %2734 = vst.sshfl [vmem:[#allocation3] sm:$0x33 pattern:$0x76325410] %v2369_v60 }
 0xafa PF: > { %s3766_s1 = sld [smem:[#allocation7_spill]]  ;;  %s3107_s23 = smov [#allocation3]  }
 0xafb   : > { %s2386_s27 = sshll.u32 %s3107_s23, 4  ;;  %s2387_s27 = int_to_ptr.vmem [resolvable:$true] %s2386_s27 }
 0xafc   : > { %s3065_s4 = scalar_lea.vmem %s2387_s27, 64  ;;  %p3072_p10 = scmp.lt.s32.totalorder %s2387_s27, %s2387_s27 }
 0xafd   : > { %p3066_p7 = scmp.ne.s32.totalorder %s2387_s27, %s3065_s4  ;;  %p3073_p11 = scmp.lt.s32.totalorder %s3065_s4, %s3065_s4 }
 0xaff   : > { %p3074_p12 = por %p3073_p11, %p3072_p10 }
 0xb00   : > { %p2888_p6 = scmp.eq.s32.totalorder %s3766_s1, 1 }
 0xb02   : > { %p3067_p8 = pnand %p3066_p7, %p2888_p6 }
 0xb04   : > { %p3068_p9 = pneg %p3067_p8 }
 0xb06   : > { %p3075_p13 = pnand %p3074_p12, %p3068_p9 }
 0xb08   : > { %3078 = shalt.err (!%p3075_p13)
}
 0xb09   : > { %s3767_s10 = sld [smem:[#allocation24_spill]] }
 0xb0f   : > { %s3079_s11 = scalar_lea.hbm %s3767_s10, 64 }
 0xb10   : > { %p3080_p0 = scmp.ne.s32.totalorder %s3767_s10, %s3079_s11  ;;  %p3085_p3 = scmp.lt.u32.totalorder %s3079_s11, %s3767_s10 }
 0xb12   : > { %p3081_p1 = pnand %p3080_p0, %p2888_p6 }
 0xb14   : > { %p3082_p2 = pneg %p3081_p1 }
 0xb16   : > { %p3087_p4 = pnand %p3085_p3, %p3082_p2 }
 0xb18   : > { %3090 = shalt.err (!%p3087_p4)
}
 0xb19   : > { %2885 = dma.vmem_to_hbm [thread:$0]  (%p2888_p6), %s2387_s27, 64, %s3767_s10, [#allocation4]  }
 0xb1a   : > { %3096 = dma.done.wait (%p2888_p6), [#allocation4], 64  }
 0xb1b   : > { %3098 = vsyncadd (%p2888_p6), [#allocation4], 4294967232 }
 0xb1c PF: > { %s3768_s21 = sld [smem:[#allocation6_spill]] }
 0xb22   : > { %s32_s2 = sadd.s32 1, %s3768_s21  }
 0xb23   : > { %p29_p5 = scmp.ge.s32.totalorder %s32_s2, 4  }
 0xb25   :  { %31 = sbr.rel (!%p29_p5) target bundleno = 18 (0x12), region = 187 }
 0xb2c   :  { %2399 = vsyncpa [#allocation4], 1 }
 0xb2d   :  { %2401 = vsyncpa [#allocation4 + $0x1], 1 }

</bundles_post_ra>
